<compile_context>
chip_gen: v7x
topology: tpu7x:2x2x1
jax: 0.10.0
libtpu: 0.0.40
codegen_flags: <defaults>
</compile_context>

<pallas_src>
import functools

import jax
import jax.numpy as jnp
from jax.experimental import pallas as pl
from jax.experimental.pallas import tpu as pltpu

NEG_INF = -1e20


# --------------------------------------------------------------------------
# Fully fused forward kernel: one batch element per grid step.
# --------------------------------------------------------------------------
def _fused_forward_kernel(
        x_ref, z_ref, trg_mask_ref, src_mask_ref, pos_ref,
        w_emb_ref, b_emb_ref, w_z_ref, b_z_ref,
        wqkv_s_ref, wo_s_ref, bo_s_ref,
        wqkv_c_ref, wo_c_ref, bo_c_ref,
        wf1_ref, bf1_ref, wf2_ref, bf2_ref,
        gam_ref, bet_ref,
        w_out_ref, b_out_ref,
        o_ref, *, num_layers, heads, head_dim, embed_size):
    x = x_ref[0]                        # (L,  Din)
    z = z_ref[0]                        # (Lz, Dz)
    pos = pos_ref[...]                  # (L,  E)

    scale = 1.0 / jnp.sqrt(jnp.float32(embed_size))

    # Masks -> additive bias, computed ONCE (hoisted out of layers and heads).
    bias_self = jnp.where(trg_mask_ref[0] == 0.0, NEG_INF, 0.0)    # (L, L)
    bias_cross = jnp.where(src_mask_ref[0] == 0.0, NEG_INF, 0.0)   # (1, Lz)

    def layer_norm(v, g, b):
        mu = jnp.mean(v, axis=-1, keepdims=True)
        var = jnp.mean((v - mu) ** 2, axis=-1, keepdims=True)
        return (v - mu) * jax.lax.rsqrt(var + 1e-5) * g + b

    def mha(q_in, kv_in, bias, wqkv, wo, bo):
        # wqkv[i] is a block-diagonal (E, E) matrix built from the shared
        # per-head (head_dim, head_dim) weight, so one full-width matmul per
        # projection replaces `heads` tiny per-head matmuls.  The softmax
        # scale is folded into Q (numerically equivalent to the reference's
        # masked_fill(-1e20) followed by softmax(energy / sqrt(E))).
        q = jnp.dot(q_in, wqkv[0], preferred_element_type=jnp.float32) * scale
        k = jnp.dot(kv_in, wqkv[1], preferred_element_type=jnp.float32)
        v = jnp.dot(kv_in, wqkv[2], preferred_element_type=jnp.float32)
        head_outs = []
        for hh in range(heads):
            sl = slice(hh * head_dim, (hh + 1) * head_dim)
            energy = jnp.dot(q[:, sl], k[:, sl].T,
                             preferred_element_type=jnp.float32) + bias
            m = jnp.max(energy, axis=-1, keepdims=True)
            p = jnp.exp(energy - m)
            inv = pl.reciprocal(jnp.sum(p, axis=-1, keepdims=True), approx=True)
            head_outs.append(
                jnp.dot(p * inv, v[:, sl], preferred_element_type=jnp.float32))
        cat = jnp.concatenate(head_outs, axis=-1)                  # (Lq, E)
        return jnp.dot(cat, wo, preferred_element_type=jnp.float32) + bo

    # Motion embedding + positional embedding (dropout = identity, eval mode).
    h = (jnp.dot(x, w_emb_ref[...], preferred_element_type=jnp.float32)
         + b_emb_ref[...] + pos)
    # Latent projection dim_latent -> embed_size.
    z_emb = (jnp.dot(z, w_z_ref[...], preferred_element_type=jnp.float32)
             + b_z_ref[...])

    for l in range(num_layers):
        gam = gam_ref[l]                # (3, E)
        bet = bet_ref[l]                # (3, E)

        # DecoderBlock: masked self-attention + residual + LayerNorm.
        self_att = mha(h, h, bias_self, wqkv_s_ref[l], wo_s_ref[l], bo_s_ref[l])
        query = layer_norm(self_att + h, gam[0:1], bet[0:1])

        # TransformerBlock: cross-attention on latent z + residual + LayerNorm.
        cross_att = mha(query, z_emb, bias_cross,
                        wqkv_c_ref[l], wo_c_ref[l], bo_c_ref[l])
        h1 = layer_norm(cross_att + query, gam[1:2], bet[1:2])

        # Feed-forward (Linear -> ReLU -> Linear) + residual + LayerNorm.
        ff_hidden = jnp.maximum(
            jnp.dot(h1, wf1_ref[l], preferred_element_type=jnp.float32)
            + bf1_ref[l], 0.0)
        ff = (jnp.dot(ff_hidden, wf2_ref[l], preferred_element_type=jnp.float32)
              + bf2_ref[l])
        h = layer_norm(ff + h1, gam[2:3], bet[2:3])

    # Output linear (fc_out) fused into the same kernel.
    o_ref[0] = (jnp.dot(h, w_out_ref[...], preferred_element_type=jnp.float32)
                + b_out_ref[...])


# --------------------------------------------------------------------------
# Wrapper: stacks per-layer weights, builds block-diagonal QKV projections,
# and issues a single pallas_call over the batch.
# --------------------------------------------------------------------------
def motion_decoder_transformers_forward(params, x, z, src_mask, trg_mask,
                                        *, heads, embed_size):
    N, L, Din = x.shape
    _, Lz, Dz = z.shape
    layers = params["layers"]
    num_layers = len(layers)
    head_dim = embed_size // heads
    Dout = params["w_out"].shape[1]

    eye = jnp.eye(heads, dtype=jnp.float32)

    def blockdiag3(w3):   # (3, d, d) -> (3, E, E) block-diagonal
        return jnp.stack([jnp.kron(eye, w3[i]) for i in range(3)], axis=0)

    def stack(name):
        return jnp.stack([lp[name] for lp in layers], axis=0)

    wqkv_s = jnp.stack([blockdiag3(lp["wqkv_s"]) for lp in layers], axis=0)
    wqkv_c = jnp.stack([blockdiag3(lp["wqkv_c"]) for lp in layers], axis=0)
    wo_s, bo_s = stack("wo_s"), stack("bo_s")
    wo_c, bo_c = stack("wo_c"), stack("bo_c")
    wf1, bf1 = stack("wf1"), stack("bf1")
    wf2, bf2 = stack("wf2"), stack("bf2")
    gammas, betas = stack("gammas"), stack("betas")

    pos = params["pos_emb"][:L]                      # (L, E)

    kernel = functools.partial(_fused_forward_kernel, num_layers=num_layers,
                               heads=heads, head_dim=head_dim,
                               embed_size=embed_size)

    def shared_spec(a):
        # Full-extent block, identical across grid steps (no re-DMA per step).
        return pl.BlockSpec(a.shape, lambda n, _nd=a.ndim: (0,) * _nd)

    return pl.pallas_call(
        kernel,
        out_shape=jax.ShapeDtypeStruct((N, L, Dout), jnp.float32),
        grid=(N,),
        in_specs=[
            pl.BlockSpec((1, L, Din), lambda n: (n, 0, 0)),
            pl.BlockSpec((1, Lz, Dz), lambda n: (n, 0, 0)),
            pl.BlockSpec((1, L, L), lambda n: (n, 0, 0)),
            pl.BlockSpec((1, 1, Lz), lambda n: (n, 0, 0)),
            shared_spec(pos),
            shared_spec(params["w_emb"]), shared_spec(params["b_emb"]),
            shared_spec(params["w_z"]), shared_spec(params["b_z"]),
            shared_spec(wqkv_s), shared_spec(wo_s), shared_spec(bo_s),
            shared_spec(wqkv_c), shared_spec(wo_c), shared_spec(bo_c),
            shared_spec(wf1), shared_spec(bf1),
            shared_spec(wf2), shared_spec(bf2),
            shared_spec(gammas), shared_spec(betas),
            shared_spec(params["w_out"]), shared_spec(params["b_out"]),
        ],
        out_specs=pl.BlockSpec((1, L, Dout), lambda n: (n, 0, 0)),
        compiler_params=pltpu.CompilerParams(
            dimension_semantics=("parallel",)),   # v7x: batch across both TCs
    )(x, z, trg_mask, src_mask, pos,
      params["w_emb"], params["b_emb"], params["w_z"], params["b_z"],
      wqkv_s, wo_s, bo_s, wqkv_c, wo_c, bo_c,
      wf1, bf1, wf2, bf2, gammas, betas,
      params["w_out"], params["b_out"])


# --------------------------------------------------------------------------
# Parameter init (deterministic, synthetic)
# --------------------------------------------------------------------------
def init_params(key, *, motion_feature_dim, embed_size, dim_latent,
                num_layers, heads, forward_expansion, max_motion_length):
    head_dim = embed_size // heads
    ff = forward_expansion * embed_size
    keys = iter(jax.random.split(key, 8 + num_layers * 8))

    def w(shape, scale=0.05):
        return scale * jax.random.normal(next(keys), shape, jnp.float32)

    params = {
        "w_emb": w((motion_feature_dim, embed_size)),
        "b_emb": jnp.zeros((1, embed_size), jnp.float32),
        "pos_emb": w((max_motion_length, embed_size)),
        "w_z": w((dim_latent, embed_size)),
        "b_z": jnp.zeros((1, embed_size), jnp.float32),
        "w_out": w((embed_size, motion_feature_dim)),
        "b_out": jnp.zeros((1, motion_feature_dim), jnp.float32),
        "layers": [],
    }
    for _ in range(num_layers):
        params["layers"].append({
            "wqkv_s": w((3, head_dim, head_dim)),
            "wo_s": w((embed_size, embed_size)),
            "bo_s": jnp.zeros((1, embed_size), jnp.float32),
            "wqkv_c": w((3, head_dim, head_dim)),
            "wo_c": w((embed_size, embed_size)),
            "bo_c": jnp.zeros((1, embed_size), jnp.float32),
            "wf1": w((embed_size, ff)),
            "bf1": jnp.zeros((1, ff), jnp.float32),
            "wf2": w((ff, embed_size)),
            "bf2": jnp.zeros((1, embed_size), jnp.float32),
            "gammas": jnp.ones((3, embed_size), jnp.float32),
            "betas": jnp.zeros((3, embed_size), jnp.float32),
        })
    return params


if __name__ == "__main__":
    # Small, forward-consistent shapes.
    motion_feature_dim = 16
    embed_size = 32
    dim_latent = 32
    num_latents = 8
    num_layers = 2
    heads = 4
    forward_expansion = 4
    max_motion_length = 16
    N, L = 2, 8

    key = jax.random.PRNGKey(0)
    kp, kx, kz = jax.random.split(key, 3)

    params = init_params(
        kp, motion_feature_dim=motion_feature_dim, embed_size=embed_size,
        dim_latent=dim_latent, num_layers=num_layers, heads=heads,
        forward_expansion=forward_expansion,
        max_motion_length=max_motion_length)

    x = jax.random.normal(kx, (N, L, motion_feature_dim), jnp.float32)
    z = jax.random.normal(kz, (N, num_latents, dim_latent), jnp.float32)
    trg_mask = jnp.tile(jnp.tril(jnp.ones((L, L), jnp.float32))[None], (N, 1, 1))
    src_mask = jnp.ones((N, 1, num_latents), jnp.float32)

    # TODO(synk): transformer_modules.Motion_Decoder source is not provided;
    # the latent z is projected dim_latent -> embed_size with a learned linear,
    # the standard pattern implied by (dim_latent, num_latents) in __init__.
    fwd = jax.jit(functools.partial(motion_decoder_transformers_forward,
                                    heads=heads, embed_size=embed_size))
    out = fwd(params, x, z, src_mask, trg_mask)
    out = jax.block_until_ready(out)
    assert out.shape == (N, L, motion_feature_dim)
    assert bool(jnp.all(jnp.isfinite(out)))
    print("KERNEL_OK")
</pallas_src>

<mosaic_0001>
module attributes {stable_mosaic.version = 11 : i64} {
  func.func @_fused_forward_kernel(%arg0: i32, %arg1: memref<1x8x16xf32, #tpu.memory_space<vmem>>, %arg2: memref<1x8x32xf32, #tpu.memory_space<vmem>>, %arg3: memref<1x8x8xf32, #tpu.memory_space<vmem>>, %arg4: memref<1x1x8xf32, #tpu.memory_space<vmem>>, %arg5: memref<8x32xf32, #tpu.memory_space<vmem>>, %arg6: memref<16x32xf32, #tpu.memory_space<vmem>>, %arg7: memref<1x32xf32, #tpu.memory_space<vmem>>, %arg8: memref<32x32xf32, #tpu.memory_space<vmem>>, %arg9: memref<1x32xf32, #tpu.memory_space<vmem>>, %arg10: memref<2x3x32x32xf32, #tpu.memory_space<vmem>>, %arg11: memref<2x32x32xf32, #tpu.memory_space<vmem>>, %arg12: memref<2x1x32xf32, #tpu.memory_space<vmem>>, %arg13: memref<2x3x32x32xf32, #tpu.memory_space<vmem>>, %arg14: memref<2x32x32xf32, #tpu.memory_space<vmem>>, %arg15: memref<2x1x32xf32, #tpu.memory_space<vmem>>, %arg16: memref<2x32x128xf32, #tpu.memory_space<vmem>>, %arg17: memref<2x1x128xf32, #tpu.memory_space<vmem>>, %arg18: memref<2x128x32xf32, #tpu.memory_space<vmem>>, %arg19: memref<2x1x32xf32, #tpu.memory_space<vmem>>, %arg20: memref<2x3x32xf32, #tpu.memory_space<vmem>>, %arg21: memref<2x3x32xf32, #tpu.memory_space<vmem>>, %arg22: memref<32x16xf32, #tpu.memory_space<vmem>>, %arg23: memref<1x16xf32, #tpu.memory_space<vmem>>, %arg24: memref<1x8x16xf32, #tpu.memory_space<vmem>>) attributes {dimension_semantics = [#tpu.dimension_semantics<parallel>], iteration_bounds = array<i64: 2>, scalar_prefetch = 0 : i64, scratch_operands = 0 : i64, tpu.core_type = #tpu.core_type<tc>, window_params = [{transform_indices = @transform_0, window_bounds = array<i64: 1, 8, 16>}, {transform_indices = @transform_1, window_bounds = array<i64: 1, 8, 32>}, {transform_indices = @transform_2, window_bounds = array<i64: 1, 8, 8>}, {transform_indices = @transform_3, window_bounds = array<i64: 1, 1, 8>}, {pipeline_mode = #tpu.pipeline_mode<synchronous>, transform_indices = @transform_4, window_bounds = array<i64: 8, 32>}, {pipeline_mode = #tpu.pipeline_mode<synchronous>, transform_indices = @transform_5, window_bounds = array<i64: 16, 32>}, {pipeline_mode = #tpu.pipeline_mode<synchronous>, transform_indices = @transform_6, window_bounds = array<i64: 1, 32>}, {pipeline_mode = #tpu.pipeline_mode<synchronous>, transform_indices = @transform_7, window_bounds = array<i64: 32, 32>}, {pipeline_mode = #tpu.pipeline_mode<synchronous>, transform_indices = @transform_8, window_bounds = array<i64: 1, 32>}, {pipeline_mode = #tpu.pipeline_mode<synchronous>, transform_indices = @transform_9, window_bounds = array<i64: 2, 3, 32, 32>}, {pipeline_mode = #tpu.pipeline_mode<synchronous>, transform_indices = @transform_10, window_bounds = array<i64: 2, 32, 32>}, {pipeline_mode = #tpu.pipeline_mode<synchronous>, transform_indices = @transform_11, window_bounds = array<i64: 2, 1, 32>}, {pipeline_mode = #tpu.pipeline_mode<synchronous>, transform_indices = @transform_12, window_bounds = array<i64: 2, 3, 32, 32>}, {pipeline_mode = #tpu.pipeline_mode<synchronous>, transform_indices = @transform_13, window_bounds = array<i64: 2, 32, 32>}, {pipeline_mode = #tpu.pipeline_mode<synchronous>, transform_indices = @transform_14, window_bounds = array<i64: 2, 1, 32>}, {pipeline_mode = #tpu.pipeline_mode<synchronous>, transform_indices = @transform_15, window_bounds = array<i64: 2, 32, 128>}, {pipeline_mode = #tpu.pipeline_mode<synchronous>, transform_indices = @transform_16, window_bounds = array<i64: 2, 1, 128>}, {pipeline_mode = #tpu.pipeline_mode<synchronous>, transform_indices = @transform_17, window_bounds = array<i64: 2, 128, 32>}, {pipeline_mode = #tpu.pipeline_mode<synchronous>, transform_indices = @transform_18, window_bounds = array<i64: 2, 1, 32>}, {pipeline_mode = #tpu.pipeline_mode<synchronous>, transform_indices = @transform_19, window_bounds = array<i64: 2, 3, 32>}, {pipeline_mode = #tpu.pipeline_mode<synchronous>, transform_indices = @transform_20, window_bounds = array<i64: 2, 3, 32>}, {pipeline_mode = #tpu.pipeline_mode<synchronous>, transform_indices = @transform_21, window_bounds = array<i64: 32, 16>}, {pipeline_mode = #tpu.pipeline_mode<synchronous>, transform_indices = @transform_22, window_bounds = array<i64: 1, 16>}, {transform_indices = @transform_23, window_bounds = array<i64: 1, 8, 16>}]} {
    %c0 = arith.constant 0 : index
    %c0_0 = arith.constant 0 : index
    %c0_1 = arith.constant 0 : index
    %0 = vector.load %arg1[%c0, %c0_0, %c0_1] : memref<1x8x16xf32, #tpu.memory_space<vmem>>, vector<1x8x16xf32>
    %1 = vector.shape_cast %0 : vector<1x8x16xf32> to vector<8x16xf32>
    %c0_2 = arith.constant 0 : index
    %c0_3 = arith.constant 0 : index
    %c0_4 = arith.constant 0 : index
    %2 = vector.load %arg2[%c0_2, %c0_3, %c0_4] : memref<1x8x32xf32, #tpu.memory_space<vmem>>, vector<1x8x32xf32>
    %3 = vector.shape_cast %2 : vector<1x8x32xf32> to vector<8x32xf32>
    %c0_5 = arith.constant 0 : index
    %c0_6 = arith.constant 0 : index
    %4 = vector.load %arg5[%c0_5, %c0_6] : memref<8x32xf32, #tpu.memory_space<vmem>>, vector<8x32xf32>
    %cst = arith.constant 3.200000e+01 : f32
    %5 = math.sqrt %cst : f32
    %cst_7 = arith.constant 1.000000e+00 : f32
    %6 = arith.divf %cst_7, %5 : f32
    %c0_8 = arith.constant 0 : index
    %c0_9 = arith.constant 0 : index
    %c0_10 = arith.constant 0 : index
    %7 = vector.load %arg3[%c0_8, %c0_9, %c0_10] : memref<1x8x8xf32, #tpu.memory_space<vmem>>, vector<1x8x8xf32>
    %8 = vector.shape_cast %7 : vector<1x8x8xf32> to vector<8x8xf32>
    %cst_11 = arith.constant 0.000000e+00 : f32
    %9 = vector.broadcast %cst_11 : f32 to vector<8x8xf32>
    %10 = arith.cmpf oeq, %8, %9 : vector<8x8xf32>
    %cst_12 = arith.constant -1.000000e+20 : f32
    %cst_13 = arith.constant 0.000000e+00 : f32
    %11 = vector.broadcast %cst_12 : f32 to vector<8x8xf32>
    %12 = vector.broadcast %cst_13 : f32 to vector<8x8xf32>
    %13 = arith.select %10, %11, %12 : vector<8x8xi1>, vector<8x8xf32>
    %c0_14 = arith.constant 0 : index
    %c0_15 = arith.constant 0 : index
    %c0_16 = arith.constant 0 : index
    %14 = vector.load %arg4[%c0_14, %c0_15, %c0_16] : memref<1x1x8xf32, #tpu.memory_space<vmem>>, vector<1x1x8xf32>
    %15 = vector.shape_cast %14 : vector<1x1x8xf32> to vector<1x8xf32>
    %cst_17 = arith.constant 0.000000e+00 : f32
    %16 = vector.broadcast %cst_17 : f32 to vector<1x8xf32>
    %17 = arith.cmpf oeq, %15, %16 : vector<1x8xf32>
    %cst_18 = arith.constant -1.000000e+20 : f32
    %cst_19 = arith.constant 0.000000e+00 : f32
    %18 = vector.broadcast %cst_18 : f32 to vector<1x8xf32>
    %19 = vector.broadcast %cst_19 : f32 to vector<1x8xf32>
    %20 = arith.select %17, %18, %19 : vector<1x8xi1>, vector<1x8xf32>
    %c0_20 = arith.constant 0 : index
    %c0_21 = arith.constant 0 : index
    %21 = vector.load %arg6[%c0_20, %c0_21] : memref<16x32xf32, #tpu.memory_space<vmem>>, vector<16x32xf32>
    %cst_22 = arith.constant dense<0.000000e+00> : vector<8x32xf32>
    %22 = tpu.matmul %1, %21, %cst_22 {dimension_numbers = #tpu.dot_dimension_numbers<[1], [0], [0], [1], [0, 0, 1, 1], [], []>} : vector<8x16xf32>, vector<16x32xf32>, vector<8x32xf32> -> vector<8x32xf32>
    %c0_23 = arith.constant 0 : index
    %c0_24 = arith.constant 0 : index
    %23 = vector.load %arg7[%c0_23, %c0_24] : memref<1x32xf32, #tpu.memory_space<vmem>>, vector<1x32xf32>
    %24 = vector.broadcast %23 : vector<1x32xf32> to vector<8x32xf32>
    %25 = arith.addf %22, %24 : vector<8x32xf32>
    %26 = arith.addf %25, %4 : vector<8x32xf32>
    %c0_25 = arith.constant 0 : index
    %c0_26 = arith.constant 0 : index
    %27 = vector.load %arg8[%c0_25, %c0_26] : memref<32x32xf32, #tpu.memory_space<vmem>>, vector<32x32xf32>
    %cst_27 = arith.constant dense<0.000000e+00> : vector<8x32xf32>
    %28 = tpu.matmul %3, %27, %cst_27 {dimension_numbers = #tpu.dot_dimension_numbers<[1], [0], [0], [1], [0, 0, 1, 1], [], []>} : vector<8x32xf32>, vector<32x32xf32>, vector<8x32xf32> -> vector<8x32xf32>
    %c0_28 = arith.constant 0 : index
    %c0_29 = arith.constant 0 : index
    %29 = vector.load %arg9[%c0_28, %c0_29] : memref<1x32xf32, #tpu.memory_space<vmem>>, vector<1x32xf32>
    %30 = vector.broadcast %29 : vector<1x32xf32> to vector<8x32xf32>
    %31 = arith.addf %28, %30 : vector<8x32xf32>
    %c0_30 = arith.constant 0 : index
    %c0_31 = arith.constant 0 : index
    %c0_32 = arith.constant 0 : index
    %32 = vector.load %arg20[%c0_30, %c0_31, %c0_32] : memref<2x3x32xf32, #tpu.memory_space<vmem>>, vector<1x3x32xf32>
    %33 = vector.shape_cast %32 : vector<1x3x32xf32> to vector<3x32xf32>
    %c0_33 = arith.constant 0 : index
    %c0_34 = arith.constant 0 : index
    %c0_35 = arith.constant 0 : index
    %34 = vector.load %arg21[%c0_33, %c0_34, %c0_35] : memref<2x3x32xf32, #tpu.memory_space<vmem>>, vector<1x3x32xf32>
    %35 = vector.shape_cast %34 : vector<1x3x32xf32> to vector<3x32xf32>
    %c0_36 = arith.constant 0 : index
    %c0_37 = arith.constant 0 : index
    %c0_38 = arith.constant 0 : index
    %c0_39 = arith.constant 0 : index
    %36 = vector.load %arg10[%c0_36, %c0_37, %c0_38, %c0_39] : memref<2x3x32x32xf32, #tpu.memory_space<vmem>>, vector<1x3x32x32xf32>
    %37 = vector.shape_cast %36 : vector<1x3x32x32xf32> to vector<3x32x32xf32>
    %c0_40 = arith.constant 0 : index
    %c0_41 = arith.constant 0 : index
    %c0_42 = arith.constant 0 : index
    %38 = vector.load %arg11[%c0_40, %c0_41, %c0_42] : memref<2x32x32xf32, #tpu.memory_space<vmem>>, vector<1x32x32xf32>
    %39 = vector.shape_cast %38 : vector<1x32x32xf32> to vector<32x32xf32>
    %c0_43 = arith.constant 0 : index
    %c0_44 = arith.constant 0 : index
    %c0_45 = arith.constant 0 : index
    %40 = vector.load %arg12[%c0_43, %c0_44, %c0_45] : memref<2x1x32xf32, #tpu.memory_space<vmem>>, vector<1x1x32xf32>
    %41 = vector.shape_cast %40 : vector<1x1x32xf32> to vector<1x32xf32>
    %42 = vector.extract_strided_slice %37 {offsets = [0, 0, 0], sizes = [1, 32, 32], strides = [1, 1, 1]} : vector<3x32x32xf32> to vector<1x32x32xf32>
    %43 = vector.shape_cast %42 : vector<1x32x32xf32> to vector<32x32xf32>
    %cst_46 = arith.constant dense<0.000000e+00> : vector<8x32xf32>
    %44 = tpu.matmul %26, %43, %cst_46 {dimension_numbers = #tpu.dot_dimension_numbers<[1], [0], [0], [1], [0, 0, 1, 1], [], []>} : vector<8x32xf32>, vector<32x32xf32>, vector<8x32xf32> -> vector<8x32xf32>
    %45 = vector.broadcast %6 : f32 to vector<8x32xf32>
    %46 = arith.mulf %44, %45 : vector<8x32xf32>
    %47 = vector.extract_strided_slice %37 {offsets = [1, 0, 0], sizes = [1, 32, 32], strides = [1, 1, 1]} : vector<3x32x32xf32> to vector<1x32x32xf32>
    %48 = vector.shape_cast %47 : vector<1x32x32xf32> to vector<32x32xf32>
    %cst_47 = arith.constant dense<0.000000e+00> : vector<8x32xf32>
    %49 = tpu.matmul %26, %48, %cst_47 {dimension_numbers = #tpu.dot_dimension_numbers<[1], [0], [0], [1], [0, 0, 1, 1], [], []>} : vector<8x32xf32>, vector<32x32xf32>, vector<8x32xf32> -> vector<8x32xf32>
    %50 = vector.extract_strided_slice %37 {offsets = [2, 0, 0], sizes = [1, 32, 32], strides = [1, 1, 1]} : vector<3x32x32xf32> to vector<1x32x32xf32>
    %51 = vector.shape_cast %50 : vector<1x32x32xf32> to vector<32x32xf32>
    %cst_48 = arith.constant dense<0.000000e+00> : vector<8x32xf32>
    %52 = tpu.matmul %26, %51, %cst_48 {dimension_numbers = #tpu.dot_dimension_numbers<[1], [0], [0], [1], [0, 0, 1, 1], [], []>} : vector<8x32xf32>, vector<32x32xf32>, vector<8x32xf32> -> vector<8x32xf32>
    %53 = vector.extract_strided_slice %46 {offsets = [0, 0], sizes = [8, 8], strides = [1, 1]} : vector<8x32xf32> to vector<8x8xf32>
    %54 = vector.extract_strided_slice %49 {offsets = [0, 0], sizes = [8, 8], strides = [1, 1]} : vector<8x32xf32> to vector<8x8xf32>
    %55 = tpu.transpose %54, [1, 0] : vector<8x8xf32> -> vector<8x8xf32>
    %cst_49 = arith.constant dense<0.000000e+00> : vector<8x8xf32>
    %56 = tpu.matmul %53, %55, %cst_49 {dimension_numbers = #tpu.dot_dimension_numbers<[1], [0], [0], [1], [0, 0, 1, 1], [], []>} : vector<8x8xf32>, vector<8x8xf32>, vector<8x8xf32> -> vector<8x8xf32>
    %57 = arith.addf %56, %13 : vector<8x8xf32>
    %cst_50 = arith.constant dense<0xFF800000> : vector<8xf32>
    %58 = vector.multi_reduction <maximumf>, %57, %cst_50 [1] : vector<8x8xf32> to vector<8xf32>
    %59 = vector.shape_cast %58 : vector<8xf32> to vector<8x1xf32>
    %60 = vector.broadcast %59 : vector<8x1xf32> to vector<8x8xf32>
    %61 = arith.subf %57, %60 : vector<8x8xf32>
    %62 = math.exp %61 : vector<8x8xf32>
    %cst_51 = arith.constant dense<0.000000e+00> : vector<8xf32>
    %63 = vector.multi_reduction <add>, %62, %cst_51 [1] : vector<8x8xf32> to vector<8xf32>
    %64 = vector.shape_cast %63 : vector<8xf32> to vector<8x1xf32>
    %65 = tpu.reciprocal %64 {approx = true} : vector<8x1xf32> -> vector<8x1xf32>
    %66 = vector.broadcast %65 : vector<8x1xf32> to vector<8x8xf32>
    %67 = arith.mulf %62, %66 : vector<8x8xf32>
    %68 = vector.extract_strided_slice %52 {offsets = [0, 0], sizes = [8, 8], strides = [1, 1]} : vector<8x32xf32> to vector<8x8xf32>
    %cst_52 = arith.constant dense<0.000000e+00> : vector<8x8xf32>
    %69 = tpu.matmul %67, %68, %cst_52 {dimension_numbers = #tpu.dot_dimension_numbers<[1], [0], [0], [1], [0, 0, 1, 1], [], []>} : vector<8x8xf32>, vector<8x8xf32>, vector<8x8xf32> -> vector<8x8xf32>
    %70 = vector.extract_strided_slice %46 {offsets = [0, 8], sizes = [8, 8], strides = [1, 1]} : vector<8x32xf32> to vector<8x8xf32>
    %71 = vector.extract_strided_slice %49 {offsets = [0, 8], sizes = [8, 8], strides = [1, 1]} : vector<8x32xf32> to vector<8x8xf32>
    %72 = tpu.transpose %71, [1, 0] : vector<8x8xf32> -> vector<8x8xf32>
    %cst_53 = arith.constant dense<0.000000e+00> : vector<8x8xf32>
    %73 = tpu.matmul %70, %72, %cst_53 {dimension_numbers = #tpu.dot_dimension_numbers<[1], [0], [0], [1], [0, 0, 1, 1], [], []>} : vector<8x8xf32>, vector<8x8xf32>, vector<8x8xf32> -> vector<8x8xf32>
    %74 = arith.addf %73, %13 : vector<8x8xf32>
    %cst_54 = arith.constant dense<0xFF800000> : vector<8xf32>
    %75 = vector.multi_reduction <maximumf>, %74, %cst_54 [1] : vector<8x8xf32> to vector<8xf32>
    %76 = vector.shape_cast %75 : vector<8xf32> to vector<8x1xf32>
    %77 = vector.broadcast %76 : vector<8x1xf32> to vector<8x8xf32>
    %78 = arith.subf %74, %77 : vector<8x8xf32>
    %79 = math.exp %78 : vector<8x8xf32>
    %cst_55 = arith.constant dense<0.000000e+00> : vector<8xf32>
    %80 = vector.multi_reduction <add>, %79, %cst_55 [1] : vector<8x8xf32> to vector<8xf32>
    %81 = vector.shape_cast %80 : vector<8xf32> to vector<8x1xf32>
    %82 = tpu.reciprocal %81 {approx = true} : vector<8x1xf32> -> vector<8x1xf32>
    %83 = vector.broadcast %82 : vector<8x1xf32> to vector<8x8xf32>
    %84 = arith.mulf %79, %83 : vector<8x8xf32>
    %85 = vector.extract_strided_slice %52 {offsets = [0, 8], sizes = [8, 8], strides = [1, 1]} : vector<8x32xf32> to vector<8x8xf32>
    %cst_56 = arith.constant dense<0.000000e+00> : vector<8x8xf32>
    %86 = tpu.matmul %84, %85, %cst_56 {dimension_numbers = #tpu.dot_dimension_numbers<[1], [0], [0], [1], [0, 0, 1, 1], [], []>} : vector<8x8xf32>, vector<8x8xf32>, vector<8x8xf32> -> vector<8x8xf32>
    %87 = vector.extract_strided_slice %46 {offsets = [0, 16], sizes = [8, 8], strides = [1, 1]} : vector<8x32xf32> to vector<8x8xf32>
    %88 = vector.extract_strided_slice %49 {offsets = [0, 16], sizes = [8, 8], strides = [1, 1]} : vector<8x32xf32> to vector<8x8xf32>
    %89 = tpu.transpose %88, [1, 0] : vector<8x8xf32> -> vector<8x8xf32>
    %cst_57 = arith.constant dense<0.000000e+00> : vector<8x8xf32>
    %90 = tpu.matmul %87, %89, %cst_57 {dimension_numbers = #tpu.dot_dimension_numbers<[1], [0], [0], [1], [0, 0, 1, 1], [], []>} : vector<8x8xf32>, vector<8x8xf32>, vector<8x8xf32> -> vector<8x8xf32>
    %91 = arith.addf %90, %13 : vector<8x8xf32>
    %cst_58 = arith.constant dense<0xFF800000> : vector<8xf32>
    %92 = vector.multi_reduction <maximumf>, %91, %cst_58 [1] : vector<8x8xf32> to vector<8xf32>
    %93 = vector.shape_cast %92 : vector<8xf32> to vector<8x1xf32>
    %94 = vector.broadcast %93 : vector<8x1xf32> to vector<8x8xf32>
    %95 = arith.subf %91, %94 : vector<8x8xf32>
    %96 = math.exp %95 : vector<8x8xf32>
    %cst_59 = arith.constant dense<0.000000e+00> : vector<8xf32>
    %97 = vector.multi_reduction <add>, %96, %cst_59 [1] : vector<8x8xf32> to vector<8xf32>
    %98 = vector.shape_cast %97 : vector<8xf32> to vector<8x1xf32>
    %99 = tpu.reciprocal %98 {approx = true} : vector<8x1xf32> -> vector<8x1xf32>
    %100 = vector.broadcast %99 : vector<8x1xf32> to vector<8x8xf32>
    %101 = arith.mulf %96, %100 : vector<8x8xf32>
    %102 = vector.extract_strided_slice %52 {offsets = [0, 16], sizes = [8, 8], strides = [1, 1]} : vector<8x32xf32> to vector<8x8xf32>
    %cst_60 = arith.constant dense<0.000000e+00> : vector<8x8xf32>
    %103 = tpu.matmul %101, %102, %cst_60 {dimension_numbers = #tpu.dot_dimension_numbers<[1], [0], [0], [1], [0, 0, 1, 1], [], []>} : vector<8x8xf32>, vector<8x8xf32>, vector<8x8xf32> -> vector<8x8xf32>
    %104 = vector.extract_strided_slice %46 {offsets = [0, 24], sizes = [8, 8], strides = [1, 1]} : vector<8x32xf32> to vector<8x8xf32>
    %105 = vector.extract_strided_slice %49 {offsets = [0, 24], sizes = [8, 8], strides = [1, 1]} : vector<8x32xf32> to vector<8x8xf32>
    %106 = tpu.transpose %105, [1, 0] : vector<8x8xf32> -> vector<8x8xf32>
    %cst_61 = arith.constant dense<0.000000e+00> : vector<8x8xf32>
    %107 = tpu.matmul %104, %106, %cst_61 {dimension_numbers = #tpu.dot_dimension_numbers<[1], [0], [0], [1], [0, 0, 1, 1], [], []>} : vector<8x8xf32>, vector<8x8xf32>, vector<8x8xf32> -> vector<8x8xf32>
    %108 = arith.addf %107, %13 : vector<8x8xf32>
    %cst_62 = arith.constant dense<0xFF800000> : vector<8xf32>
    %109 = vector.multi_reduction <maximumf>, %108, %cst_62 [1] : vector<8x8xf32> to vector<8xf32>
    %110 = vector.shape_cast %109 : vector<8xf32> to vector<8x1xf32>
    %111 = vector.broadcast %110 : vector<8x1xf32> to vector<8x8xf32>
    %112 = arith.subf %108, %111 : vector<8x8xf32>
    %113 = math.exp %112 : vector<8x8xf32>
    %cst_63 = arith.constant dense<0.000000e+00> : vector<8xf32>
    %114 = vector.multi_reduction <add>, %113, %cst_63 [1] : vector<8x8xf32> to vector<8xf32>
    %115 = vector.shape_cast %114 : vector<8xf32> to vector<8x1xf32>
    %116 = tpu.reciprocal %115 {approx = true} : vector<8x1xf32> -> vector<8x1xf32>
    %117 = vector.broadcast %116 : vector<8x1xf32> to vector<8x8xf32>
    %118 = arith.mulf %113, %117 : vector<8x8xf32>
    %119 = vector.extract_strided_slice %52 {offsets = [0, 24], sizes = [8, 8], strides = [1, 1]} : vector<8x32xf32> to vector<8x8xf32>
    %cst_64 = arith.constant dense<0.000000e+00> : vector<8x8xf32>
    %120 = tpu.matmul %118, %119, %cst_64 {dimension_numbers = #tpu.dot_dimension_numbers<[1], [0], [0], [1], [0, 0, 1, 1], [], []>} : vector<8x8xf32>, vector<8x8xf32>, vector<8x8xf32> -> vector<8x8xf32>
    %121 = tpu.concatenate %69, %86, %103, %120 in 1 : vector<8x8xf32>, vector<8x8xf32>, vector<8x8xf32>, vector<8x8xf32> -> vector<8x32xf32>
    %cst_65 = arith.constant dense<0.000000e+00> : vector<8x32xf32>
    %122 = tpu.matmul %121, %39, %cst_65 {dimension_numbers = #tpu.dot_dimension_numbers<[1], [0], [0], [1], [0, 0, 1, 1], [], []>} : vector<8x32xf32>, vector<32x32xf32>, vector<8x32xf32> -> vector<8x32xf32>
    %123 = vector.broadcast %41 : vector<1x32xf32> to vector<8x32xf32>
    %124 = arith.addf %122, %123 : vector<8x32xf32>
    %125 = arith.addf %124, %26 : vector<8x32xf32>
    %126 = vector.extract_strided_slice %33 {offsets = [0, 0], sizes = [1, 32], strides = [1, 1]} : vector<3x32xf32> to vector<1x32xf32>
    %127 = vector.extract_strided_slice %35 {offsets = [0, 0], sizes = [1, 32], strides = [1, 1]} : vector<3x32xf32> to vector<1x32xf32>
    %cst_66 = arith.constant dense<0.000000e+00> : vector<8xf32>
    %128 = vector.multi_reduction <add>, %125, %cst_66 [1] : vector<8x32xf32> to vector<8xf32>
    %129 = vector.shape_cast %128 : vector<8xf32> to vector<8x1xf32>
    %cst_67 = arith.constant 3.200000e+01 : f32
    %130 = vector.broadcast %cst_67 : f32 to vector<8x1xf32>
    %131 = arith.divf %129, %130 : vector<8x1xf32>
    %132 = vector.broadcast %131 : vector<8x1xf32> to vector<8x32xf32>
    %133 = arith.subf %125, %132 : vector<8x32xf32>
    %134 = arith.mulf %133, %133 : vector<8x32xf32>
    %cst_68 = arith.constant dense<0.000000e+00> : vector<8xf32>
    %135 = vector.multi_reduction <add>, %134, %cst_68 [1] : vector<8x32xf32> to vector<8xf32>
    %136 = vector.shape_cast %135 : vector<8xf32> to vector<8x1xf32>
    %cst_69 = arith.constant 3.200000e+01 : f32
    %137 = vector.broadcast %cst_69 : f32 to vector<8x1xf32>
    %138 = arith.divf %136, %137 : vector<8x1xf32>
    %139 = vector.broadcast %131 : vector<8x1xf32> to vector<8x32xf32>
    %140 = arith.subf %125, %139 : vector<8x32xf32>
    %cst_70 = arith.constant 9.99999974E-6 : f32
    %141 = vector.broadcast %cst_70 : f32 to vector<8x1xf32>
    %142 = arith.addf %138, %141 : vector<8x1xf32>
    %143 = math.rsqrt %142 : vector<8x1xf32>
    %144 = vector.broadcast %143 : vector<8x1xf32> to vector<8x32xf32>
    %145 = arith.mulf %140, %144 : vector<8x32xf32>
    %146 = vector.broadcast %126 : vector<1x32xf32> to vector<8x32xf32>
    %147 = arith.mulf %145, %146 : vector<8x32xf32>
    %148 = vector.broadcast %127 : vector<1x32xf32> to vector<8x32xf32>
    %149 = arith.addf %147, %148 : vector<8x32xf32>
    %c0_71 = arith.constant 0 : index
    %c0_72 = arith.constant 0 : index
    %c0_73 = arith.constant 0 : index
    %c0_74 = arith.constant 0 : index
    %150 = vector.load %arg13[%c0_71, %c0_72, %c0_73, %c0_74] : memref<2x3x32x32xf32, #tpu.memory_space<vmem>>, vector<1x3x32x32xf32>
    %151 = vector.shape_cast %150 : vector<1x3x32x32xf32> to vector<3x32x32xf32>
    %c0_75 = arith.constant 0 : index
    %c0_76 = arith.constant 0 : index
    %c0_77 = arith.constant 0 : index
    %152 = vector.load %arg14[%c0_75, %c0_76, %c0_77] : memref<2x32x32xf32, #tpu.memory_space<vmem>>, vector<1x32x32xf32>
    %153 = vector.shape_cast %152 : vector<1x32x32xf32> to vector<32x32xf32>
    %c0_78 = arith.constant 0 : index
    %c0_79 = arith.constant 0 : index
    %c0_80 = arith.constant 0 : index
    %154 = vector.load %arg15[%c0_78, %c0_79, %c0_80] : memref<2x1x32xf32, #tpu.memory_space<vmem>>, vector<1x1x32xf32>
    %155 = vector.shape_cast %154 : vector<1x1x32xf32> to vector<1x32xf32>
    %156 = vector.extract_strided_slice %151 {offsets = [0, 0, 0], sizes = [1, 32, 32], strides = [1, 1, 1]} : vector<3x32x32xf32> to vector<1x32x32xf32>
    %157 = vector.shape_cast %156 : vector<1x32x32xf32> to vector<32x32xf32>
    %cst_81 = arith.constant dense<0.000000e+00> : vector<8x32xf32>
    %158 = tpu.matmul %149, %157, %cst_81 {dimension_numbers = #tpu.dot_dimension_numbers<[1], [0], [0], [1], [0, 0, 1, 1], [], []>} : vector<8x32xf32>, vector<32x32xf32>, vector<8x32xf32> -> vector<8x32xf32>
    %159 = vector.broadcast %6 : f32 to vector<8x32xf32>
    %160 = arith.mulf %158, %159 : vector<8x32xf32>
    %161 = vector.extract_strided_slice %151 {offsets = [1, 0, 0], sizes = [1, 32, 32], strides = [1, 1, 1]} : vector<3x32x32xf32> to vector<1x32x32xf32>
    %162 = vector.shape_cast %161 : vector<1x32x32xf32> to vector<32x32xf32>
    %cst_82 = arith.constant dense<0.000000e+00> : vector<8x32xf32>
    %163 = tpu.matmul %31, %162, %cst_82 {dimension_numbers = #tpu.dot_dimension_numbers<[1], [0], [0], [1], [0, 0, 1, 1], [], []>} : vector<8x32xf32>, vector<32x32xf32>, vector<8x32xf32> -> vector<8x32xf32>
    %164 = vector.extract_strided_slice %151 {offsets = [2, 0, 0], sizes = [1, 32, 32], strides = [1, 1, 1]} : vector<3x32x32xf32> to vector<1x32x32xf32>
    %165 = vector.shape_cast %164 : vector<1x32x32xf32> to vector<32x32xf32>
    %cst_83 = arith.constant dense<0.000000e+00> : vector<8x32xf32>
    %166 = tpu.matmul %31, %165, %cst_83 {dimension_numbers = #tpu.dot_dimension_numbers<[1], [0], [0], [1], [0, 0, 1, 1], [], []>} : vector<8x32xf32>, vector<32x32xf32>, vector<8x32xf32> -> vector<8x32xf32>
    %167 = vector.extract_strided_slice %160 {offsets = [0, 0], sizes = [8, 8], strides = [1, 1]} : vector<8x32xf32> to vector<8x8xf32>
    %168 = vector.extract_strided_slice %163 {offsets = [0, 0], sizes = [8, 8], strides = [1, 1]} : vector<8x32xf32> to vector<8x8xf32>
    %169 = tpu.transpose %168, [1, 0] : vector<8x8xf32> -> vector<8x8xf32>
    %cst_84 = arith.constant dense<0.000000e+00> : vector<8x8xf32>
    %170 = tpu.matmul %167, %169, %cst_84 {dimension_numbers = #tpu.dot_dimension_numbers<[1], [0], [0], [1], [0, 0, 1, 1], [], []>} : vector<8x8xf32>, vector<8x8xf32>, vector<8x8xf32> -> vector<8x8xf32>
    %171 = vector.broadcast %20 : vector<1x8xf32> to vector<8x8xf32>
    %172 = arith.addf %170, %171 : vector<8x8xf32>
    %cst_85 = arith.constant dense<0xFF800000> : vector<8xf32>
    %173 = vector.multi_reduction <maximumf>, %172, %cst_85 [1] : vector<8x8xf32> to vector<8xf32>
    %174 = vector.shape_cast %173 : vector<8xf32> to vector<8x1xf32>
    %175 = vector.broadcast %174 : vector<8x1xf32> to vector<8x8xf32>
    %176 = arith.subf %172, %175 : vector<8x8xf32>
    %177 = math.exp %176 : vector<8x8xf32>
    %cst_86 = arith.constant dense<0.000000e+00> : vector<8xf32>
    %178 = vector.multi_reduction <add>, %177, %cst_86 [1] : vector<8x8xf32> to vector<8xf32>
    %179 = vector.shape_cast %178 : vector<8xf32> to vector<8x1xf32>
    %180 = tpu.reciprocal %179 {approx = true} : vector<8x1xf32> -> vector<8x1xf32>
    %181 = vector.broadcast %180 : vector<8x1xf32> to vector<8x8xf32>
    %182 = arith.mulf %177, %181 : vector<8x8xf32>
    %183 = vector.extract_strided_slice %166 {offsets = [0, 0], sizes = [8, 8], strides = [1, 1]} : vector<8x32xf32> to vector<8x8xf32>
    %cst_87 = arith.constant dense<0.000000e+00> : vector<8x8xf32>
    %184 = tpu.matmul %182, %183, %cst_87 {dimension_numbers = #tpu.dot_dimension_numbers<[1], [0], [0], [1], [0, 0, 1, 1], [], []>} : vector<8x8xf32>, vector<8x8xf32>, vector<8x8xf32> -> vector<8x8xf32>
    %185 = vector.extract_strided_slice %160 {offsets = [0, 8], sizes = [8, 8], strides = [1, 1]} : vector<8x32xf32> to vector<8x8xf32>
    %186 = vector.extract_strided_slice %163 {offsets = [0, 8], sizes = [8, 8], strides = [1, 1]} : vector<8x32xf32> to vector<8x8xf32>
    %187 = tpu.transpose %186, [1, 0] : vector<8x8xf32> -> vector<8x8xf32>
    %cst_88 = arith.constant dense<0.000000e+00> : vector<8x8xf32>
    %188 = tpu.matmul %185, %187, %cst_88 {dimension_numbers = #tpu.dot_dimension_numbers<[1], [0], [0], [1], [0, 0, 1, 1], [], []>} : vector<8x8xf32>, vector<8x8xf32>, vector<8x8xf32> -> vector<8x8xf32>
    %189 = vector.broadcast %20 : vector<1x8xf32> to vector<8x8xf32>
    %190 = arith.addf %188, %189 : vector<8x8xf32>
    %cst_89 = arith.constant dense<0xFF800000> : vector<8xf32>
    %191 = vector.multi_reduction <maximumf>, %190, %cst_89 [1] : vector<8x8xf32> to vector<8xf32>
    %192 = vector.shape_cast %191 : vector<8xf32> to vector<8x1xf32>
    %193 = vector.broadcast %192 : vector<8x1xf32> to vector<8x8xf32>
    %194 = arith.subf %190, %193 : vector<8x8xf32>
    %195 = math.exp %194 : vector<8x8xf32>
    %cst_90 = arith.constant dense<0.000000e+00> : vector<8xf32>
    %196 = vector.multi_reduction <add>, %195, %cst_90 [1] : vector<8x8xf32> to vector<8xf32>
    %197 = vector.shape_cast %196 : vector<8xf32> to vector<8x1xf32>
    %198 = tpu.reciprocal %197 {approx = true} : vector<8x1xf32> -> vector<8x1xf32>
    %199 = vector.broadcast %198 : vector<8x1xf32> to vector<8x8xf32>
    %200 = arith.mulf %195, %199 : vector<8x8xf32>
    %201 = vector.extract_strided_slice %166 {offsets = [0, 8], sizes = [8, 8], strides = [1, 1]} : vector<8x32xf32> to vector<8x8xf32>
    %cst_91 = arith.constant dense<0.000000e+00> : vector<8x8xf32>
    %202 = tpu.matmul %200, %201, %cst_91 {dimension_numbers = #tpu.dot_dimension_numbers<[1], [0], [0], [1], [0, 0, 1, 1], [], []>} : vector<8x8xf32>, vector<8x8xf32>, vector<8x8xf32> -> vector<8x8xf32>
    %203 = vector.extract_strided_slice %160 {offsets = [0, 16], sizes = [8, 8], strides = [1, 1]} : vector<8x32xf32> to vector<8x8xf32>
    %204 = vector.extract_strided_slice %163 {offsets = [0, 16], sizes = [8, 8], strides = [1, 1]} : vector<8x32xf32> to vector<8x8xf32>
    %205 = tpu.transpose %204, [1, 0] : vector<8x8xf32> -> vector<8x8xf32>
    %cst_92 = arith.constant dense<0.000000e+00> : vector<8x8xf32>
    %206 = tpu.matmul %203, %205, %cst_92 {dimension_numbers = #tpu.dot_dimension_numbers<[1], [0], [0], [1], [0, 0, 1, 1], [], []>} : vector<8x8xf32>, vector<8x8xf32>, vector<8x8xf32> -> vector<8x8xf32>
    %207 = vector.broadcast %20 : vector<1x8xf32> to vector<8x8xf32>
    %208 = arith.addf %206, %207 : vector<8x8xf32>
    %cst_93 = arith.constant dense<0xFF800000> : vector<8xf32>
    %209 = vector.multi_reduction <maximumf>, %208, %cst_93 [1] : vector<8x8xf32> to vector<8xf32>
    %210 = vector.shape_cast %209 : vector<8xf32> to vector<8x1xf32>
    %211 = vector.broadcast %210 : vector<8x1xf32> to vector<8x8xf32>
    %212 = arith.subf %208, %211 : vector<8x8xf32>
    %213 = math.exp %212 : vector<8x8xf32>
    %cst_94 = arith.constant dense<0.000000e+00> : vector<8xf32>
    %214 = vector.multi_reduction <add>, %213, %cst_94 [1] : vector<8x8xf32> to vector<8xf32>
    %215 = vector.shape_cast %214 : vector<8xf32> to vector<8x1xf32>
    %216 = tpu.reciprocal %215 {approx = true} : vector<8x1xf32> -> vector<8x1xf32>
    %217 = vector.broadcast %216 : vector<8x1xf32> to vector<8x8xf32>
    %218 = arith.mulf %213, %217 : vector<8x8xf32>
    %219 = vector.extract_strided_slice %166 {offsets = [0, 16], sizes = [8, 8], strides = [1, 1]} : vector<8x32xf32> to vector<8x8xf32>
    %cst_95 = arith.constant dense<0.000000e+00> : vector<8x8xf32>
    %220 = tpu.matmul %218, %219, %cst_95 {dimension_numbers = #tpu.dot_dimension_numbers<[1], [0], [0], [1], [0, 0, 1, 1], [], []>} : vector<8x8xf32>, vector<8x8xf32>, vector<8x8xf32> -> vector<8x8xf32>
    %221 = vector.extract_strided_slice %160 {offsets = [0, 24], sizes = [8, 8], strides = [1, 1]} : vector<8x32xf32> to vector<8x8xf32>
    %222 = vector.extract_strided_slice %163 {offsets = [0, 24], sizes = [8, 8], strides = [1, 1]} : vector<8x32xf32> to vector<8x8xf32>
    %223 = tpu.transpose %222, [1, 0] : vector<8x8xf32> -> vector<8x8xf32>
    %cst_96 = arith.constant dense<0.000000e+00> : vector<8x8xf32>
    %224 = tpu.matmul %221, %223, %cst_96 {dimension_numbers = #tpu.dot_dimension_numbers<[1], [0], [0], [1], [0, 0, 1, 1], [], []>} : vector<8x8xf32>, vector<8x8xf32>, vector<8x8xf32> -> vector<8x8xf32>
    %225 = vector.broadcast %20 : vector<1x8xf32> to vector<8x8xf32>
    %226 = arith.addf %224, %225 : vector<8x8xf32>
    %cst_97 = arith.constant dense<0xFF800000> : vector<8xf32>
    %227 = vector.multi_reduction <maximumf>, %226, %cst_97 [1] : vector<8x8xf32> to vector<8xf32>
    %228 = vector.shape_cast %227 : vector<8xf32> to vector<8x1xf32>
    %229 = vector.broadcast %228 : vector<8x1xf32> to vector<8x8xf32>
    %230 = arith.subf %226, %229 : vector<8x8xf32>
    %231 = math.exp %230 : vector<8x8xf32>
    %cst_98 = arith.constant dense<0.000000e+00> : vector<8xf32>
    %232 = vector.multi_reduction <add>, %231, %cst_98 [1] : vector<8x8xf32> to vector<8xf32>
    %233 = vector.shape_cast %232 : vector<8xf32> to vector<8x1xf32>
    %234 = tpu.reciprocal %233 {approx = true} : vector<8x1xf32> -> vector<8x1xf32>
    %235 = vector.broadcast %234 : vector<8x1xf32> to vector<8x8xf32>
    %236 = arith.mulf %231, %235 : vector<8x8xf32>
    %237 = vector.extract_strided_slice %166 {offsets = [0, 24], sizes = [8, 8], strides = [1, 1]} : vector<8x32xf32> to vector<8x8xf32>
    %cst_99 = arith.constant dense<0.000000e+00> : vector<8x8xf32>
    %238 = tpu.matmul %236, %237, %cst_99 {dimension_numbers = #tpu.dot_dimension_numbers<[1], [0], [0], [1], [0, 0, 1, 1], [], []>} : vector<8x8xf32>, vector<8x8xf32>, vector<8x8xf32> -> vector<8x8xf32>
    %239 = tpu.concatenate %184, %202, %220, %238 in 1 : vector<8x8xf32>, vector<8x8xf32>, vector<8x8xf32>, vector<8x8xf32> -> vector<8x32xf32>
    %cst_100 = arith.constant dense<0.000000e+00> : vector<8x32xf32>
    %240 = tpu.matmul %239, %153, %cst_100 {dimension_numbers = #tpu.dot_dimension_numbers<[1], [0], [0], [1], [0, 0, 1, 1], [], []>} : vector<8x32xf32>, vector<32x32xf32>, vector<8x32xf32> -> vector<8x32xf32>
    %241 = vector.broadcast %155 : vector<1x32xf32> to vector<8x32xf32>
    %242 = arith.addf %240, %241 : vector<8x32xf32>
    %243 = arith.addf %242, %149 : vector<8x32xf32>
    %244 = vector.extract_strided_slice %33 {offsets = [1, 0], sizes = [1, 32], strides = [1, 1]} : vector<3x32xf32> to vector<1x32xf32>
    %245 = vector.extract_strided_slice %35 {offsets = [1, 0], sizes = [1, 32], strides = [1, 1]} : vector<3x32xf32> to vector<1x32xf32>
    %cst_101 = arith.constant dense<0.000000e+00> : vector<8xf32>
    %246 = vector.multi_reduction <add>, %243, %cst_101 [1] : vector<8x32xf32> to vector<8xf32>
    %247 = vector.shape_cast %246 : vector<8xf32> to vector<8x1xf32>
    %cst_102 = arith.constant 3.200000e+01 : f32
    %248 = vector.broadcast %cst_102 : f32 to vector<8x1xf32>
    %249 = arith.divf %247, %248 : vector<8x1xf32>
    %250 = vector.broadcast %249 : vector<8x1xf32> to vector<8x32xf32>
    %251 = arith.subf %243, %250 : vector<8x32xf32>
    %252 = arith.mulf %251, %251 : vector<8x32xf32>
    %cst_103 = arith.constant dense<0.000000e+00> : vector<8xf32>
    %253 = vector.multi_reduction <add>, %252, %cst_103 [1] : vector<8x32xf32> to vector<8xf32>
    %254 = vector.shape_cast %253 : vector<8xf32> to vector<8x1xf32>
    %cst_104 = arith.constant 3.200000e+01 : f32
    %255 = vector.broadcast %cst_104 : f32 to vector<8x1xf32>
    %256 = arith.divf %254, %255 : vector<8x1xf32>
    %257 = vector.broadcast %249 : vector<8x1xf32> to vector<8x32xf32>
    %258 = arith.subf %243, %257 : vector<8x32xf32>
    %cst_105 = arith.constant 9.99999974E-6 : f32
    %259 = vector.broadcast %cst_105 : f32 to vector<8x1xf32>
    %260 = arith.addf %256, %259 : vector<8x1xf32>
    %261 = math.rsqrt %260 : vector<8x1xf32>
    %262 = vector.broadcast %261 : vector<8x1xf32> to vector<8x32xf32>
    %263 = arith.mulf %258, %262 : vector<8x32xf32>
    %264 = vector.broadcast %244 : vector<1x32xf32> to vector<8x32xf32>
    %265 = arith.mulf %263, %264 : vector<8x32xf32>
    %266 = vector.broadcast %245 : vector<1x32xf32> to vector<8x32xf32>
    %267 = arith.addf %265, %266 : vector<8x32xf32>
    %c0_106 = arith.constant 0 : index
    %c0_107 = arith.constant 0 : index
    %c0_108 = arith.constant 0 : index
    %268 = vector.load %arg16[%c0_106, %c0_107, %c0_108] : memref<2x32x128xf32, #tpu.memory_space<vmem>>, vector<1x32x128xf32>
    %269 = vector.shape_cast %268 : vector<1x32x128xf32> to vector<32x128xf32>
    %cst_109 = arith.constant dense<0.000000e+00> : vector<8x128xf32>
    %270 = tpu.matmul %267, %269, %cst_109 {dimension_numbers = #tpu.dot_dimension_numbers<[1], [0], [0], [1], [0, 0, 1, 1], [], []>} : vector<8x32xf32>, vector<32x128xf32>, vector<8x128xf32> -> vector<8x128xf32>
    %c0_110 = arith.constant 0 : index
    %c0_111 = arith.constant 0 : index
    %c0_112 = arith.constant 0 : index
    %271 = vector.load %arg17[%c0_110, %c0_111, %c0_112] : memref<2x1x128xf32, #tpu.memory_space<vmem>>, vector<1x1x128xf32>
    %272 = vector.shape_cast %271 : vector<1x1x128xf32> to vector<1x128xf32>
    %273 = vector.broadcast %272 : vector<1x128xf32> to vector<8x128xf32>
    %274 = arith.addf %270, %273 : vector<8x128xf32>
    %cst_113 = arith.constant 0.000000e+00 : f32
    %275 = vector.broadcast %cst_113 : f32 to vector<8x128xf32>
    %276 = arith.maximumf %274, %275 : vector<8x128xf32>
    %c0_114 = arith.constant 0 : index
    %c0_115 = arith.constant 0 : index
    %c0_116 = arith.constant 0 : index
    %277 = vector.load %arg18[%c0_114, %c0_115, %c0_116] : memref<2x128x32xf32, #tpu.memory_space<vmem>>, vector<1x128x32xf32>
    %278 = vector.shape_cast %277 : vector<1x128x32xf32> to vector<128x32xf32>
    %cst_117 = arith.constant dense<0.000000e+00> : vector<8x32xf32>
    %279 = tpu.matmul %276, %278, %cst_117 {dimension_numbers = #tpu.dot_dimension_numbers<[1], [0], [0], [1], [0, 0, 1, 1], [], []>} : vector<8x128xf32>, vector<128x32xf32>, vector<8x32xf32> -> vector<8x32xf32>
    %c0_118 = arith.constant 0 : index
    %c0_119 = arith.constant 0 : index
    %c0_120 = arith.constant 0 : index
    %280 = vector.load %arg19[%c0_118, %c0_119, %c0_120] : memref<2x1x32xf32, #tpu.memory_space<vmem>>, vector<1x1x32xf32>
    %281 = vector.shape_cast %280 : vector<1x1x32xf32> to vector<1x32xf32>
    %282 = vector.broadcast %281 : vector<1x32xf32> to vector<8x32xf32>
    %283 = arith.addf %279, %282 : vector<8x32xf32>
    %284 = arith.addf %283, %267 : vector<8x32xf32>
    %285 = vector.extract_strided_slice %33 {offsets = [2, 0], sizes = [1, 32], strides = [1, 1]} : vector<3x32xf32> to vector<1x32xf32>
    %286 = vector.extract_strided_slice %35 {offsets = [2, 0], sizes = [1, 32], strides = [1, 1]} : vector<3x32xf32> to vector<1x32xf32>
    %cst_121 = arith.constant dense<0.000000e+00> : vector<8xf32>
    %287 = vector.multi_reduction <add>, %284, %cst_121 [1] : vector<8x32xf32> to vector<8xf32>
    %288 = vector.shape_cast %287 : vector<8xf32> to vector<8x1xf32>
    %cst_122 = arith.constant 3.200000e+01 : f32
    %289 = vector.broadcast %cst_122 : f32 to vector<8x1xf32>
    %290 = arith.divf %288, %289 : vector<8x1xf32>
    %291 = vector.broadcast %290 : vector<8x1xf32> to vector<8x32xf32>
    %292 = arith.subf %284, %291 : vector<8x32xf32>
    %293 = arith.mulf %292, %292 : vector<8x32xf32>
    %cst_123 = arith.constant dense<0.000000e+00> : vector<8xf32>
    %294 = vector.multi_reduction <add>, %293, %cst_123 [1] : vector<8x32xf32> to vector<8xf32>
    %295 = vector.shape_cast %294 : vector<8xf32> to vector<8x1xf32>
    %cst_124 = arith.constant 3.200000e+01 : f32
    %296 = vector.broadcast %cst_124 : f32 to vector<8x1xf32>
    %297 = arith.divf %295, %296 : vector<8x1xf32>
    %298 = vector.broadcast %290 : vector<8x1xf32> to vector<8x32xf32>
    %299 = arith.subf %284, %298 : vector<8x32xf32>
    %cst_125 = arith.constant 9.99999974E-6 : f32
    %300 = vector.broadcast %cst_125 : f32 to vector<8x1xf32>
    %301 = arith.addf %297, %300 : vector<8x1xf32>
    %302 = math.rsqrt %301 : vector<8x1xf32>
    %303 = vector.broadcast %302 : vector<8x1xf32> to vector<8x32xf32>
    %304 = arith.mulf %299, %303 : vector<8x32xf32>
    %305 = vector.broadcast %285 : vector<1x32xf32> to vector<8x32xf32>
    %306 = arith.mulf %304, %305 : vector<8x32xf32>
    %307 = vector.broadcast %286 : vector<1x32xf32> to vector<8x32xf32>
    %308 = arith.addf %306, %307 : vector<8x32xf32>
    %c1 = arith.constant 1 : index
    %c0_126 = arith.constant 0 : index
    %c0_127 = arith.constant 0 : index
    %309 = vector.load %arg20[%c1, %c0_126, %c0_127] : memref<2x3x32xf32, #tpu.memory_space<vmem>>, vector<1x3x32xf32>
    %310 = vector.shape_cast %309 : vector<1x3x32xf32> to vector<3x32xf32>
    %c1_128 = arith.constant 1 : index
    %c0_129 = arith.constant 0 : index
    %c0_130 = arith.constant 0 : index
    %311 = vector.load %arg21[%c1_128, %c0_129, %c0_130] : memref<2x3x32xf32, #tpu.memory_space<vmem>>, vector<1x3x32xf32>
    %312 = vector.shape_cast %311 : vector<1x3x32xf32> to vector<3x32xf32>
    %c1_131 = arith.constant 1 : index
    %c0_132 = arith.constant 0 : index
    %c0_133 = arith.constant 0 : index
    %c0_134 = arith.constant 0 : index
    %313 = vector.load %arg10[%c1_131, %c0_132, %c0_133, %c0_134] : memref<2x3x32x32xf32, #tpu.memory_space<vmem>>, vector<1x3x32x32xf32>
    %314 = vector.shape_cast %313 : vector<1x3x32x32xf32> to vector<3x32x32xf32>
    %c1_135 = arith.constant 1 : index
    %c0_136 = arith.constant 0 : index
    %c0_137 = arith.constant 0 : index
    %315 = vector.load %arg11[%c1_135, %c0_136, %c0_137] : memref<2x32x32xf32, #tpu.memory_space<vmem>>, vector<1x32x32xf32>
    %316 = vector.shape_cast %315 : vector<1x32x32xf32> to vector<32x32xf32>
    %c1_138 = arith.constant 1 : index
    %c0_139 = arith.constant 0 : index
    %c0_140 = arith.constant 0 : index
    %317 = vector.load %arg12[%c1_138, %c0_139, %c0_140] : memref<2x1x32xf32, #tpu.memory_space<vmem>>, vector<1x1x32xf32>
    %318 = vector.shape_cast %317 : vector<1x1x32xf32> to vector<1x32xf32>
    %319 = vector.extract_strided_slice %314 {offsets = [0, 0, 0], sizes = [1, 32, 32], strides = [1, 1, 1]} : vector<3x32x32xf32> to vector<1x32x32xf32>
    %320 = vector.shape_cast %319 : vector<1x32x32xf32> to vector<32x32xf32>
    %cst_141 = arith.constant dense<0.000000e+00> : vector<8x32xf32>
    %321 = tpu.matmul %308, %320, %cst_141 {dimension_numbers = #tpu.dot_dimension_numbers<[1], [0], [0], [1], [0, 0, 1, 1], [], []>} : vector<8x32xf32>, vector<32x32xf32>, vector<8x32xf32> -> vector<8x32xf32>
    %322 = vector.broadcast %6 : f32 to vector<8x32xf32>
    %323 = arith.mulf %321, %322 : vector<8x32xf32>
    %324 = vector.extract_strided_slice %314 {offsets = [1, 0, 0], sizes = [1, 32, 32], strides = [1, 1, 1]} : vector<3x32x32xf32> to vector<1x32x32xf32>
    %325 = vector.shape_cast %324 : vector<1x32x32xf32> to vector<32x32xf32>
    %cst_142 = arith.constant dense<0.000000e+00> : vector<8x32xf32>
    %326 = tpu.matmul %308, %325, %cst_142 {dimension_numbers = #tpu.dot_dimension_numbers<[1], [0], [0], [1], [0, 0, 1, 1], [], []>} : vector<8x32xf32>, vector<32x32xf32>, vector<8x32xf32> -> vector<8x32xf32>
    %327 = vector.extract_strided_slice %314 {offsets = [2, 0, 0], sizes = [1, 32, 32], strides = [1, 1, 1]} : vector<3x32x32xf32> to vector<1x32x32xf32>
    %328 = vector.shape_cast %327 : vector<1x32x32xf32> to vector<32x32xf32>
    %cst_143 = arith.constant dense<0.000000e+00> : vector<8x32xf32>
    %329 = tpu.matmul %308, %328, %cst_143 {dimension_numbers = #tpu.dot_dimension_numbers<[1], [0], [0], [1], [0, 0, 1, 1], [], []>} : vector<8x32xf32>, vector<32x32xf32>, vector<8x32xf32> -> vector<8x32xf32>
    %330 = vector.extract_strided_slice %323 {offsets = [0, 0], sizes = [8, 8], strides = [1, 1]} : vector<8x32xf32> to vector<8x8xf32>
    %331 = vector.extract_strided_slice %326 {offsets = [0, 0], sizes = [8, 8], strides = [1, 1]} : vector<8x32xf32> to vector<8x8xf32>
    %332 = tpu.transpose %331, [1, 0] : vector<8x8xf32> -> vector<8x8xf32>
    %cst_144 = arith.constant dense<0.000000e+00> : vector<8x8xf32>
    %333 = tpu.matmul %330, %332, %cst_144 {dimension_numbers = #tpu.dot_dimension_numbers<[1], [0], [0], [1], [0, 0, 1, 1], [], []>} : vector<8x8xf32>, vector<8x8xf32>, vector<8x8xf32> -> vector<8x8xf32>
    %334 = arith.addf %333, %13 : vector<8x8xf32>
    %cst_145 = arith.constant dense<0xFF800000> : vector<8xf32>
    %335 = vector.multi_reduction <maximumf>, %334, %cst_145 [1] : vector<8x8xf32> to vector<8xf32>
    %336 = vector.shape_cast %335 : vector<8xf32> to vector<8x1xf32>
    %337 = vector.broadcast %336 : vector<8x1xf32> to vector<8x8xf32>
    %338 = arith.subf %334, %337 : vector<8x8xf32>
    %339 = math.exp %338 : vector<8x8xf32>
    %cst_146 = arith.constant dense<0.000000e+00> : vector<8xf32>
    %340 = vector.multi_reduction <add>, %339, %cst_146 [1] : vector<8x8xf32> to vector<8xf32>
    %341 = vector.shape_cast %340 : vector<8xf32> to vector<8x1xf32>
    %342 = tpu.reciprocal %341 {approx = true} : vector<8x1xf32> -> vector<8x1xf32>
    %343 = vector.broadcast %342 : vector<8x1xf32> to vector<8x8xf32>
    %344 = arith.mulf %339, %343 : vector<8x8xf32>
    %345 = vector.extract_strided_slice %329 {offsets = [0, 0], sizes = [8, 8], strides = [1, 1]} : vector<8x32xf32> to vector<8x8xf32>
    %cst_147 = arith.constant dense<0.000000e+00> : vector<8x8xf32>
    %346 = tpu.matmul %344, %345, %cst_147 {dimension_numbers = #tpu.dot_dimension_numbers<[1], [0], [0], [1], [0, 0, 1, 1], [], []>} : vector<8x8xf32>, vector<8x8xf32>, vector<8x8xf32> -> vector<8x8xf32>
    %347 = vector.extract_strided_slice %323 {offsets = [0, 8], sizes = [8, 8], strides = [1, 1]} : vector<8x32xf32> to vector<8x8xf32>
    %348 = vector.extract_strided_slice %326 {offsets = [0, 8], sizes = [8, 8], strides = [1, 1]} : vector<8x32xf32> to vector<8x8xf32>
    %349 = tpu.transpose %348, [1, 0] : vector<8x8xf32> -> vector<8x8xf32>
    %cst_148 = arith.constant dense<0.000000e+00> : vector<8x8xf32>
    %350 = tpu.matmul %347, %349, %cst_148 {dimension_numbers = #tpu.dot_dimension_numbers<[1], [0], [0], [1], [0, 0, 1, 1], [], []>} : vector<8x8xf32>, vector<8x8xf32>, vector<8x8xf32> -> vector<8x8xf32>
    %351 = arith.addf %350, %13 : vector<8x8xf32>
    %cst_149 = arith.constant dense<0xFF800000> : vector<8xf32>
    %352 = vector.multi_reduction <maximumf>, %351, %cst_149 [1] : vector<8x8xf32> to vector<8xf32>
    %353 = vector.shape_cast %352 : vector<8xf32> to vector<8x1xf32>
    %354 = vector.broadcast %353 : vector<8x1xf32> to vector<8x8xf32>
    %355 = arith.subf %351, %354 : vector<8x8xf32>
    %356 = math.exp %355 : vector<8x8xf32>
    %cst_150 = arith.constant dense<0.000000e+00> : vector<8xf32>
    %357 = vector.multi_reduction <add>, %356, %cst_150 [1] : vector<8x8xf32> to vector<8xf32>
    %358 = vector.shape_cast %357 : vector<8xf32> to vector<8x1xf32>
    %359 = tpu.reciprocal %358 {approx = true} : vector<8x1xf32> -> vector<8x1xf32>
    %360 = vector.broadcast %359 : vector<8x1xf32> to vector<8x8xf32>
    %361 = arith.mulf %356, %360 : vector<8x8xf32>
    %362 = vector.extract_strided_slice %329 {offsets = [0, 8], sizes = [8, 8], strides = [1, 1]} : vector<8x32xf32> to vector<8x8xf32>
    %cst_151 = arith.constant dense<0.000000e+00> : vector<8x8xf32>
    %363 = tpu.matmul %361, %362, %cst_151 {dimension_numbers = #tpu.dot_dimension_numbers<[1], [0], [0], [1], [0, 0, 1, 1], [], []>} : vector<8x8xf32>, vector<8x8xf32>, vector<8x8xf32> -> vector<8x8xf32>
    %364 = vector.extract_strided_slice %323 {offsets = [0, 16], sizes = [8, 8], strides = [1, 1]} : vector<8x32xf32> to vector<8x8xf32>
    %365 = vector.extract_strided_slice %326 {offsets = [0, 16], sizes = [8, 8], strides = [1, 1]} : vector<8x32xf32> to vector<8x8xf32>
    %366 = tpu.transpose %365, [1, 0] : vector<8x8xf32> -> vector<8x8xf32>
    %cst_152 = arith.constant dense<0.000000e+00> : vector<8x8xf32>
    %367 = tpu.matmul %364, %366, %cst_152 {dimension_numbers = #tpu.dot_dimension_numbers<[1], [0], [0], [1], [0, 0, 1, 1], [], []>} : vector<8x8xf32>, vector<8x8xf32>, vector<8x8xf32> -> vector<8x8xf32>
    %368 = arith.addf %367, %13 : vector<8x8xf32>
    %cst_153 = arith.constant dense<0xFF800000> : vector<8xf32>
    %369 = vector.multi_reduction <maximumf>, %368, %cst_153 [1] : vector<8x8xf32> to vector<8xf32>
    %370 = vector.shape_cast %369 : vector<8xf32> to vector<8x1xf32>
    %371 = vector.broadcast %370 : vector<8x1xf32> to vector<8x8xf32>
    %372 = arith.subf %368, %371 : vector<8x8xf32>
    %373 = math.exp %372 : vector<8x8xf32>
    %cst_154 = arith.constant dense<0.000000e+00> : vector<8xf32>
    %374 = vector.multi_reduction <add>, %373, %cst_154 [1] : vector<8x8xf32> to vector<8xf32>
    %375 = vector.shape_cast %374 : vector<8xf32> to vector<8x1xf32>
    %376 = tpu.reciprocal %375 {approx = true} : vector<8x1xf32> -> vector<8x1xf32>
    %377 = vector.broadcast %376 : vector<8x1xf32> to vector<8x8xf32>
    %378 = arith.mulf %373, %377 : vector<8x8xf32>
    %379 = vector.extract_strided_slice %329 {offsets = [0, 16], sizes = [8, 8], strides = [1, 1]} : vector<8x32xf32> to vector<8x8xf32>
    %cst_155 = arith.constant dense<0.000000e+00> : vector<8x8xf32>
    %380 = tpu.matmul %378, %379, %cst_155 {dimension_numbers = #tpu.dot_dimension_numbers<[1], [0], [0], [1], [0, 0, 1, 1], [], []>} : vector<8x8xf32>, vector<8x8xf32>, vector<8x8xf32> -> vector<8x8xf32>
    %381 = vector.extract_strided_slice %323 {offsets = [0, 24], sizes = [8, 8], strides = [1, 1]} : vector<8x32xf32> to vector<8x8xf32>
    %382 = vector.extract_strided_slice %326 {offsets = [0, 24], sizes = [8, 8], strides = [1, 1]} : vector<8x32xf32> to vector<8x8xf32>
    %383 = tpu.transpose %382, [1, 0] : vector<8x8xf32> -> vector<8x8xf32>
    %cst_156 = arith.constant dense<0.000000e+00> : vector<8x8xf32>
    %384 = tpu.matmul %381, %383, %cst_156 {dimension_numbers = #tpu.dot_dimension_numbers<[1], [0], [0], [1], [0, 0, 1, 1], [], []>} : vector<8x8xf32>, vector<8x8xf32>, vector<8x8xf32> -> vector<8x8xf32>
    %385 = arith.addf %384, %13 : vector<8x8xf32>
    %cst_157 = arith.constant dense<0xFF800000> : vector<8xf32>
    %386 = vector.multi_reduction <maximumf>, %385, %cst_157 [1] : vector<8x8xf32> to vector<8xf32>
    %387 = vector.shape_cast %386 : vector<8xf32> to vector<8x1xf32>
    %388 = vector.broadcast %387 : vector<8x1xf32> to vector<8x8xf32>
    %389 = arith.subf %385, %388 : vector<8x8xf32>
    %390 = math.exp %389 : vector<8x8xf32>
    %cst_158 = arith.constant dense<0.000000e+00> : vector<8xf32>
    %391 = vector.multi_reduction <add>, %390, %cst_158 [1] : vector<8x8xf32> to vector<8xf32>
    %392 = vector.shape_cast %391 : vector<8xf32> to vector<8x1xf32>
    %393 = tpu.reciprocal %392 {approx = true} : vector<8x1xf32> -> vector<8x1xf32>
    %394 = vector.broadcast %393 : vector<8x1xf32> to vector<8x8xf32>
    %395 = arith.mulf %390, %394 : vector<8x8xf32>
    %396 = vector.extract_strided_slice %329 {offsets = [0, 24], sizes = [8, 8], strides = [1, 1]} : vector<8x32xf32> to vector<8x8xf32>
    %cst_159 = arith.constant dense<0.000000e+00> : vector<8x8xf32>
    %397 = tpu.matmul %395, %396, %cst_159 {dimension_numbers = #tpu.dot_dimension_numbers<[1], [0], [0], [1], [0, 0, 1, 1], [], []>} : vector<8x8xf32>, vector<8x8xf32>, vector<8x8xf32> -> vector<8x8xf32>
    %398 = tpu.concatenate %346, %363, %380, %397 in 1 : vector<8x8xf32>, vector<8x8xf32>, vector<8x8xf32>, vector<8x8xf32> -> vector<8x32xf32>
    %cst_160 = arith.constant dense<0.000000e+00> : vector<8x32xf32>
    %399 = tpu.matmul %398, %316, %cst_160 {dimension_numbers = #tpu.dot_dimension_numbers<[1], [0], [0], [1], [0, 0, 1, 1], [], []>} : vector<8x32xf32>, vector<32x32xf32>, vector<8x32xf32> -> vector<8x32xf32>
    %400 = vector.broadcast %318 : vector<1x32xf32> to vector<8x32xf32>
    %401 = arith.addf %399, %400 : vector<8x32xf32>
    %402 = arith.addf %401, %308 : vector<8x32xf32>
    %403 = vector.extract_strided_slice %310 {offsets = [0, 0], sizes = [1, 32], strides = [1, 1]} : vector<3x32xf32> to vector<1x32xf32>
    %404 = vector.extract_strided_slice %312 {offsets = [0, 0], sizes = [1, 32], strides = [1, 1]} : vector<3x32xf32> to vector<1x32xf32>
    %cst_161 = arith.constant dense<0.000000e+00> : vector<8xf32>
    %405 = vector.multi_reduction <add>, %402, %cst_161 [1] : vector<8x32xf32> to vector<8xf32>
    %406 = vector.shape_cast %405 : vector<8xf32> to vector<8x1xf32>
    %cst_162 = arith.constant 3.200000e+01 : f32
    %407 = vector.broadcast %cst_162 : f32 to vector<8x1xf32>
    %408 = arith.divf %406, %407 : vector<8x1xf32>
    %409 = vector.broadcast %408 : vector<8x1xf32> to vector<8x32xf32>
    %410 = arith.subf %402, %409 : vector<8x32xf32>
    %411 = arith.mulf %410, %410 : vector<8x32xf32>
    %cst_163 = arith.constant dense<0.000000e+00> : vector<8xf32>
    %412 = vector.multi_reduction <add>, %411, %cst_163 [1] : vector<8x32xf32> to vector<8xf32>
    %413 = vector.shape_cast %412 : vector<8xf32> to vector<8x1xf32>
    %cst_164 = arith.constant 3.200000e+01 : f32
    %414 = vector.broadcast %cst_164 : f32 to vector<8x1xf32>
    %415 = arith.divf %413, %414 : vector<8x1xf32>
    %416 = vector.broadcast %408 : vector<8x1xf32> to vector<8x32xf32>
    %417 = arith.subf %402, %416 : vector<8x32xf32>
    %cst_165 = arith.constant 9.99999974E-6 : f32
    %418 = vector.broadcast %cst_165 : f32 to vector<8x1xf32>
    %419 = arith.addf %415, %418 : vector<8x1xf32>
    %420 = math.rsqrt %419 : vector<8x1xf32>
    %421 = vector.broadcast %420 : vector<8x1xf32> to vector<8x32xf32>
    %422 = arith.mulf %417, %421 : vector<8x32xf32>
    %423 = vector.broadcast %403 : vector<1x32xf32> to vector<8x32xf32>
    %424 = arith.mulf %422, %423 : vector<8x32xf32>
    %425 = vector.broadcast %404 : vector<1x32xf32> to vector<8x32xf32>
    %426 = arith.addf %424, %425 : vector<8x32xf32>
    %c1_166 = arith.constant 1 : index
    %c0_167 = arith.constant 0 : index
    %c0_168 = arith.constant 0 : index
    %c0_169 = arith.constant 0 : index
    %427 = vector.load %arg13[%c1_166, %c0_167, %c0_168, %c0_169] : memref<2x3x32x32xf32, #tpu.memory_space<vmem>>, vector<1x3x32x32xf32>
    %428 = vector.shape_cast %427 : vector<1x3x32x32xf32> to vector<3x32x32xf32>
    %c1_170 = arith.constant 1 : index
    %c0_171 = arith.constant 0 : index
    %c0_172 = arith.constant 0 : index
    %429 = vector.load %arg14[%c1_170, %c0_171, %c0_172] : memref<2x32x32xf32, #tpu.memory_space<vmem>>, vector<1x32x32xf32>
    %430 = vector.shape_cast %429 : vector<1x32x32xf32> to vector<32x32xf32>
    %c1_173 = arith.constant 1 : index
    %c0_174 = arith.constant 0 : index
    %c0_175 = arith.constant 0 : index
    %431 = vector.load %arg15[%c1_173, %c0_174, %c0_175] : memref<2x1x32xf32, #tpu.memory_space<vmem>>, vector<1x1x32xf32>
    %432 = vector.shape_cast %431 : vector<1x1x32xf32> to vector<1x32xf32>
    %433 = vector.extract_strided_slice %428 {offsets = [0, 0, 0], sizes = [1, 32, 32], strides = [1, 1, 1]} : vector<3x32x32xf32> to vector<1x32x32xf32>
    %434 = vector.shape_cast %433 : vector<1x32x32xf32> to vector<32x32xf32>
    %cst_176 = arith.constant dense<0.000000e+00> : vector<8x32xf32>
    %435 = tpu.matmul %426, %434, %cst_176 {dimension_numbers = #tpu.dot_dimension_numbers<[1], [0], [0], [1], [0, 0, 1, 1], [], []>} : vector<8x32xf32>, vector<32x32xf32>, vector<8x32xf32> -> vector<8x32xf32>
    %436 = vector.broadcast %6 : f32 to vector<8x32xf32>
    %437 = arith.mulf %435, %436 : vector<8x32xf32>
    %438 = vector.extract_strided_slice %428 {offsets = [1, 0, 0], sizes = [1, 32, 32], strides = [1, 1, 1]} : vector<3x32x32xf32> to vector<1x32x32xf32>
    %439 = vector.shape_cast %438 : vector<1x32x32xf32> to vector<32x32xf32>
    %cst_177 = arith.constant dense<0.000000e+00> : vector<8x32xf32>
    %440 = tpu.matmul %31, %439, %cst_177 {dimension_numbers = #tpu.dot_dimension_numbers<[1], [0], [0], [1], [0, 0, 1, 1], [], []>} : vector<8x32xf32>, vector<32x32xf32>, vector<8x32xf32> -> vector<8x32xf32>
    %441 = vector.extract_strided_slice %428 {offsets = [2, 0, 0], sizes = [1, 32, 32], strides = [1, 1, 1]} : vector<3x32x32xf32> to vector<1x32x32xf32>
    %442 = vector.shape_cast %441 : vector<1x32x32xf32> to vector<32x32xf32>
    %cst_178 = arith.constant dense<0.000000e+00> : vector<8x32xf32>
    %443 = tpu.matmul %31, %442, %cst_178 {dimension_numbers = #tpu.dot_dimension_numbers<[1], [0], [0], [1], [0, 0, 1, 1], [], []>} : vector<8x32xf32>, vector<32x32xf32>, vector<8x32xf32> -> vector<8x32xf32>
    %444 = vector.extract_strided_slice %437 {offsets = [0, 0], sizes = [8, 8], strides = [1, 1]} : vector<8x32xf32> to vector<8x8xf32>
    %445 = vector.extract_strided_slice %440 {offsets = [0, 0], sizes = [8, 8], strides = [1, 1]} : vector<8x32xf32> to vector<8x8xf32>
    %446 = tpu.transpose %445, [1, 0] : vector<8x8xf32> -> vector<8x8xf32>
    %cst_179 = arith.constant dense<0.000000e+00> : vector<8x8xf32>
    %447 = tpu.matmul %444, %446, %cst_179 {dimension_numbers = #tpu.dot_dimension_numbers<[1], [0], [0], [1], [0, 0, 1, 1], [], []>} : vector<8x8xf32>, vector<8x8xf32>, vector<8x8xf32> -> vector<8x8xf32>
    %448 = vector.broadcast %20 : vector<1x8xf32> to vector<8x8xf32>
    %449 = arith.addf %447, %448 : vector<8x8xf32>
    %cst_180 = arith.constant dense<0xFF800000> : vector<8xf32>
    %450 = vector.multi_reduction <maximumf>, %449, %cst_180 [1] : vector<8x8xf32> to vector<8xf32>
    %451 = vector.shape_cast %450 : vector<8xf32> to vector<8x1xf32>
    %452 = vector.broadcast %451 : vector<8x1xf32> to vector<8x8xf32>
    %453 = arith.subf %449, %452 : vector<8x8xf32>
    %454 = math.exp %453 : vector<8x8xf32>
    %cst_181 = arith.constant dense<0.000000e+00> : vector<8xf32>
    %455 = vector.multi_reduction <add>, %454, %cst_181 [1] : vector<8x8xf32> to vector<8xf32>
    %456 = vector.shape_cast %455 : vector<8xf32> to vector<8x1xf32>
    %457 = tpu.reciprocal %456 {approx = true} : vector<8x1xf32> -> vector<8x1xf32>
    %458 = vector.broadcast %457 : vector<8x1xf32> to vector<8x8xf32>
    %459 = arith.mulf %454, %458 : vector<8x8xf32>
    %460 = vector.extract_strided_slice %443 {offsets = [0, 0], sizes = [8, 8], strides = [1, 1]} : vector<8x32xf32> to vector<8x8xf32>
    %cst_182 = arith.constant dense<0.000000e+00> : vector<8x8xf32>
    %461 = tpu.matmul %459, %460, %cst_182 {dimension_numbers = #tpu.dot_dimension_numbers<[1], [0], [0], [1], [0, 0, 1, 1], [], []>} : vector<8x8xf32>, vector<8x8xf32>, vector<8x8xf32> -> vector<8x8xf32>
    %462 = vector.extract_strided_slice %437 {offsets = [0, 8], sizes = [8, 8], strides = [1, 1]} : vector<8x32xf32> to vector<8x8xf32>
    %463 = vector.extract_strided_slice %440 {offsets = [0, 8], sizes = [8, 8], strides = [1, 1]} : vector<8x32xf32> to vector<8x8xf32>
    %464 = tpu.transpose %463, [1, 0] : vector<8x8xf32> -> vector<8x8xf32>
    %cst_183 = arith.constant dense<0.000000e+00> : vector<8x8xf32>
    %465 = tpu.matmul %462, %464, %cst_183 {dimension_numbers = #tpu.dot_dimension_numbers<[1], [0], [0], [1], [0, 0, 1, 1], [], []>} : vector<8x8xf32>, vector<8x8xf32>, vector<8x8xf32> -> vector<8x8xf32>
    %466 = vector.broadcast %20 : vector<1x8xf32> to vector<8x8xf32>
    %467 = arith.addf %465, %466 : vector<8x8xf32>
    %cst_184 = arith.constant dense<0xFF800000> : vector<8xf32>
    %468 = vector.multi_reduction <maximumf>, %467, %cst_184 [1] : vector<8x8xf32> to vector<8xf32>
    %469 = vector.shape_cast %468 : vector<8xf32> to vector<8x1xf32>
    %470 = vector.broadcast %469 : vector<8x1xf32> to vector<8x8xf32>
    %471 = arith.subf %467, %470 : vector<8x8xf32>
    %472 = math.exp %471 : vector<8x8xf32>
    %cst_185 = arith.constant dense<0.000000e+00> : vector<8xf32>
    %473 = vector.multi_reduction <add>, %472, %cst_185 [1] : vector<8x8xf32> to vector<8xf32>
    %474 = vector.shape_cast %473 : vector<8xf32> to vector<8x1xf32>
    %475 = tpu.reciprocal %474 {approx = true} : vector<8x1xf32> -> vector<8x1xf32>
    %476 = vector.broadcast %475 : vector<8x1xf32> to vector<8x8xf32>
    %477 = arith.mulf %472, %476 : vector<8x8xf32>
    %478 = vector.extract_strided_slice %443 {offsets = [0, 8], sizes = [8, 8], strides = [1, 1]} : vector<8x32xf32> to vector<8x8xf32>
    %cst_186 = arith.constant dense<0.000000e+00> : vector<8x8xf32>
    %479 = tpu.matmul %477, %478, %cst_186 {dimension_numbers = #tpu.dot_dimension_numbers<[1], [0], [0], [1], [0, 0, 1, 1], [], []>} : vector<8x8xf32>, vector<8x8xf32>, vector<8x8xf32> -> vector<8x8xf32>
    %480 = vector.extract_strided_slice %437 {offsets = [0, 16], sizes = [8, 8], strides = [1, 1]} : vector<8x32xf32> to vector<8x8xf32>
    %481 = vector.extract_strided_slice %440 {offsets = [0, 16], sizes = [8, 8], strides = [1, 1]} : vector<8x32xf32> to vector<8x8xf32>
    %482 = tpu.transpose %481, [1, 0] : vector<8x8xf32> -> vector<8x8xf32>
    %cst_187 = arith.constant dense<0.000000e+00> : vector<8x8xf32>
    %483 = tpu.matmul %480, %482, %cst_187 {dimension_numbers = #tpu.dot_dimension_numbers<[1], [0], [0], [1], [0, 0, 1, 1], [], []>} : vector<8x8xf32>, vector<8x8xf32>, vector<8x8xf32> -> vector<8x8xf32>
    %484 = vector.broadcast %20 : vector<1x8xf32> to vector<8x8xf32>
    %485 = arith.addf %483, %484 : vector<8x8xf32>
    %cst_188 = arith.constant dense<0xFF800000> : vector<8xf32>
    %486 = vector.multi_reduction <maximumf>, %485, %cst_188 [1] : vector<8x8xf32> to vector<8xf32>
    %487 = vector.shape_cast %486 : vector<8xf32> to vector<8x1xf32>
    %488 = vector.broadcast %487 : vector<8x1xf32> to vector<8x8xf32>
    %489 = arith.subf %485, %488 : vector<8x8xf32>
    %490 = math.exp %489 : vector<8x8xf32>
    %cst_189 = arith.constant dense<0.000000e+00> : vector<8xf32>
    %491 = vector.multi_reduction <add>, %490, %cst_189 [1] : vector<8x8xf32> to vector<8xf32>
    %492 = vector.shape_cast %491 : vector<8xf32> to vector<8x1xf32>
    %493 = tpu.reciprocal %492 {approx = true} : vector<8x1xf32> -> vector<8x1xf32>
    %494 = vector.broadcast %493 : vector<8x1xf32> to vector<8x8xf32>
    %495 = arith.mulf %490, %494 : vector<8x8xf32>
    %496 = vector.extract_strided_slice %443 {offsets = [0, 16], sizes = [8, 8], strides = [1, 1]} : vector<8x32xf32> to vector<8x8xf32>
    %cst_190 = arith.constant dense<0.000000e+00> : vector<8x8xf32>
    %497 = tpu.matmul %495, %496, %cst_190 {dimension_numbers = #tpu.dot_dimension_numbers<[1], [0], [0], [1], [0, 0, 1, 1], [], []>} : vector<8x8xf32>, vector<8x8xf32>, vector<8x8xf32> -> vector<8x8xf32>
    %498 = vector.extract_strided_slice %437 {offsets = [0, 24], sizes = [8, 8], strides = [1, 1]} : vector<8x32xf32> to vector<8x8xf32>
    %499 = vector.extract_strided_slice %440 {offsets = [0, 24], sizes = [8, 8], strides = [1, 1]} : vector<8x32xf32> to vector<8x8xf32>
    %500 = tpu.transpose %499, [1, 0] : vector<8x8xf32> -> vector<8x8xf32>
    %cst_191 = arith.constant dense<0.000000e+00> : vector<8x8xf32>
    %501 = tpu.matmul %498, %500, %cst_191 {dimension_numbers = #tpu.dot_dimension_numbers<[1], [0], [0], [1], [0, 0, 1, 1], [], []>} : vector<8x8xf32>, vector<8x8xf32>, vector<8x8xf32> -> vector<8x8xf32>
    %502 = vector.broadcast %20 : vector<1x8xf32> to vector<8x8xf32>
    %503 = arith.addf %501, %502 : vector<8x8xf32>
    %cst_192 = arith.constant dense<0xFF800000> : vector<8xf32>
    %504 = vector.multi_reduction <maximumf>, %503, %cst_192 [1] : vector<8x8xf32> to vector<8xf32>
    %505 = vector.shape_cast %504 : vector<8xf32> to vector<8x1xf32>
    %506 = vector.broadcast %505 : vector<8x1xf32> to vector<8x8xf32>
    %507 = arith.subf %503, %506 : vector<8x8xf32>
    %508 = math.exp %507 : vector<8x8xf32>
    %cst_193 = arith.constant dense<0.000000e+00> : vector<8xf32>
    %509 = vector.multi_reduction <add>, %508, %cst_193 [1] : vector<8x8xf32> to vector<8xf32>
    %510 = vector.shape_cast %509 : vector<8xf32> to vector<8x1xf32>
    %511 = tpu.reciprocal %510 {approx = true} : vector<8x1xf32> -> vector<8x1xf32>
    %512 = vector.broadcast %511 : vector<8x1xf32> to vector<8x8xf32>
    %513 = arith.mulf %508, %512 : vector<8x8xf32>
    %514 = vector.extract_strided_slice %443 {offsets = [0, 24], sizes = [8, 8], strides = [1, 1]} : vector<8x32xf32> to vector<8x8xf32>
    %cst_194 = arith.constant dense<0.000000e+00> : vector<8x8xf32>
    %515 = tpu.matmul %513, %514, %cst_194 {dimension_numbers = #tpu.dot_dimension_numbers<[1], [0], [0], [1], [0, 0, 1, 1], [], []>} : vector<8x8xf32>, vector<8x8xf32>, vector<8x8xf32> -> vector<8x8xf32>
    %516 = tpu.concatenate %461, %479, %497, %515 in 1 : vector<8x8xf32>, vector<8x8xf32>, vector<8x8xf32>, vector<8x8xf32> -> vector<8x32xf32>
    %cst_195 = arith.constant dense<0.000000e+00> : vector<8x32xf32>
    %517 = tpu.matmul %516, %430, %cst_195 {dimension_numbers = #tpu.dot_dimension_numbers<[1], [0], [0], [1], [0, 0, 1, 1], [], []>} : vector<8x32xf32>, vector<32x32xf32>, vector<8x32xf32> -> vector<8x32xf32>
    %518 = vector.broadcast %432 : vector<1x32xf32> to vector<8x32xf32>
    %519 = arith.addf %517, %518 : vector<8x32xf32>
    %520 = arith.addf %519, %426 : vector<8x32xf32>
    %521 = vector.extract_strided_slice %310 {offsets = [1, 0], sizes = [1, 32], strides = [1, 1]} : vector<3x32xf32> to vector<1x32xf32>
    %522 = vector.extract_strided_slice %312 {offsets = [1, 0], sizes = [1, 32], strides = [1, 1]} : vector<3x32xf32> to vector<1x32xf32>
    %cst_196 = arith.constant dense<0.000000e+00> : vector<8xf32>
    %523 = vector.multi_reduction <add>, %520, %cst_196 [1] : vector<8x32xf32> to vector<8xf32>
    %524 = vector.shape_cast %523 : vector<8xf32> to vector<8x1xf32>
    %cst_197 = arith.constant 3.200000e+01 : f32
    %525 = vector.broadcast %cst_197 : f32 to vector<8x1xf32>
    %526 = arith.divf %524, %525 : vector<8x1xf32>
    %527 = vector.broadcast %526 : vector<8x1xf32> to vector<8x32xf32>
    %528 = arith.subf %520, %527 : vector<8x32xf32>
    %529 = arith.mulf %528, %528 : vector<8x32xf32>
    %cst_198 = arith.constant dense<0.000000e+00> : vector<8xf32>
    %530 = vector.multi_reduction <add>, %529, %cst_198 [1] : vector<8x32xf32> to vector<8xf32>
    %531 = vector.shape_cast %530 : vector<8xf32> to vector<8x1xf32>
    %cst_199 = arith.constant 3.200000e+01 : f32
    %532 = vector.broadcast %cst_199 : f32 to vector<8x1xf32>
    %533 = arith.divf %531, %532 : vector<8x1xf32>
    %534 = vector.broadcast %526 : vector<8x1xf32> to vector<8x32xf32>
    %535 = arith.subf %520, %534 : vector<8x32xf32>
    %cst_200 = arith.constant 9.99999974E-6 : f32
    %536 = vector.broadcast %cst_200 : f32 to vector<8x1xf32>
    %537 = arith.addf %533, %536 : vector<8x1xf32>
    %538 = math.rsqrt %537 : vector<8x1xf32>
    %539 = vector.broadcast %538 : vector<8x1xf32> to vector<8x32xf32>
    %540 = arith.mulf %535, %539 : vector<8x32xf32>
    %541 = vector.broadcast %521 : vector<1x32xf32> to vector<8x32xf32>
    %542 = arith.mulf %540, %541 : vector<8x32xf32>
    %543 = vector.broadcast %522 : vector<1x32xf32> to vector<8x32xf32>
    %544 = arith.addf %542, %543 : vector<8x32xf32>
    %c1_201 = arith.constant 1 : index
    %c0_202 = arith.constant 0 : index
    %c0_203 = arith.constant 0 : index
    %545 = vector.load %arg16[%c1_201, %c0_202, %c0_203] : memref<2x32x128xf32, #tpu.memory_space<vmem>>, vector<1x32x128xf32>
    %546 = vector.shape_cast %545 : vector<1x32x128xf32> to vector<32x128xf32>
    %cst_204 = arith.constant dense<0.000000e+00> : vector<8x128xf32>
    %547 = tpu.matmul %544, %546, %cst_204 {dimension_numbers = #tpu.dot_dimension_numbers<[1], [0], [0], [1], [0, 0, 1, 1], [], []>} : vector<8x32xf32>, vector<32x128xf32>, vector<8x128xf32> -> vector<8x128xf32>
    %c1_205 = arith.constant 1 : index
    %c0_206 = arith.constant 0 : index
    %c0_207 = arith.constant 0 : index
    %548 = vector.load %arg17[%c1_205, %c0_206, %c0_207] : memref<2x1x128xf32, #tpu.memory_space<vmem>>, vector<1x1x128xf32>
    %549 = vector.shape_cast %548 : vector<1x1x128xf32> to vector<1x128xf32>
    %550 = vector.broadcast %549 : vector<1x128xf32> to vector<8x128xf32>
    %551 = arith.addf %547, %550 : vector<8x128xf32>
    %cst_208 = arith.constant 0.000000e+00 : f32
    %552 = vector.broadcast %cst_208 : f32 to vector<8x128xf32>
    %553 = arith.maximumf %551, %552 : vector<8x128xf32>
    %c1_209 = arith.constant 1 : index
    %c0_210 = arith.constant 0 : index
    %c0_211 = arith.constant 0 : index
    %554 = vector.load %arg18[%c1_209, %c0_210, %c0_211] : memref<2x128x32xf32, #tpu.memory_space<vmem>>, vector<1x128x32xf32>
    %555 = vector.shape_cast %554 : vector<1x128x32xf32> to vector<128x32xf32>
    %cst_212 = arith.constant dense<0.000000e+00> : vector<8x32xf32>
    %556 = tpu.matmul %553, %555, %cst_212 {dimension_numbers = #tpu.dot_dimension_numbers<[1], [0], [0], [1], [0, 0, 1, 1], [], []>} : vector<8x128xf32>, vector<128x32xf32>, vector<8x32xf32> -> vector<8x32xf32>
    %c1_213 = arith.constant 1 : index
    %c0_214 = arith.constant 0 : index
    %c0_215 = arith.constant 0 : index
    %557 = vector.load %arg19[%c1_213, %c0_214, %c0_215] : memref<2x1x32xf32, #tpu.memory_space<vmem>>, vector<1x1x32xf32>
    %558 = vector.shape_cast %557 : vector<1x1x32xf32> to vector<1x32xf32>
    %559 = vector.broadcast %558 : vector<1x32xf32> to vector<8x32xf32>
    %560 = arith.addf %556, %559 : vector<8x32xf32>
    %561 = arith.addf %560, %544 : vector<8x32xf32>
    %562 = vector.extract_strided_slice %310 {offsets = [2, 0], sizes = [1, 32], strides = [1, 1]} : vector<3x32xf32> to vector<1x32xf32>
    %563 = vector.extract_strided_slice %312 {offsets = [2, 0], sizes = [1, 32], strides = [1, 1]} : vector<3x32xf32> to vector<1x32xf32>
    %cst_216 = arith.constant dense<0.000000e+00> : vector<8xf32>
    %564 = vector.multi_reduction <add>, %561, %cst_216 [1] : vector<8x32xf32> to vector<8xf32>
    %565 = vector.shape_cast %564 : vector<8xf32> to vector<8x1xf32>
    %cst_217 = arith.constant 3.200000e+01 : f32
    %566 = vector.broadcast %cst_217 : f32 to vector<8x1xf32>
    %567 = arith.divf %565, %566 : vector<8x1xf32>
    %568 = vector.broadcast %567 : vector<8x1xf32> to vector<8x32xf32>
    %569 = arith.subf %561, %568 : vector<8x32xf32>
    %570 = arith.mulf %569, %569 : vector<8x32xf32>
    %cst_218 = arith.constant dense<0.000000e+00> : vector<8xf32>
    %571 = vector.multi_reduction <add>, %570, %cst_218 [1] : vector<8x32xf32> to vector<8xf32>
    %572 = vector.shape_cast %571 : vector<8xf32> to vector<8x1xf32>
    %cst_219 = arith.constant 3.200000e+01 : f32
    %573 = vector.broadcast %cst_219 : f32 to vector<8x1xf32>
    %574 = arith.divf %572, %573 : vector<8x1xf32>
    %575 = vector.broadcast %567 : vector<8x1xf32> to vector<8x32xf32>
    %576 = arith.subf %561, %575 : vector<8x32xf32>
    %cst_220 = arith.constant 9.99999974E-6 : f32
    %577 = vector.broadcast %cst_220 : f32 to vector<8x1xf32>
    %578 = arith.addf %574, %577 : vector<8x1xf32>
    %579 = math.rsqrt %578 : vector<8x1xf32>
    %580 = vector.broadcast %579 : vector<8x1xf32> to vector<8x32xf32>
    %581 = arith.mulf %576, %580 : vector<8x32xf32>
    %582 = vector.broadcast %562 : vector<1x32xf32> to vector<8x32xf32>
    %583 = arith.mulf %581, %582 : vector<8x32xf32>
    %584 = vector.broadcast %563 : vector<1x32xf32> to vector<8x32xf32>
    %585 = arith.addf %583, %584 : vector<8x32xf32>
    %c0_221 = arith.constant 0 : index
    %c0_222 = arith.constant 0 : index
    %586 = vector.load %arg22[%c0_221, %c0_222] : memref<32x16xf32, #tpu.memory_space<vmem>>, vector<32x16xf32>
    %cst_223 = arith.constant dense<0.000000e+00> : vector<8x16xf32>
    %587 = tpu.matmul %585, %586, %cst_223 {dimension_numbers = #tpu.dot_dimension_numbers<[1], [0], [0], [1], [0, 0, 1, 1], [], []>} : vector<8x32xf32>, vector<32x16xf32>, vector<8x16xf32> -> vector<8x16xf32>
    %c0_224 = arith.constant 0 : index
    %c0_225 = arith.constant 0 : index
    %588 = vector.load %arg23[%c0_224, %c0_225] : memref<1x16xf32, #tpu.memory_space<vmem>>, vector<1x16xf32>
    %589 = vector.broadcast %588 : vector<1x16xf32> to vector<8x16xf32>
    %590 = arith.addf %587, %589 : vector<8x16xf32>
    %c0_226 = arith.constant 0 : index
    %c0_227 = arith.constant 0 : index
    %c0_228 = arith.constant 0 : index
    %591 = vector.load %arg24[%c0_226, %c0_227, %c0_228] : memref<1x8x16xf32, #tpu.memory_space<vmem>>, vector<1x8x16xf32>
    %592 = vector.shape_cast %591 : vector<1x8x16xf32> to vector<8x16xf32>
    %593 = vector.shape_cast %590 : vector<8x16xf32> to vector<1x8x16xf32>
    tpu.vector_store %arg24[%c0_226, %c0_227, %c0_228], %593 {strides = array<i32>} : memref<1x8x16xf32, #tpu.memory_space<vmem>>, vector<1x8x16xf32>,
    return
  }
  func.func @transform_0(%arg0: i32) -> (i32, i32, i32) {
    %c0_i32 = arith.constant 0 : i32
    %c0_i32_0 = arith.constant 0 : i32
    %c0_i32_1 = arith.constant 0 : i32
    return %arg0, %c0_i32, %c0_i32_0 : i32, i32, i32
  }
  func.func @transform_1(%arg0: i32) -> (i32, i32, i32) {
    %c0_i32 = arith.constant 0 : i32
    %c0_i32_0 = arith.constant 0 : i32
    %c0_i32_1 = arith.constant 0 : i32
    return %arg0, %c0_i32, %c0_i32_0 : i32, i32, i32
  }
  func.func @transform_2(%arg0: i32) -> (i32, i32, i32) {
    %c0_i32 = arith.constant 0 : i32
    %c0_i32_0 = arith.constant 0 : i32
    %c0_i32_1 = arith.constant 0 : i32
    return %arg0, %c0_i32, %c0_i32_0 : i32, i32, i32
  }
  func.func @transform_3(%arg0: i32) -> (i32, i32, i32) {
    %c0_i32 = arith.constant 0 : i32
    %c0_i32_0 = arith.constant 0 : i32
    %c0_i32_1 = arith.constant 0 : i32
    return %arg0, %c0_i32, %c0_i32_0 : i32, i32, i32
  }
  func.func @transform_4(%arg0: i32) -> (i32, i32) {
    %c0_i32 = arith.constant 0 : i32
    %c0_i32_0 = arith.constant 0 : i32
    %c0_i32_1 = arith.constant 0 : i32
    return %c0_i32, %c0_i32_0 : i32, i32
  }
  func.func @transform_5(%arg0: i32) -> (i32, i32) {
    %c0_i32 = arith.constant 0 : i32
    %c0_i32_0 = arith.constant 0 : i32
    %c0_i32_1 = arith.constant 0 : i32
    return %c0_i32, %c0_i32_0 : i32, i32
  }
  func.func @transform_6(%arg0: i32) -> (i32, i32) {
    %c0_i32 = arith.constant 0 : i32
    %c0_i32_0 = arith.constant 0 : i32
    %c0_i32_1 = arith.constant 0 : i32
    return %c0_i32, %c0_i32_0 : i32, i32
  }
  func.func @transform_7(%arg0: i32) -> (i32, i32) {
    %c0_i32 = arith.constant 0 : i32
    %c0_i32_0 = arith.constant 0 : i32
    %c0_i32_1 = arith.constant 0 : i32
    return %c0_i32, %c0_i32_0 : i32, i32
  }
  func.func @transform_8(%arg0: i32) -> (i32, i32) {
    %c0_i32 = arith.constant 0 : i32
    %c0_i32_0 = arith.constant 0 : i32
    %c0_i32_1 = arith.constant 0 : i32
    return %c0_i32, %c0_i32_0 : i32, i32
  }
  func.func @transform_9(%arg0: i32) -> (i32, i32, i32, i32) {
    %c0_i32 = arith.constant 0 : i32
    %c0_i32_0 = arith.constant 0 : i32
    %c0_i32_1 = arith.constant 0 : i32
    %c0_i32_2 = arith.constant 0 : i32
    %c0_i32_3 = arith.constant 0 : i32
    return %c0_i32, %c0_i32_0, %c0_i32_1, %c0_i32_2 : i32, i32, i32, i32
  }
  func.func @transform_10(%arg0: i32) -> (i32, i32, i32) {
    %c0_i32 = arith.constant 0 : i32
    %c0_i32_0 = arith.constant 0 : i32
    %c0_i32_1 = arith.constant 0 : i32
    %c0_i32_2 = arith.constant 0 : i32
    return %c0_i32, %c0_i32_0, %c0_i32_1 : i32, i32, i32
  }
  func.func @transform_11(%arg0: i32) -> (i32, i32, i32) {
    %c0_i32 = arith.constant 0 : i32
    %c0_i32_0 = arith.constant 0 : i32
    %c0_i32_1 = arith.constant 0 : i32
    %c0_i32_2 = arith.constant 0 : i32
    return %c0_i32, %c0_i32_0, %c0_i32_1 : i32, i32, i32
  }
  func.func @transform_12(%arg0: i32) -> (i32, i32, i32, i32) {
    %c0_i32 = arith.constant 0 : i32
    %c0_i32_0 = arith.constant 0 : i32
    %c0_i32_1 = arith.constant 0 : i32
    %c0_i32_2 = arith.constant 0 : i32
    %c0_i32_3 = arith.constant 0 : i32
    return %c0_i32, %c0_i32_0, %c0_i32_1, %c0_i32_2 : i32, i32, i32, i32
  }
  func.func @transform_13(%arg0: i32) -> (i32, i32, i32) {
    %c0_i32 = arith.constant 0 : i32
    %c0_i32_0 = arith.constant 0 : i32
    %c0_i32_1 = arith.constant 0 : i32
    %c0_i32_2 = arith.constant 0 : i32
    return %c0_i32, %c0_i32_0, %c0_i32_1 : i32, i32, i32
  }
  func.func @transform_14(%arg0: i32) -> (i32, i32, i32) {
    %c0_i32 = arith.constant 0 : i32
    %c0_i32_0 = arith.constant 0 : i32
    %c0_i32_1 = arith.constant 0 : i32
    %c0_i32_2 = arith.constant 0 : i32
    return %c0_i32, %c0_i32_0, %c0_i32_1 : i32, i32, i32
  }
  func.func @transform_15(%arg0: i32) -> (i32, i32, i32) {
    %c0_i32 = arith.constant 0 : i32
    %c0_i32_0 = arith.constant 0 : i32
    %c0_i32_1 = arith.constant 0 : i32
    %c0_i32_2 = arith.constant 0 : i32
    return %c0_i32, %c0_i32_0, %c0_i32_1 : i32, i32, i32
  }
  func.func @transform_16(%arg0: i32) -> (i32, i32, i32) {
    %c0_i32 = arith.constant 0 : i32
    %c0_i32_0 = arith.constant 0 : i32
    %c0_i32_1 = arith.constant 0 : i32
    %c0_i32_2 = arith.constant 0 : i32
    return %c0_i32, %c0_i32_0, %c0_i32_1 : i32, i32, i32
  }
  func.func @transform_17(%arg0: i32) -> (i32, i32, i32) {
    %c0_i32 = arith.constant 0 : i32
    %c0_i32_0 = arith.constant 0 : i32
    %c0_i32_1 = arith.constant 0 : i32
    %c0_i32_2 = arith.constant 0 : i32
    return %c0_i32, %c0_i32_0, %c0_i32_1 : i32, i32, i32
  }
  func.func @transform_18(%arg0: i32) -> (i32, i32, i32) {
    %c0_i32 = arith.constant 0 : i32
    %c0_i32_0 = arith.constant 0 : i32
    %c0_i32_1 = arith.constant 0 : i32
    %c0_i32_2 = arith.constant 0 : i32
    return %c0_i32, %c0_i32_0, %c0_i32_1 : i32, i32, i32
  }
  func.func @transform_19(%arg0: i32) -> (i32, i32, i32) {
    %c0_i32 = arith.constant 0 : i32
    %c0_i32_0 = arith.constant 0 : i32
    %c0_i32_1 = arith.constant 0 : i32
    %c0_i32_2 = arith.constant 0 : i32
    return %c0_i32, %c0_i32_0, %c0_i32_1 : i32, i32, i32
  }
  func.func @transform_20(%arg0: i32) -> (i32, i32, i32) {
    %c0_i32 = arith.constant 0 : i32
    %c0_i32_0 = arith.constant 0 : i32
    %c0_i32_1 = arith.constant 0 : i32
    %c0_i32_2 = arith.constant 0 : i32
    return %c0_i32, %c0_i32_0, %c0_i32_1 : i32, i32, i32
  }
  func.func @transform_21(%arg0: i32) -> (i32, i32) {
    %c0_i32 = arith.constant 0 : i32
    %c0_i32_0 = arith.constant 0 : i32
    %c0_i32_1 = arith.constant 0 : i32
    return %c0_i32, %c0_i32_0 : i32, i32
  }
  func.func @transform_22(%arg0: i32) -> (i32, i32) {
    %c0_i32 = arith.constant 0 : i32
    %c0_i32_0 = arith.constant 0 : i32
    %c0_i32_1 = arith.constant 0 : i32
    return %c0_i32, %c0_i32_0 : i32, i32
  }
  func.func @transform_23(%arg0: i32) -> (i32, i32, i32) {
    %c0_i32 = arith.constant 0 : i32
    %c0_i32_0 = arith.constant 0 : i32
    %c0_i32_1 = arith.constant 0 : i32
    return %arg0, %c0_i32, %c0_i32_0 : i32, i32, i32
  }
}

</mosaic_0001>

<bundles_post_ra>
// kernel: motion_decoder_transformers_forward.1
= control target key start
LH: loop header
LB: loop body
LE: loop exit
PB: predicated region body
PF: predicated region fallthrough
CT: control target
= control target key end

     0   :  { %s7872_s0 = inlined_call_operand.vmem [shape: f32[2,8,16], index: 0, kind: input, shape index: {}]   ;;  %s7873_s1 = inlined_call_operand.vmem [shape: f32[2,8,32], index: 1, kind: input, shape index: {}]   ;;  %s7874_s2 = inlined_call_operand.vmem [shape: f32[2,8,8], index: 2, kind: input, shape index: {}]   ;;  %s7875_s3 = inlined_call_operand.vmem [shape: f32[2,1,8], index: 3, kind: input, shape index: {}]   ;;  %s7876_s4 = inlined_call_operand.vmem [shape: f32[8,32], index: 4, kind: input, shape index: {}]   ;;  %s7877_s5 = inlined_call_operand.vmem [shape: f32[16,32], index: 5, kind: input, shape index: {}]   ;;  %s7878_s6 = inlined_call_operand.vmem [shape: f32[1,32], index: 6, kind: input, shape index: {}]   ;;  %s7879_s7 = inlined_call_operand.vmem [shape: f32[32,32], index: 7, kind: input, shape index: {}]   ;;  %s7880_s8 = inlined_call_operand.vmem [shape: f32[1,32], index: 8, kind: input, shape index: {}]   ;;  %s7881_s9 = inlined_call_operand.vmem [shape: f32[2,3,32,32], index: 9, kind: input, shape index: {}]   ;;  %s7882_s10 = inlined_call_operand.vmem [shape: f32[2,32,32], index: 10, kind: input, shape index: {}]   ;;  %s7883_s11 = inlined_call_operand.vmem [shape: f32[2,1,32], index: 11, kind: input, shape index: {}]   ;;  %s7884_s12 = inlined_call_operand.vmem [shape: f32[2,3,32,32], index: 12, kind: input, shape index: {}]   ;;  %s7885_s13 = inlined_call_operand.vmem [shape: f32[2,32,32], index: 13, kind: input, shape index: {}]   ;;  %s7886_s14 = inlined_call_operand.vmem [shape: f32[2,1,32], index: 14, kind: input, shape index: {}]   ;;  %s7887_s15 = inlined_call_operand.vmem [shape: f32[2,32,128], index: 15, kind: input, shape index: {}]   ;;  %s7888_s16 = inlined_call_operand.vmem [shape: f32[2,1,128], index: 16, kind: input, shape index: {}]   ;;  %s7889_s17 = inlined_call_operand.vmem [shape: f32[2,128,32], index: 17, kind: input, shape index: {}]   ;;  %s7890_s18 = inlined_call_operand.vmem [shape: f32[2,1,32], index: 18, kind: input, shape index: {}]   ;;  %s7891_s19 = inlined_call_operand.vmem [shape: f32[2,3,32], index: 19, kind: input, shape index: {}]   ;;  %s7892_s20 = inlined_call_operand.vmem [shape: f32[2,3,32], index: 20, kind: input, shape index: {}]   ;;  %s7893_s21 = inlined_call_operand.vmem [shape: f32[32,16], index: 21, kind: input, shape index: {}]   ;;  %s7894_s22 = inlined_call_operand.vmem [shape: f32[1,16], index: 22, kind: input, shape index: {}]   ;;  %s7895_s23 = inlined_call_operand.hbm [shape: f32[2,8,16], index: 23, kind: output, shape index: {}]  }
   0x1   :  { %7918 = sst [smem:[#allocation11_spill]] %s7872_s0 }
   0x2   :  { %7919 = sst [smem:[#allocation12_spill]] %s7873_s1 }
   0x3   :  { %7920 = sst [smem:[#allocation13_spill]] %s7874_s2 }
   0x4   :  { %7921 = sst [smem:[#allocation14_spill]] %s7875_s3 }
   0x5   :  { %7922 = sst [smem:[#allocation15_spill]] %s7876_s4 }
   0x6   :  { %7923 = sst [smem:[#allocation16_spill]] %s7877_s5 }
   0x7   :  { %7924 = sst [smem:[#allocation17_spill]] %s7878_s6 }
   0x8   :  { %7925 = sst [smem:[#allocation18_spill]] %s7879_s7 }
   0x9   :  { %7926 = sst [smem:[#allocation19_spill]] %s7880_s8 }
   0xa   :  { %7927 = sst [smem:[#allocation20_spill]] %s7881_s9 }
   0xb   :  { %28 = vsyncpa [#allocation3], 0 }
   0xc   :  { %30 = vsyncpa [#allocation3 + $0x1], 0  ;;  %s6872_s4 = smov 0   ;;  %s6874_s30 = smov 0  }
   0xd   :  { %s6876_s24 = smov 0   ;;  %s6878_s25 = smov 0  }
   0xe LB: > { %7928 = sst [smem:[#allocation5_spill]] %s6728_s4  ;;  %s6893_s5 = sadd.s32 4294967295, %s6740_s25   ;;  %s6740_s25 = sphi %s6878_s25, %s7955_s25   ;;  %s6736_s24 = sphi %s6876_s24, %s7957_s24   ;;  %s6732_s30 = sphi %s6874_s30, %s7959_s30   ;;  %s6728_s4 = sphi %s6872_s4, %s7958_s4  }
   0xf   : > { %7929 = sst [smem:[#allocation6_spill]] %s6736_s24  ;;  %s5575_s1 = sadd.s32 4294967294, %s6740_s25  }
  0x10   : > { %7930 = sst [smem:[#allocation7_spill]] %s6740_s25  ;;  %s6897_s26 = sadd.s32 1, %s6740_s25  }
  0x11   : > { %7931 = sst [smem:[#allocation8_spill]] %s6897_s26  ;;  %s546_s2 = sadd.s32 1, %s6736_s24 }
  0x12   : > { %s543_s6 = ssub.s32 %s6740_s25, %s6897_s26  ;;  %p556_p0 = scmp.ne.s32.totalorder %s6736_s24, %s6732_s30 }
  0x13   : > { %p544_p1 = scmp.eq.s32.totalorder %s543_s6, 0  ;;  %p557_p2 = scmp.eq.s32.totalorder %s6893_s5, 1 }
  0x14   : > { %p562_p3 = scmp.ne.s32.totalorder %s6732_s30, %s6728_s4  ;;  %p563_p4 = scmp.eq.s32.totalorder %s5575_s1, 1 }
  0x15   : > { %s6908_s27 = scalar_select %p544_p1, %s6736_s24, %s546_s2  }
  0x16   : > { %p6910_p5 = por %p557_p2, %p556_p0  ;;  %p6914_p6 = por %p563_p4, %p562_p3 }
  0x17   : > { %7932 = sst [smem:[#allocation9_spill]] %s6908_s27  ;;  %p5578_p7 = scmp.ge.s32.totalorder %s6740_s25, 1 }
  0x18   : > { %s7934_s28 = scalar_select %p6914_p6, 1, 0 }
  0x19   : > { %p665_p8 = scmp.lt.s32.totalorder %s6740_s25, 3 }
  0x1a   : > { %7935 = sst [smem:[#allocation10_spill]] %s7934_s28 }
  0x1b   : > { %p666_p9 = pnand %p5578_p7, %p665_p8 }
  0x1c   : > { %s7936_s0 = sld [smem:[#allocation16_spill]] (!%p666_p9)  ;;  %p739_p10 = scmp.lt.s32.totalorder (!%p666_p9), %s6893_s5, 1  ;;  %v6742_v2 = vmov (!%p666_p9), 0.0|0.0   ;;  %vm6743_vm0 = vmmov (!%p666_p9), 0   ;;  %v6744_v4 = vmov (!%p666_p9), 0.0   ;;  %vm772_vm1 = vcmask (!%p666_p9), 130048  }
  0x1d   : > { %669 = sbr.rel (%p666_p9) target bundleno = 8876 (0x22ac), region = 112  ;;  %6383 = vmatprep.subr.bf16.mxu0 (!%p666_p9), %v6742_v2  ;;  %5930 = vmatprep.mubr.msk.f32.mxu0 (!%p666_p9), %vm6743_vm0, %v6744_v4  ;;  %s7937_s29 = sld [smem:[#allocation18_spill]] (!%p666_p9)  ;;  %vm858_vm2 = vcmask (!%p666_p9), 261120   ;;  %vm1165_vm3 = vcmask (!%p666_p9), 64512   ;;  %vm1836_vm5 = vcmask (!%p666_p9), 195584  }
  0x1e   : > { %6398 = vmatprep.subr.bf16.mxu1 (!%p666_p9), %v6742_v2  ;;  %5963 = vmatprep.mubr.msk.f32.mxu1 (!%p666_p9), %vm6743_vm0, %v6744_v4  ;;  %s7938_s9 = sld [smem:[#allocation20_spill]] (!%p666_p9)  ;;  %s7939_s28 = sld [smem:[#allocation11_spill]] (!%p666_p9) }
  0x1f   : > { %s7940_s27 = sld [smem:[#allocation12_spill]] (!%p666_p9)  ;;  %s7908_s26 = smov (!%p666_p9), 16  }
  0x20   : > { %s7944_s8 = sld [smem:[#allocation19_spill]] (!%p666_p9) }
  0x22   : > { %v763_v0 = vld [vmem:[%s7936_s0] sm:$0xff] (!%p666_p9)  ;;  %v764_v1 = vld [vmem:[%s7936_s0 + $0x8] sm:$0xff] (!%p666_p9) }
  0x23   : > { %v6384_v3 = vpack.c.bf16 (!%p666_p9), %v764_v1, %v763_v0  ;;  %v847_v5 = vld [vmem:[%s7937_s29] sm:$0xff] (!%p666_p9)  ;;  %v848_v6 = vld [vmem:[%s7937_s29 + $0x8] sm:$0xff] (!%p666_p9)  ;;  %v849_v11 = vld [vmem:[%s7937_s29 + $0x10] sm:$0xff] (!%p666_p9) }
  0x24   : > { %s6937_s1 = scalar_select %p739_p10, %s6893_s5, 1  ;;  %v938_v7 = vld [vmem:[%s7938_s9 + $0x20] sm:$0xff]  ;;  %v939_v8 = vld [vmem:[%s7938_s9 + $0x28] sm:$0xff]  ;;  %v6387_v9 = vpack.c.bf16 %v848_v6, %v847_v5  ;;  %v850_v12 = vld [vmem:[%s7937_s29 + $0x18] sm:$0xff] }
  0x25   : > { %6385 = vmatpush3.bf16.msra.mxu0 %v6384_v3  ;;  %v6399_v10 = vpack.c.bf16 %v939_v8, %v938_v7  ;;  %v6390_v14 = vpack.c.bf16 %v850_v12, %v849_v11  ;;  %v934_v15 = vld [vmem:[%s7938_s9] sm:$0xff]  ;;  %v935_v16 = vld [vmem:[%s7938_s9 + $0x8] sm:$0xff]  ;;  %v936_v19 = vld [vmem:[%s7938_s9 + $0x10] sm:$0xff]  ;;  %s7942_s29 = sld [smem:[#allocation15_spill]] }
  0x26   : > { %s6949_s6 = sshll.u32 %s6937_s1, 3  ;;  %6386 = vmatprep.subr.bf16.mxu0 %v6742_v2  ;;  %v6393_v18 = vpack.c.bf16 %v935_v16, %v934_v15  ;;  %v937_v20 = vld [vmem:[%s7938_s9 + $0x18] sm:$0xff]  ;;  %v940_v22 = vld [vmem:[%s7938_s9 + $0x30] sm:$0xff]  ;;  %v942_v26 = vld [vmem:[%s7938_s9 + $0x40] sm:$0xff] }
  0x27   : > { %s742_s4 = scalar_lea.vmem %s7939_s28, %s6949_s6  ;;  %6400 = vmatpush3.bf16.msra.mxu1 %v6399_v10  ;;  %s746_s24 = scalar_lea.vmem %s7940_s27, %s6949_s6  ;;  %v6396_v21 = vpack.c.bf16 %v937_v20, %v936_v19  ;;  %v941_v23 = vld [vmem:[%s7938_s9 + $0x38] sm:$0xff]  ;;  %v943_v27 = vld [vmem:[%s7938_s9 + $0x48] sm:$0xff]  ;;  %v944_v34 = vld [vmem:[%s7938_s9 + $0x50] sm:$0xff] }
  0x28   : > { %v754_v13 = vld [vmem:[%s742_s4] sm:$0xff]  ;;  %6401 = vmatprep.subr.bf16.mxu1 %v6742_v2  ;;  %v6402_v24 = vpack.c.bf16 %v941_v23, %v940_v22  ;;  %s7941_s28 = sld [smem:[#allocation17_spill]]  ;;  %v6405_v32 = vpack.c.bf16 %v943_v27, %v942_v26  ;;  %v945_v35 = vld [vmem:[%s7938_s9 + $0x58] sm:$0xff]  ;;  %s7916_s27 = smov 120  }
  0x29   : > { %5931 = vmatmul.mubr.msk.f32.vlgmr.msra.gmra.mrb[0].mxu0 %vm772_vm1, %v754_v13  ;;  %v755_v17 = vld [vmem:[%s746_s24] sm:$0xff]  ;;  %v6408_v36 = vpack.c.bf16 %v945_v35, %v944_v34  ;;  %s7914_s24 = smov 104   ;;  %s7943_s4 = sld [smem:[#allocation13_spill]] }
  0x2a   : > { %6388 = vmatpush3.bf16.msra.mxu0 %v6387_v9  ;;  %5941 = vmatprep.mubr.msk.f32.mxu0 %vm6743_vm0, %v6744_v4 }
  0x2b   : > { %6389 = vmatprep.subr.bf16.mxu0 %v6742_v2  ;;  %6403 = vmatpush3.bf16.msra.mxu1 %v6402_v24  ;;  %v756_v28 = vld [vmem:[%s7942_s29] sm:$0xff]  ;;  %s7912_s29 = smov 112  }
  0x2c   : > { %5977 = vmatprep.subr.mxu1 %v6744_v4 }
  0x2e   : > { %6391 = vmatpush3.bf16.msra.mxu0 %v6390_v14  ;;  %v5583_v25 = vld [vmem:[%s7941_s28] ss:$0 sm:$0xff]  ;;  %s7906_s28 = smov 24  }
  0x2f   : > { %6392 = vmatprep.subr.bf16.mxu0 %v6742_v2  ;;  %s750_s2 = scalar_lea.vmem %s7943_s4, %s6949_s6  ;;  %s7910_s6 = smov 8  }
  0x30   : > { %v757_v52 = vld [vmem:[%s750_s2] sm:$0xff] }
  0x31   : > { %5942 = vmatmul.mubr.msk.f32.vlgmr.msra.gmra.mrb[2].mxu0 %vm858_vm2, %v755_v17  ;;  %vm758_vm4 = vcmp.eq.f32.partialorder %v757_v52, 0.0 }
  0x32   : > { %6394 = vmatpush3.bf16.msra.mxu0 %v6393_v18  ;;  %5952 = vmatprep.mubr.msk.f32.mxu0 %vm6743_vm0, %v6744_v4  ;;  %v7067_v53 = vsel %vm758_vm4, -1e+20, %v6744_v4 }
  0x33   : > { %6395 = vmatprep.subr.bf16.mxu0 %v6742_v2 }
  0x36   : > { %6397 = vmatpush3.bf16.msra.mxu0 %v6396_v21 }
  0x37   : > { %6404 = vmatprep.subr.bf16.mxu0 %v6742_v2 }
  0xfc   : > { %v842_v29 = vpop.f32.mrb[0].mxu0 }
  0xfd   : > { %v843_v30 = vadd.f32 %v5583_v25, %v842_v29  ;;  %v5932_v31 = vpop.f32.mrb[1].mxu0 }
  0xff   : > { %v7008_v33 = vadd.f32 %v843_v30, %v756_v28 }
 0x101   : > { %5953 = vmatmul.mubr.msk.f32.vlgmr.msra.gmra.mrb[4].mxu0 %vm858_vm2, %v7008_v33  ;;  %5964 = vmatmul.mubr.msk.f32.vlgmr.msra.gmra.mrb[0].mxu1 %vm858_vm2, %v7008_v33 }
 0x102   : > { %6406 = vmatpush3.bf16.msra.mxu0 %v6405_v32  ;;  %5974 = vmatprep.mubr.msk.f32.mxu0 %vm6743_vm0, %v6744_v4 }
 0x103   : > { %6407 = vmatprep.subr.bf16.mxu0 %v6742_v2  ;;  %5979 = vmatprep.mubr.msk.f32.mxu1 %vm6743_vm0, %v6744_v4 }
 0x104   : > { %v7025_v37 = vpop.f32.mrb[2].mxu0 }
 0x105   : > { %v5943_v38 = vpop.f32.mrb[3].mxu0 }
 0x106   : > { %6409 = vmatpush3.bf16.msra.mxu0 %v6408_v36 }
 0x107   : > { %5982 = vmatprep.subr.mxu0 %v6744_v4 }
 0x109   : > { %5975 = vmatmul.mubr.msk.f32.vlgmr.msra.gmra.mrb[6].mxu0 %vm858_vm2, %v7008_v33 }
 0x10a   : > { %5984 = vmatprep.mubr.msk.f32.mxu0 %vm6743_vm0, %v6744_v4 }
 0x1d4   : > { %v1020_v39 = vpop.f32.mrb[4].mxu0  ;;  %v1091_v40 = vpop.f32.mrb[0].mxu1 }
 0x1d5   : > { %v1024_v41 = vmul.f32 0.17677669, %v1020_v39  ;;  %1494 = vrot.lane.b32.xlu1 %v1091_v40, %s7912_s29  ;;  %1328 = vrot.lane.b32.xlu0 %v1091_v40, %s7916_s27  ;;  %v5954_v42 = vpop.f32.mrb[5].mxu0  ;;  %v5965_v43 = vpop.f32.mrb[1].mxu1 }
 0x1d6   : > { %5978 = vmatpush3.xpose.msk.msra.mxu1 %vm1165_vm3, %v1091_v40 }
 0x1d7   : > { %5987 = vmatprep.subr.mxu1 %v6744_v4 }
 0x1d9   : > { %5980 = vmatmul.mubr.msk.f32.vlgmr.msra.gmra.mrb[2].mxu1 %vm1165_vm3, %v1024_v41  ;;  %1492 = vrot.lane.b32.xlu1 %v1024_v41, %s7912_s29 }
 0x1da   : > { %1326 = vrot.lane.b32.xlu0 %v1024_v41, %s7916_s27  ;;  %5989 = vmatprep.mubr.msk.f32.mxu1 %vm6743_vm0, %v6744_v4 }
 0x1dc   : > { %v7041_v44 = vpop.f32.mrb[6].mxu0 }
 0x1dd   : > { %v5976_v45 = vpop.f32.mrb[7].mxu0  ;;  %5983 = vmatpush3.msra.mxu0 %v7041_v44  ;;  %1657 = vrot.lane.b32.xlu1 %v1024_v41, %s7914_s24 }
 0x1de   : > { %1659 = vrot.lane.b32.xlu0 %v1091_v40, %s7914_s24  ;;  %5992 = vmatprep.subr.mxu0 %v6744_v4 }
 0x247   : > { %v1329_v46 = vpop.permute.xlu0 %1328  ;;  %v1495_v47 = vpop.permute.xlu1 %1494 }
 0x248   : > { %5988 = vmatpush3.xpose.msk.msra.mxu1 %vm1165_vm3, %v1329_v46 }
 0x249   : > { %5997 = vmatprep.subr.mxu1 %v6744_v4 }
 0x24b   : > { %v1493_v49 = vpop.permute.xlu1 %1492 }
 0x24c   : > { %v1327_v48 = vpop.permute.xlu0 %1326 }
 0x24d   : > { %5990 = vmatmul.mubr.msk.f32.vlgmr.msra.gmra.mrb[4].mxu1 %vm1165_vm3, %v1327_v48  ;;  %v947_v48 = vld [vmem:[%s7882_s10 + $0x8] sm:$0xff] }
 0x24e   : > { %5998 = vmatpush3.xpose.msk.msra.mxu1 %vm1165_vm3, %v1495_v47  ;;  %5999 = vmatprep.mubr.msk.f32.mxu1 %vm6743_vm0, %v6744_v4  ;;  %v946_v47 = vld [vmem:[%s7882_s10] sm:$0xff] }
 0x24f   : > { %6007 = vmatprep.subr.mxu1 %v6744_v4  ;;  %v1658_v51 = vpop.permute.xlu1 %1657 }
 0x250   : > { %v1660_v50 = vpop.permute.xlu0 %1659 }
 0x251   : > { %6000 = vmatmul.mubr.msk.f32.vlgmr.msra.gmra.mrb[6].mxu1 %vm1165_vm3, %v1493_v49  ;;  %v6411_v49 = vpack.c.bf16 %v947_v48, %v946_v47  ;;  %v1952_v48 = vld [vmem:[%s7884_s12 + $0x50] sm:$0xff] }
 0x252   : > { %6008 = vmatpush3.xpose.msk.msra.mxu1 %vm1165_vm3, %v1660_v50  ;;  %6009 = vmatprep.mubr.msk.f32.mxu1 %vm6743_vm0, %v6744_v4  ;;  %v948_v50 = vld [vmem:[%s7882_s10 + $0x10] sm:$0xff] }
 0x253   : > { %6410 = vmatprep.subr.bf16.mxu1 %v6742_v2 }
 0x255   : > { %6010 = vmatmul.mubr.msk.f32.vlgmr.msra.gmra.mrb[8].mxu1 %vm1165_vm3, %v1658_v51  ;;  %v949_v51 = vld [vmem:[%s7882_s10 + $0x18] sm:$0xff] }
 0x256   : > { %6025 = vmatprep.mubr.msk.f32.mxu1 %vm6743_vm0, %v6744_v4  ;;  %6412 = vmatpush3.bf16.msra.mxu1 %v6411_v49  ;;  %v6414_v52 = vpack.c.bf16 %v949_v51, %v948_v50  ;;  %v1953_v49 = vld [vmem:[%s7884_s12 + $0x58] sm:$0xff] }
 0x257   : > { %6413 = vmatprep.subr.bf16.mxu1 %v6742_v2  ;;  %v6432_v50 = vpack.c.bf16 %v1953_v49, %v1952_v48 }
 0x25a   : > { %6415 = vmatpush3.bf16.msra.mxu1 %v6414_v52 }
 0x25b   : > { %6422 = vmatprep.subr.bf16.mxu1 %v6742_v2 }
 0x2ac   : > { %v1238_v54 = vpop.f32.mrb[2].mxu1 }
 0x2ad   : > { %v1239_v55 = vadd.f32 %v1238_v54, %v7067_v53  ;;  %v5981_v56 = vpop.f32.mrb[3].mxu1 }
 0x2af   : > { %v1242_v57 = vsel %vm1165_vm3, %v1239_v55, -inf }
 0x2b0   : > { %1243 = vmax.xlane.f32.xlu0 %v1242_v57 }
 0x320   : > { %v1400_v58 = vpop.f32.mrb[4].mxu1 }
 0x321   : > { %v1401_v59 = vadd.f32 %v1400_v58, %v7067_v53  ;;  %v5991_v60 = vpop.f32.mrb[5].mxu1 }
 0x323   : > { %v1404_v61 = vsel %vm1165_vm3, %v1401_v59, -inf }
 0x324   : > { %1405 = vmax.xlane.f32.xlu1 %v1404_v61  ;;  %v1566_v62 = vpop.f32.mrb[6].mxu1  ;;  %v1946_v61 = vld [vmem:[%s7884_s12 + $0x20] sm:$0xff] }
 0x325   : > { %v1567_v63 = vadd.f32 %v1566_v62, %v7067_v53  ;;  %v6001_v0 = vpop.f32.mrb[7].mxu1  ;;  %v1947_v62 = vld [vmem:[%s7884_s12 + $0x28] sm:$0xff] }
 0x327   : > { %v1570_v1 = vsel %vm1165_vm3, %v1567_v63, -inf }
 0x328   : > { %1571 = vmax.xlane.f32.xlu0 %v1570_v1  ;;  %v1731_v3 = vpop.f32.mrb[8].mxu1  ;;  %v6423_v1 = vpack.c.bf16 %v1947_v62, %v1946_v61 }
 0x329   : > { %v1732_v5 = vadd.f32 %v1731_v3, %v7067_v53  ;;  %v6011_v6 = vpop.f32.mrb[9].mxu1 }
 0x32a   : > { %v1948_v6 = vld [vmem:[%s7884_s12 + $0x30] sm:$0xff] }
 0x32b   : > { %v1735_v7 = vsel %vm1165_vm3, %v1732_v5, -inf }
 0x32c   : > { %1736 = vmax.xlane.f32.xlu0 %v1735_v7  ;;  %v1949_v7 = vld [vmem:[%s7884_s12 + $0x38] sm:$0xff] }
 0x335   : > { %1416 = vrot.lane.b32.xlu1 %v7041_v44, %s7916_s27 }
 0x33d   : > { %v1244_v8 = vpop.xlane.xlu0 %1243 }
 0x33e   : > { %v1245_v9 = vsub.f32 %v1239_v55, %v1244_v8 }
 0x340   : > { %v1246_v10 = vmul.f32 1.442695, %v1245_v9  ;;  %v6426_v9 = vpack.c.bf16 %v1949_v7, %v1948_v6 }
 0x342   : > { %6602 = vpow2.f32 %v1246_v10  ;;  %v5585_v10 = vld [vmem:[%s7944_s8] ss:$0 sm:$0xff]  ;;  %s736_s8 = sand.u32 1, %s6732_s30  }
 0x34c   : > { %v6603_v11 = vpop.eup %6602 }
 0x34d   : > { %v1248_v12 = vsel %vm1165_vm3, %v6603_v11, 0.0 }
 0x359   : > { %1249 = vadd.xlane.f32.xlu1 %v1248_v12  ;;  %v5602_v12 = vld [vmem:[%s7883_s11] ss:$0 sm:$0xff] }
 0x3b1   : > { %v1406_v13 = vpop.xlane.xlu1 %1405 }
 0x3b2   : > { %v1407_v14 = vsub.f32 %v1401_v59, %v1406_v13 }
 0x3b4   : > { %v1408_v15 = vmul.f32 1.442695, %v1407_v14 }
 0x3b5   : > { %v1572_v16 = vpop.xlane.xlu0 %1571  ;;  %v1417_v28 = vpop.permute.xlu1 %1416 }
 0x3b6   : > { %6604 = vpow2.f32 %v1408_v15  ;;  %v1573_v17 = vsub.f32 %v1567_v63, %v1572_v16 }
 0x3b8   : > { %v1574_v18 = vmul.f32 1.442695, %v1573_v17 }
 0x3b9   : > { %v1737_v19 = vpop.xlane.xlu0 %1736 }
 0x3ba   : > { %6606 = vpow2.f32 %v1574_v18  ;;  %v1738_v20 = vsub.f32 %v1732_v5, %v1737_v19 }
 0x3bc   : > { %v1739_v21 = vmul.f32 1.442695, %v1738_v20 }
 0x3be   : > { %6608 = vpow2.f32 %v1739_v21 }
 0x3c0   : > { %v6605_v22 = vpop.eup %6604 }
 0x3c1   : > { %v1410_v23 = vsel %vm1165_vm3, %v6605_v22, 0.0 }
 0x3c2   : > { %1411 = vadd.xlane.f32.xlu0 %v1410_v23  ;;  %v1942_v23 = vld [vmem:[%s7884_s12] sm:$0xff] }
 0x3c4   : > { %v6607_v24 = vpop.eup %6606 }
 0x3c5   : > { %v1576_v25 = vsel %vm1165_vm3, %v6607_v24, 0.0 }
 0x3c6   : > { %1577 = vadd.xlane.f32.xlu1 %v1576_v25 }
 0x3c8   : > { %v6609_v26 = vpop.eup %6608 }
 0x3c9   : > { %v1741_v27 = vsel %vm1165_vm3, %v6609_v26, 0.0 }
 0x3ca   : > { %1742 = vadd.xlane.f32.xlu0 %v1741_v27  ;;  %v1945_v27 = vld [vmem:[%s7884_s12 + $0x18] sm:$0xff] }
 0x3d7   : > { %1746 = vrot.lane.b32.xlu1 %v7041_v44, %s7914_s24 }
 0x3e0   : > { %1581 = vrot.lane.b32.xlu0 %v7041_v44, %s7912_s29 }
 0x3e6   : > { %v1250_v29 = vpop.xlane.xlu1 %1249 }
 0x3e7   : > { %6610 = vrcp.f32 %v1250_v29 }
 0x3f1   : > { %v6611_v30 = vpop.eup %6610 }
 0x3f2   : > { %v1252_v31 = vmul.f32 %v6611_v30, %v6603_v11  ;;  %v7142_v11 = vadd.f32 %v5585_v10, %v7025_v37 }
 0x3f4   : > { %5985 = vmatmul.mubr.msk.f32.vlgmr.msra.gmra.mrb[8].mxu0 %vm1165_vm3, %v1252_v31  ;;  %v1932_v31 = vlaneseq }
 0x3f5   : > { %5993 = vmatpush3.msra.mxu0 %v1417_v28  ;;  %5994 = vmatprep.mubr.msk.f32.mxu0 %vm6743_vm0, %v6744_v4 }
 0x3f6   : > { %6002 = vmatprep.subr.mxu0 %v6744_v4 }
 0x44f   : > { %v1412_v32 = vpop.xlane.xlu0 %1411 }
 0x450   : > { %6612 = vrcp.f32 %v1412_v32 }
 0x453   : > { %v1578_v34 = vpop.xlane.xlu1 %1577 }
 0x454   : > { %6614 = vrcp.f32 %v1578_v34  ;;  %v7174_v34 = vshrl.u32 %v1932_v31, 7 }
 0x457   : > { %v1743_v35 = vpop.xlane.xlu0 %1742  ;;  %v1747_v42 = vpop.permute.xlu1 %1746 }
 0x458   : > { %6616 = vrcp.f32 %v1743_v35  ;;  %v7177_v35 = vsub.s32 0, %v7174_v34 }
 0x45a   : > { %v6613_v36 = vpop.eup %6612 }
 0x45b   : > { %v1414_v38 = vmul.f32 %v6613_v36, %v6605_v22  ;;  %v1582_v39 = vpop.permute.xlu0 %1581  ;;  %v7182_v36 = vld [vmem:[%s7891_s19] sm:$0x7] }
 0x45d   : > { %5995 = vmatmul.mubr.msk.f32.vlgmr.msra.gmra.mrb[10].mxu0 %vm1165_vm3, %v1414_v38  ;;  %v7187_v38 = vld [vmem:[%s7892_s20] sm:$0x7] }
 0x45e   : > { %v6615_v40 = vpop.eup %6614  ;;  %6003 = vmatpush3.msra.mxu0 %v1582_v39  ;;  %6004 = vmatprep.mubr.msk.f32.mxu0 %vm6743_vm0, %v6744_v4  ;;  %v1935_v39 = vrot.slane %v7182_v36, %v7177_v35 }
 0x45f   : > { %v1580_v41 = vmul.f32 %v6615_v40, %v6607_v24  ;;  %6012 = vmatprep.subr.mxu0 %v6744_v4  ;;  %v1943_v24 = vld [vmem:[%s7884_s12 + $0x8] sm:$0xff] }
 0x460   : > { %v6417_v25 = vpack.c.bf16 %v1943_v24, %v1942_v23 }
 0x461   : > { %6005 = vmatmul.mubr.msk.f32.vlgmr.msra.gmra.mrb[12].mxu0 %vm1165_vm3, %v1580_v41 }
 0x462   : > { %v6617_v43 = vpop.eup %6616  ;;  %6013 = vmatpush3.msra.mxu0 %v1747_v42  ;;  %6014 = vmatprep.mubr.msk.f32.mxu0 %vm6743_vm0, %v6744_v4  ;;  %v1940_v42 = vrot.slane %v7187_v38, %v7177_v35 }
 0x463   : > { %v1745_v44 = vmul.f32 %v6617_v43, %v6609_v26  ;;  %6416 = vmatprep.subr.bf16.mxu0 %v6742_v2  ;;  %v1944_v26 = vld [vmem:[%s7884_s12 + $0x10] sm:$0xff]  ;;  %v1950_v43 = vld [vmem:[%s7884_s12 + $0x40] sm:$0xff] }
 0x464   : > { %v6420_v28 = vpack.c.bf16 %v1945_v27, %v1944_v26 }
 0x465   : > { %6015 = vmatmul.mubr.msk.f32.vlgmr.msra.gmra.mrb[14].mxu0 %vm1165_vm3, %v1745_v44  ;;  %v1951_v44 = vld [vmem:[%s7884_s12 + $0x48] sm:$0xff] }
 0x466   : > { %6036 = vmatprep.mubr.msk.f32.mxu0 %vm6743_vm0, %v6744_v4  ;;  %6418 = vmatpush3.bf16.msra.mxu0 %v6417_v25 }
 0x467   : > { %6419 = vmatprep.subr.bf16.mxu0 %v6742_v2 }
 0x46a   : > { %6421 = vmatpush3.bf16.msra.mxu0 %v6420_v28 }
 0x46b   : > { %6428 = vmatprep.subr.bf16.mxu0 %v6742_v2 }
 0x4c7   : > { %v1322_v45 = vpop.f32.mrb[8].mxu0 }
 0x4c8   : > { %v5986_v46 = vpop.f32.mrb[9].mxu0 }
 0x4c9   : > { %v6429_v46 = vpack.c.bf16 %v1951_v44, %v1950_v43 }
 0x530   : > { %v1488_v54 = vpop.f32.mrb[10].mxu0 }
 0x531   : > { %1823 = vrot.lane.b32.xlu1 %v1488_v54, %s7910_s6  ;;  %v5996_v55 = vpop.f32.mrb[11].mxu0  ;;  %s7945_s6 = sld [smem:[#allocation14_spill]] }
 0x534   : > { %v1653_v56 = vpop.f32.mrb[12].mxu0 }
 0x535   : > { %1827 = vrot.lane.b32.xlu0 %v1653_v56, %s7908_s26  ;;  %v6006_v57 = vpop.f32.mrb[13].mxu0 }
 0x537   : > { %s753_s26 = scalar_lea.vmem %s7945_s6, %s6937_s1  ;;  %s7947_s1 = smov 16  }
 0x538   : > { %v1818_v58 = vpop.f32.mrb[14].mxu0 }
 0x539   : > { %1831 = vrot.lane.b32.xlu1 %v1818_v58, %s7906_s28  ;;  %v6016_v59 = vpop.f32.mrb[15].mxu0  ;;  %s7948_s28 = smov 24  }
 0x5a3   : > { %v1824_v60 = vpop.permute.xlu1 %1823 }
 0x5a4   : > { %v1834_v0 = vsel %vm1165_vm3, %v1322_v45, %v1824_v60 }
 0x5a7   : > { %v1828_v63 = vpop.permute.xlu0 %1827 }
 0x5a8   : > { %v1835_v3 = vsel %vm772_vm1, %v1834_v0, %v1828_v63  ;;  %v760_v63 = vld [vmem:[%s753_s26] sm:$0x1]  ;;  %s7946_s26 = smov 8  }
 0x5a9   : > { %vm761_vm6 = vcmp.eq.f32.partialorder %v760_v63, 0.0 }
 0x5aa   : > { %v762_v0 = vsel %vm761_vm6, -1e+20, %v6744_v4 }
 0x5ab   : > { %v1832_v5 = vpop.permute.xlu1 %1831 }
 0x5ac   : > { %v1837_v8 = vsel %vm1836_vm5, %v1835_v3, %v1832_v5 }
 0x5ad   : > { %6026 = vmatmul.mubr.msk.f32.vlgmr.msra.gmra.mrb[10].mxu1 %vm858_vm2, %v1837_v8 }
 0x5ae   : > { %6424 = vmatpush3.bf16.msra.mxu1 %v6423_v1  ;;  %6047 = vmatprep.mubr.msk.f32.mxu1 %vm6743_vm0, %v6744_v4  ;;  %v7248_v1 = vrot.slane %v762_v0, %v7177_v35  ;;  %v1954_v0 = vld [vmem:[%s7885_s13] sm:$0xff] }
 0x5af   : > { %6425 = vmatprep.subr.bf16.mxu1 %v6742_v2 }
 0x5b2   : > { %6427 = vmatpush3.bf16.msra.mxu1 %v6426_v9 }
 0x5b3   : > { %6061 = vmatprep.subr.mxu1 %v6744_v4 }
 0x5b5   : > { %6048 = vmatmul.mubr.msk.f32.vlgmr.msra.gmra.mrb[12].mxu1 %vm858_vm2, %v7142_v11 }
 0x5b6   : > { %6063 = vmatprep.mubr.msk.f32.mxu1 %vm6743_vm0, %v6744_v4 }
 0x680   : > { %v1913_v13 = vpop.f32.mrb[10].mxu1 }
 0x681   : > { %v1914_v14 = vadd.f32 %v5602_v12, %v1913_v13  ;;  %v6027_v15 = vpop.f32.mrb[11].mxu1 }
 0x683   : > { %v1917_v16 = vadd.f32 %v1914_v14, %v7008_v33 }
 0x685   : > { %v1918_v37 = vsel %vm858_vm2, %v1917_v16, 0.0 }
 0x686   : > { %1919 = vadd.xlane.f32.xlu0 %v1918_v37 }
 0x688   : > { %v2102_v17 = vpop.f32.mrb[12].mxu1 }
 0x689   : > { %v6049_v18 = vpop.f32.mrb[13].mxu1  ;;  %6062 = vmatpush3.xpose.msk.msra.mxu1 %vm1165_vm3, %v2102_v17 }
 0x68a   : > { %6071 = vmatprep.subr.mxu1 %v6744_v4 }
 0x69c   : > { %2344 = vrot.lane.b32.xlu0 %v2102_v17, %s7916_s27 }
 0x6a0   : > { %2510 = vrot.lane.b32.xlu0 %v2102_v17, %s7912_s29 }
 0x6a4   : > { %2675 = vrot.lane.b32.xlu0 %v2102_v17, %s7914_s24 }
 0x713   : > { %v1920_v19 = vpop.xlane.xlu0 %1919 }
 0x714   : > { %v1922_v20 = vmul.f32 0.03125, %v1920_v19 }
 0x716   : > { %v1923_v21 = vsub.f32 %v1917_v16, %v1922_v20 }
 0x717   : > { %v2345_v55 = vpop.permute.xlu0 %2344 }
 0x718   : > { %v1924_v22 = vmul.f32 %v1923_v21, %v1923_v21 }
 0x71a   : > { %v1925_v33 = vsel %vm858_vm2, %v1924_v22, 0.0 }
 0x71b   : > { %1926 = vadd.xlane.f32.xlu1 %v1925_v33  ;;  %v2511_v58 = vpop.permute.xlu0 %2510 }
 0x71f   : > { %v2676_v61 = vpop.permute.xlu0 %2675 }
 0x7a8   : > { %v1927_v29 = vpop.xlane.xlu1 %1926 }
 0x7a9   : > { %v1928_v30 = vmul.f32 0.03125, %v1927_v29 }
 0x7ab   : > { %v1929_v32 = vadd.f32 1e-05, %v1928_v30 }
 0x7ad   : > { %6618 = vrsqrt.f32 %v1929_v32 }
 0x7b7   : > { %v6619_v40 = vpop.eup %6618 }
 0x7b8   : > { %v1931_v41 = vmul.f32 %v6619_v40, %v1923_v21 }
 0x7ba   : > { %v1936_v45 = vmul.f32 %v1935_v39, %v1931_v41 }
 0x7bc   : > { %v7199_v47 = vadd.f32 %v1940_v42, %v1936_v45 }
 0x7be   : > { %6037 = vmatmul.mubr.msk.f32.vlgmr.msra.gmra.mrb[16].mxu0 %vm858_vm2, %v7199_v47 }
 0x7bf   : > { %6430 = vmatpush3.bf16.msra.mxu0 %v6429_v46  ;;  %6058 = vmatprep.mubr.msk.f32.mxu0 %vm6743_vm0, %v6744_v4 }
 0x7c0   : > { %6431 = vmatprep.subr.bf16.mxu0 %v6742_v2 }
 0x7c3   : > { %6433 = vmatpush3.bf16.msra.mxu0 %v6432_v50 }
 0x7c4   : > { %6066 = vmatprep.subr.mxu0 %v6744_v4 }
 0x7c6   : > { %6059 = vmatmul.mubr.msk.f32.vlgmr.msra.gmra.mrb[18].mxu0 %vm858_vm2, %v7142_v11 }
 0x7c7   : > { %6068 = vmatprep.mubr.msk.f32.mxu0 %vm6743_vm0, %v6744_v4 }
 0x891   : > { %v2028_v51 = vpop.f32.mrb[16].mxu0 }
 0x892   : > { %v2032_v52 = vmul.f32 0.17677669, %v2028_v51  ;;  %v6038_v54 = vpop.f32.mrb[17].mxu0 }
 0x894   : > { %2342 = vrot.lane.b32.xlu1 %v2032_v52, %s7916_s27  ;;  %6064 = vmatmul.mubr.msk.f32.vlgmr.msra.gmra.mrb[14].mxu1 %vm1165_vm3, %v2032_v52 }
 0x895   : > { %6072 = vmatpush3.xpose.msk.msra.mxu1 %vm1165_vm3, %v2345_v55  ;;  %6073 = vmatprep.mubr.msk.f32.mxu1 %vm6743_vm0, %v6744_v4 }
 0x896   : > { %6081 = vmatprep.subr.mxu1 %v6744_v4 }
 0x898   : > { %2508 = vrot.lane.b32.xlu1 %v2032_v52, %s7912_s29 }
 0x899   : > { %v7224_v56 = vpop.f32.mrb[18].mxu0 }
 0x89a   : > { %v6060_v57 = vpop.f32.mrb[19].mxu0  ;;  %6067 = vmatpush3.msra.mxu0 %v7224_v56 }
 0x89b   : > { %6076 = vmatprep.subr.mxu0 %v6744_v4 }
 0x89c   : > { %2673 = vrot.lane.b32.xlu1 %v2032_v52, %s7914_s24 }
 0x906   : > { %v2343_v59 = vpop.permute.xlu1 %2342 }
 0x907   : > { %6074 = vmatmul.mubr.msk.f32.vlgmr.msra.gmra.mrb[16].mxu1 %vm1165_vm3, %v2343_v59 }
 0x908   : > { %6082 = vmatpush3.xpose.msk.msra.mxu1 %vm1165_vm3, %v2511_v58  ;;  %6083 = vmatprep.mubr.msk.f32.mxu1 %vm6743_vm0, %v6744_v4 }
 0x909   : > { %6091 = vmatprep.subr.mxu1 %v6744_v4 }
 0x90a   : > { %v2509_v60 = vpop.permute.xlu1 %2508 }
 0x90b   : > { %6084 = vmatmul.mubr.msk.f32.vlgmr.msra.gmra.mrb[18].mxu1 %vm1165_vm3, %v2509_v60 }
 0x90c   : > { %6092 = vmatpush3.xpose.msk.msra.mxu1 %vm1165_vm3, %v2676_v61  ;;  %6093 = vmatprep.mubr.msk.f32.mxu1 %vm6743_vm0, %v6744_v4 }
 0x90d   : > { %6434 = vmatprep.subr.bf16.mxu1 %v6742_v2 }
 0x90e   : > { %v2674_v62 = vpop.permute.xlu1 %2673 }
 0x90f   : > { %6094 = vmatmul.mubr.msk.f32.vlgmr.msra.gmra.mrb[20].mxu1 %vm1165_vm3, %v2674_v62 }
 0x910   : > { %6109 = vmatprep.mubr.msk.f32.mxu1 %vm6743_vm0, %v6744_v4 }
 0x967   : > { %v2254_v3 = vpop.f32.mrb[14].mxu1 }
 0x968   : > { %v2255_v5 = vadd.f32 %v2254_v3, %v7248_v1  ;;  %v6065_v6 = vpop.f32.mrb[15].mxu1  ;;  %v1955_v3 = vld [vmem:[%s7885_s13 + $0x8] sm:$0xff] }
 0x969   : > { %v1956_v6 = vld [vmem:[%s7885_s13 + $0x10] sm:$0xff] }
 0x96a   : > { %v2258_v7 = vsel %vm1165_vm3, %v2255_v5, -inf }
 0x96b   : > { %2259 = vmax.xlane.f32.xlu0 %v2258_v7  ;;  %v1957_v7 = vld [vmem:[%s7885_s13 + $0x18] sm:$0xff] }
 0x9da   : > { %v2416_v8 = vpop.f32.mrb[16].mxu1 }
 0x9db   : > { %v2417_v9 = vadd.f32 %v2416_v8, %v7248_v1  ;;  %v6075_v10 = vpop.f32.mrb[17].mxu1  ;;  %v6438_v8 = vpack.c.bf16 %v1957_v7, %v1956_v6  ;;  %v7376_v7 = vsub.s32 1, %v7174_v34 }
 0x9dd   : > { %v2420_v12 = vsel %vm1165_vm3, %v2417_v9, -inf }
 0x9de   : > { %2421 = vmax.xlane.f32.xlu1 %v2420_v12  ;;  %v2582_v13 = vpop.f32.mrb[18].mxu1 }
 0x9df   : > { %v2583_v14 = vadd.f32 %v2582_v13, %v7248_v1  ;;  %v6085_v15 = vpop.f32.mrb[19].mxu1 }
 0x9e1   : > { %v2586_v16 = vsel %vm1165_vm3, %v2583_v14, -inf }
 0x9e2   : > { %2587 = vmax.xlane.f32.xlu0 %v2586_v16  ;;  %v2747_v37 = vpop.f32.mrb[20].mxu1 }
 0x9e3   : > { %v2748_v17 = vadd.f32 %v2747_v37, %v7248_v1  ;;  %v6095_v18 = vpop.f32.mrb[21].mxu1 }
 0x9e5   : > { %v2751_v19 = vsel %vm1165_vm3, %v2748_v17, -inf }
 0x9e6   : > { %2752 = vmax.xlane.f32.xlu0 %v2751_v19 }
 0x9ef   : > { %2432 = vrot.lane.b32.xlu1 %v7224_v56, %s7916_s27  ;;  %s7950_s27 = smov 104  }
 0x9f8   : > { %v2260_v20 = vpop.xlane.xlu0 %2259 }
 0x9f9   : > { %v2261_v21 = vsub.f32 %v2255_v5, %v2260_v20  ;;  %v6435_v5 = vpack.c.bf16 %v1955_v3, %v1954_v0 }
 0x9fb   : > { %v2262_v22 = vmul.f32 1.442695, %v2261_v21  ;;  %6436 = vmatpush3.bf16.msra.mxu1 %v6435_v5  ;;  %v5619_v21 = vld [vmem:[%s7886_s14] ss:$0 sm:$0xff] }
 0x9fc   : > { %6437 = vmatprep.subr.bf16.mxu1 %v6742_v2 }
 0x9fd   : > { %6620 = vpow2.f32 %v2262_v22 }
 0x9ff   : > { %6439 = vmatpush3.bf16.msra.mxu1 %v6438_v8  ;;  %v2949_v8 = vrot.slane %v7182_v36, %v7376_v7 }
 0xa00   : > { %6446 = vmatprep.subr.bf16.mxu1 %v6742_v2 }
 0xa07   : > { %v6621_v33 = vpop.eup %6620 }
 0xa08   : > { %v2264_v23 = vsel %vm1165_vm3, %v6621_v33, 0.0 }
 0xa13   : > { %2265 = vadd.xlane.f32.xlu1 %v2264_v23 }
 0xa6b   : > { %v2422_v24 = vpop.xlane.xlu1 %2421 }
 0xa6c   : > { %v2423_v25 = vsub.f32 %v2417_v9, %v2422_v24 }
 0xa6e   : > { %v2424_v26 = vmul.f32 1.442695, %v2423_v25 }
 0xa6f   : > { %v2588_v27 = vpop.xlane.xlu0 %2587  ;;  %v2433_v45 = vpop.permute.xlu1 %2432 }
 0xa70   : > { %6622 = vpow2.f32 %v2424_v26  ;;  %v2589_v28 = vsub.f32 %v2583_v14, %v2588_v27 }
 0xa72   : > { %v2590_v29 = vmul.f32 1.442695, %v2589_v28 }
 0xa73   : > { %v2753_v30 = vpop.xlane.xlu0 %2752 }
 0xa74   : > { %6624 = vpow2.f32 %v2590_v29  ;;  %v2754_v31 = vsub.f32 %v2748_v17, %v2753_v30 }
 0xa76   : > { %v2755_v32 = vmul.f32 1.442695, %v2754_v31  ;;  %v2956_v31 = vld [vmem:[%s7887_s15] sm:$0xff] }
 0xa78   : > { %6626 = vpow2.f32 %v2755_v32  ;;  %v2957_v32 = vld [vmem:[%s7887_s15 + $0x8] sm:$0xff] }
 0xa7a   : > { %v6623_v39 = vpop.eup %6622 }
 0xa7b   : > { %v2426_v40 = vsel %vm1165_vm3, %v6623_v39, 0.0 }
 0xa7c   : > { %2427 = vadd.xlane.f32.xlu0 %v2426_v40  ;;  %v2959_v40 = vld [vmem:[%s7887_s15 + $0x18] sm:$0xff] }
 0xa7e   : > { %v6625_v41 = vpop.eup %6624 }
 0xa7f   : > { %v2592_v42 = vsel %vm1165_vm3, %v6625_v41, 0.0 }
 0xa80   : > { %2593 = vadd.xlane.f32.xlu1 %v2592_v42  ;;  %v3041_v42 = vld [vmem:[%s7889_s17] sm:$0xff] }
 0xa82   : > { %v6627_v43 = vpop.eup %6626 }
 0xa83   : > { %v2757_v44 = vsel %vm1165_vm3, %v6627_v43, 0.0 }
 0xa84   : > { %2758 = vadd.xlane.f32.xlu0 %v2757_v44  ;;  %v3043_v44 = vld [vmem:[%s7889_s17 + $0x10] sm:$0xff] }
 0xa91   : > { %2762 = vrot.lane.b32.xlu1 %v7224_v56, %s7914_s24  ;;  %s7951_s24 = smov 112  }
 0xa9a   : > { %2597 = vrot.lane.b32.xlu0 %v7224_v56, %s7912_s29  ;;  %s7949_s29 = smov 120  }
 0xaa0   : > { %v2266_v46 = vpop.xlane.xlu1 %2265 }
 0xaa1   : > { %6628 = vrcp.f32 %v2266_v46  ;;  %v3044_v46 = vld [vmem:[%s7889_s17 + $0x18] sm:$0xff] }
 0xaab   : > { %v6629_v48 = vpop.eup %6628 }
 0xaac   : > { %v2268_v49 = vmul.f32 %v6629_v48, %v6621_v33  ;;  %v6450_v48 = vpack.c.bf16 %v3044_v46, %v3043_v44  ;;  %v7417_v46 = vsub.s32 2, %v7174_v34 }
 0xaae   : > { %6069 = vmatmul.mubr.msk.f32.vlgmr.msra.gmra.mrb[20].mxu0 %vm1165_vm3, %v2268_v49  ;;  %v3045_v49 = vld [vmem:[%s7889_s17 + $0x20] sm:$0xff] }
 0xaaf   : > { %6077 = vmatpush3.msra.mxu0 %v2433_v45  ;;  %6078 = vmatprep.mubr.msk.f32.mxu0 %vm6743_vm0, %v6744_v4 }
 0xab0   : > { %6086 = vmatprep.subr.mxu0 %v6744_v4 }
 0xb09   : > { %v2428_v50 = vpop.xlane.xlu0 %2427 }
 0xb0a   : > { %6630 = vrcp.f32 %v2428_v50  ;;  %v3046_v50 = vld [vmem:[%s7889_s17 + $0x28] sm:$0xff] }
 0xb0d   : > { %v2594_v51 = vpop.xlane.xlu1 %2593 }
 0xb0e   : > { %6632 = vrcp.f32 %v2594_v51  ;;  %v6453_v51 = vpack.c.bf16 %v3046_v50, %v3045_v49 }
 0xb11   : > { %v2759_v52 = vpop.xlane.xlu0 %2758  ;;  %v2763_v59 = vpop.permute.xlu1 %2762 }
 0xb12   : > { %6634 = vrcp.f32 %v2759_v52  ;;  %v3047_v52 = vld [vmem:[%s7889_s17 + $0x30] sm:$0xff] }
 0xb14   : > { %v6631_v54 = vpop.eup %6630 }
 0xb15   : > { %v2430_v55 = vmul.f32 %v6631_v54, %v6623_v39  ;;  %v2598_v56 = vpop.permute.xlu0 %2597  ;;  %v6441_v39 = vpack.c.bf16 %v2957_v32, %v2956_v31  ;;  %v3048_v54 = vld [vmem:[%s7889_s17 + $0x38] sm:$0xff]  ;;  %v5626_v32 = vld [vmem:[%s7938_s9 + $0x60] sm:$0xff] }
 0xb17   : > { %6079 = vmatmul.mubr.msk.f32.vlgmr.msra.gmra.mrb[22].mxu0 %vm1165_vm3, %v2430_v55  ;;  %v6456_v55 = vpack.c.bf16 %v3048_v54, %v3047_v52  ;;  %v5630_v52 = vld [vmem:[%s7938_s9 + $0x80] sm:$0xff]  ;;  %v5631_v54 = vld [vmem:[%s7938_s9 + $0x88] sm:$0xff] }
 0xb18   : > { %v6633_v57 = vpop.eup %6632  ;;  %6087 = vmatpush3.msra.mxu0 %v2598_v56  ;;  %6088 = vmatprep.mubr.msk.f32.mxu0 %vm6743_vm0, %v6744_v4  ;;  %v3049_v56 = vld [vmem:[%s7889_s17 + $0x40] sm:$0xff] }
 0xb19   : > { %v2596_v58 = vmul.f32 %v6633_v57, %v6625_v41  ;;  %6096 = vmatprep.subr.mxu0 %v6744_v4  ;;  %v3050_v57 = vld [vmem:[%s7889_s17 + $0x48] sm:$0xff] }
 0xb1b   : > { %6089 = vmatmul.mubr.msk.f32.vlgmr.msra.gmra.mrb[24].mxu0 %vm1165_vm3, %v2596_v58  ;;  %v6459_v58 = vpack.c.bf16 %v3050_v57, %v3049_v56  ;;  %v6477_v56 = vpack.c.bf16 %v5631_v54, %v5630_v52 }
 0xb1c   : > { %v6635_v60 = vpop.eup %6634  ;;  %6097 = vmatpush3.msra.mxu0 %v2763_v59  ;;  %6098 = vmatprep.mubr.msk.f32.mxu0 %vm6743_vm0, %v6744_v4  ;;  %v3051_v59 = vld [vmem:[%s7889_s17 + $0x50] sm:$0xff] }
 0xb1d   : > { %v2761_v61 = vmul.f32 %v6635_v60, %v6627_v43  ;;  %6440 = vmatprep.subr.bf16.mxu0 %v6742_v2  ;;  %v3042_v43 = vld [vmem:[%s7889_s17 + $0x8] sm:$0xff]  ;;  %v3052_v60 = vld [vmem:[%s7889_s17 + $0x58] sm:$0xff] }
 0xb1e   : > { %v6447_v45 = vpack.c.bf16 %v3042_v43, %v3041_v42 }
 0xb1f   : > { %6099 = vmatmul.mubr.msk.f32.vlgmr.msra.gmra.mrb[26].mxu0 %vm1165_vm3, %v2761_v61  ;;  %v6462_v61 = vpack.c.bf16 %v3052_v60, %v3051_v59  ;;  %v5635_v59 = vld [vmem:[%s7938_s9 + $0xa8] sm:$0xff] }
 0xb20   : > { %6120 = vmatprep.mubr.msk.f32.mxu0 %vm6743_vm0, %v6744_v4  ;;  %6442 = vmatpush3.bf16.msra.mxu0 %v6441_v39  ;;  %v5627_v39 = vld [vmem:[%s7938_s9 + $0x68] sm:$0xff] }
 0xb21   : > { %6443 = vmatprep.subr.bf16.mxu0 %v6742_v2 }
 0xb81   : > { %v2338_v62 = vpop.f32.mrb[20].mxu0 }
 0xb82   : > { %v6070_v63 = vpop.f32.mrb[21].mxu0 }
 0xb83   : > { %v3054_v63 = vld [vmem:[%s7889_s17 + $0x68] sm:$0xff] }
 0xbea   : > { %v2504_v9 = vpop.f32.mrb[22].mxu0 }
 0xbeb   : > { %2839 = vrot.lane.b32.xlu1 %v2504_v9, %s7946_s26  ;;  %v6080_v10 = vpop.f32.mrb[23].mxu0 }
 0xbee   : > { %v2669_v12 = vpop.f32.mrb[24].mxu0 }
 0xbef   : > { %2843 = vrot.lane.b32.xlu0 %v2669_v12, %s7947_s1  ;;  %v6090_v13 = vpop.f32.mrb[25].mxu0  ;;  %v2954_v12 = vrot.slane %v7187_v38, %v7376_v7 }
 0xbf2   : > { %v2834_v14 = vpop.f32.mrb[26].mxu0 }
 0xbf3   : > { %2847 = vrot.lane.b32.xlu1 %v2834_v14, %s7948_s28  ;;  %v6100_v15 = vpop.f32.mrb[27].mxu0 }
 0xbf4   : > { %v3055_v15 = vld [vmem:[%s7889_s17 + $0x70] sm:$0xff] }
 0xc5d   : > { %v2840_v16 = vpop.permute.xlu1 %2839 }
 0xc5e   : > { %v2850_v17 = vsel %vm1165_vm3, %v2338_v62, %v2840_v16  ;;  %v3053_v62 = vld [vmem:[%s7889_s17 + $0x60] sm:$0xff]  ;;  %v3056_v16 = vld [vmem:[%s7889_s17 + $0x78] sm:$0xff] }
 0xc5f   : > { %v6465_v0 = vpack.c.bf16 %v3054_v63, %v3053_v62  ;;  %v5637_v62 = vld [vmem:[%s7938_s9 + $0xb8] sm:$0xff] }
 0xc61   : > { %v2844_v37 = vpop.permute.xlu0 %2843 }
 0xc62   : > { %v2851_v18 = vsel %vm772_vm1, %v2850_v17, %v2844_v37  ;;  %v6468_v37 = vpack.c.bf16 %v3056_v16, %v3055_v15  ;;  %v5621_v17 = vld [vmem:[%s7888_s16] ss:$0 sm:$0xff] }
 0xc65   : > { %v2848_v19 = vpop.permute.xlu1 %2847 }
 0xc66   : > { %v2852_v20 = vsel %vm1836_vm5, %v2851_v18, %v2848_v19 }
 0xc67   : > { %6110 = vmatmul.mubr.msk.f32.vlgmr.msra.gmra.mrb[22].mxu1 %vm858_vm2, %v2852_v20 }
 0xc68   : > { %6155 = vmatprep.mubr.msk.f32.mxu1 %vm6743_vm0, %v6744_v4  ;;  %6448 = vmatpush3.bf16.msra.mxu1 %v6447_v45 }
 0xc69   : > { %6449 = vmatprep.subr.bf16.mxu1 %v6742_v2 }
 0xc6c   : > { %6451 = vmatpush3.bf16.msra.mxu1 %v6450_v48  ;;  %v3151_v48 = vrot.slane %v7182_v36, %v7417_v46  ;;  %v5632_v36 = vld [vmem:[%s7938_s9 + $0x90] sm:$0xff] }
 0xc6d   : > { %6452 = vmatprep.subr.bf16.mxu1 %v6742_v2 }
 0xc70   : > { %6454 = vmatpush3.bf16.msra.mxu1 %v6453_v51  ;;  %v3156_v51 = vrot.slane %v7187_v38, %v7417_v46  ;;  %v5633_v38 = vld [vmem:[%s7938_s9 + $0x98] sm:$0xff] }
 0xc71   : > { %6455 = vmatprep.subr.bf16.mxu1 %v6742_v2  ;;  %v6480_v57 = vpack.c.bf16 %v5633_v38, %v5632_v36 }
 0xc74   : > { %6457 = vmatpush3.bf16.msra.mxu1 %v6456_v55 }
 0xc75   : > { %6458 = vmatprep.subr.bf16.mxu1 %v6742_v2 }
 0xc78   : > { %6460 = vmatpush3.bf16.msra.mxu1 %v6459_v58  ;;  %v5634_v58 = vld [vmem:[%s7938_s9 + $0xa0] sm:$0xff] }
 0xc79   : > { %6461 = vmatprep.subr.bf16.mxu1 %v6742_v2  ;;  %v6483_v60 = vpack.c.bf16 %v5635_v59, %v5634_v58 }
 0xc7c   : > { %6463 = vmatpush3.bf16.msra.mxu1 %v6462_v61  ;;  %v5636_v61 = vld [vmem:[%s7938_s9 + $0xb0] sm:$0xff] }
 0xc7d   : > { %6464 = vmatprep.subr.bf16.mxu1 %v6742_v2  ;;  %v6486_v63 = vpack.c.bf16 %v5637_v62, %v5636_v61 }
 0xc80   : > { %6466 = vmatpush3.bf16.msra.mxu1 %v6465_v0 }
 0xc81   : > { %6467 = vmatprep.subr.bf16.mxu1 %v6742_v2 }
 0xc84   : > { %6469 = vmatpush3.bf16.msra.mxu1 %v6468_v37 }
 0xc85   : > { %6201 = vmatprep.subr.mxu1 %v6744_v4 }
 0xd3a   : > { %v2928_v22 = vpop.f32.mrb[22].mxu1 }
 0xd3b   : > { %v2929_v33 = vadd.f32 %v5619_v21, %v2928_v22  ;;  %v6111_v23 = vpop.f32.mrb[23].mxu1  ;;  %v5623_v22 = vld [vmem:[%s7890_s18] ss:$0 sm:$0xff] }
 0xd3d   : > { %v2932_v24 = vadd.f32 %v2929_v33, %v7199_v47  ;;  %v2958_v47 = vld [vmem:[%s7887_s15 + $0x10] sm:$0xff] }
 0xd3e   : > { %v6444_v41 = vpack.c.bf16 %v2959_v40, %v2958_v47  ;;  %v6471_v47 = vpack.c.bf16 %v5627_v39, %v5626_v32  ;;  %v5628_v40 = vld [vmem:[%s7938_s9 + $0x70] sm:$0xff] }
 0xd3f   : > { %v2933_v25 = vsel %vm858_vm2, %v2932_v24, 0.0 }
 0xd40   : > { %2934 = vadd.xlane.f32.xlu0 %v2933_v25  ;;  %6445 = vmatpush3.bf16.msra.mxu0 %v6444_v41  ;;  %v5629_v41 = vld [vmem:[%s7938_s9 + $0x78] sm:$0xff]  ;;  %s5579_s9 = sshll.u32 %s736_s8, 3 }
 0xd41   : > { %6470 = vmatprep.subr.bf16.mxu0 %v6742_v2  ;;  %v6474_v42 = vpack.c.bf16 %v5629_v41, %v5628_v40  ;;  %s738_s25 = scalar_lea.vmem [#allocation2], %s5579_s9 }
 0xd42   : > { %s5483_s3 = sshll.u32 %s738_s25, 4  ;;  %s7831_s3 = int_to_ptr.vmem [resolvable:$true] %s5483_s3 }
 0xd43   : > { %s6678_s0 = scalar_lea.vmem %s7831_s3, 128 }
 0xd44   : > { %p6679_p11 = scmp.ne.s32.totalorder %s7831_s3, %s6678_s0 }
 0xd46   : > { %p6680_p12 = pnand %p6679_p11, %p6910_p5 }
 0xd48   : > { %p6681_p13 = pneg %p6680_p12 }
 0xdcd   : > { %v2935_v26 = vpop.xlane.xlu0 %2934 }
 0xdce   : > { %v2936_v27 = vmul.f32 0.03125, %v2935_v26 }
 0xdd0   : > { %v2937_v28 = vsub.f32 %v2932_v24, %v2936_v27 }
 0xdd2   : > { %v2938_v29 = vmul.f32 %v2937_v28, %v2937_v28 }
 0xdd4   : > { %v2939_v30 = vsel %vm858_vm2, %v2938_v29, 0.0 }
 0xdd5   : > { %2940 = vadd.xlane.f32.xlu1 %v2939_v30 }
 0xe62   : > { %v2941_v3 = vpop.xlane.xlu1 %2940 }
 0xe63   : > { %v2942_v5 = vmul.f32 0.03125, %v2941_v3 }
 0xe65   : > { %v2943_v6 = vadd.f32 1e-05, %v2942_v5 }
 0xe67   : > { %6636 = vrsqrt.f32 %v2943_v6 }
 0xe71   : > { %v6637_v9 = vpop.eup %6636 }
 0xe72   : > { %v2945_v10 = vmul.f32 %v6637_v9, %v2937_v28 }
 0xe74   : > { %v2950_v13 = vmul.f32 %v2949_v8, %v2945_v10 }
 0xe76   : > { %v2955_v14 = vadd.f32 %v2954_v12, %v2950_v13 }
 0xe78   : > { %6121 = vmatmul.mubr.msk.f32.vlgmr.msra.gmra.mrb[28].mxu0 %vm858_vm2, %v2955_v14 }
 0xe79   : > { %6166 = vmatprep.mubr.msk.f32.mxu0 %vm6743_vm0, %v6744_v4  ;;  %6472 = vmatpush3.bf16.msra.mxu0 %v6471_v47 }
 0xe7a   : > { %6473 = vmatprep.subr.bf16.mxu0 %v6742_v2 }
 0xe7d   : > { %6475 = vmatpush3.bf16.msra.mxu0 %v6474_v42 }
 0xe7e   : > { %6476 = vmatprep.subr.bf16.mxu0 %v6742_v2 }
 0xf4b   : > { %v3036_v18 = vpop.f32.mrb[28].mxu0 }
 0xf4c   : > { %v3037_v19 = vadd.f32 %v5621_v17, %v3036_v18  ;;  %v6122_v20 = vpop.f32.mrb[29].mxu0 }
 0xf4e   : > { %v3040_v21 = vmax.f32 %v3037_v19, 0.0 }
 0xf50   : > { %6156 = vmatmul.mubr.f32.vlgmr.msra.gmra.mrb[24].mxu1 %v3040_v21 }
 0xf51   : > { %6203 = vmatprep.mubr.msk.f32.mxu1 %vm6743_vm0, %v6744_v4 }
0x1023   : > { %v3130_v33 = vpop.f32.mrb[24].mxu1 }
0x1024   : > { %v3131_v23 = vadd.f32 %v5623_v22, %v3130_v33  ;;  %v6157_v24 = vpop.f32.mrb[25].mxu1 }
0x1026   : > { %v3134_v25 = vadd.f32 %v3131_v23, %v2955_v14 }
0x1028   : > { %v3135_v26 = vsel %vm858_vm2, %v3134_v25, 0.0 }
0x1029   : > { %3136 = vadd.xlane.f32.xlu0 %v3135_v26 }
0x10b6   : > { %v3137_v27 = vpop.xlane.xlu0 %3136 }
0x10b7   : > { %v3138_v28 = vmul.f32 0.03125, %v3137_v27 }
0x10b9   : > { %v3139_v29 = vsub.f32 %v3134_v25, %v3138_v28 }
0x10bb   : > { %v3140_v30 = vmul.f32 %v3139_v29, %v3139_v29 }
0x10bd   : > { %v3141_v31 = vsel %vm858_vm2, %v3140_v30, 0.0 }
0x10be   : > { %3142 = vadd.xlane.f32.xlu0 %v3141_v31 }
0x114b   : > { %v3143_v43 = vpop.xlane.xlu0 %3142 }
0x114c   : > { %v3144_v44 = vmul.f32 0.03125, %v3143_v43 }
0x114e   : > { %v3145_v45 = vadd.f32 1e-05, %v3144_v44 }
0x1150   : > { %6638 = vrsqrt.f32 %v3145_v45 }
0x115a   : > { %v6639_v49 = vpop.eup %6638 }
0x115b   : > { %v3147_v50 = vmul.f32 %v6639_v49, %v3139_v29 }
0x115d   : > { %v3152_v55 = vmul.f32 %v3151_v48, %v3147_v50 }
0x115f   : > { %v7429_v34 = vadd.f32 %v3156_v51, %v3152_v55 }
0x1161   : > { %6167 = vmatmul.mubr.msk.f32.vlgmr.msra.gmra.mrb[30].mxu0 %vm858_vm2, %v7429_v34 }
0x1162   : > { %6478 = vmatpush3.bf16.msra.mxu0 %v6477_v56  ;;  %6177 = vmatprep.mubr.msk.f32.mxu0 %vm6743_vm0, %v6744_v4 }
0x1163   : > { %6479 = vmatprep.subr.bf16.mxu0 %v6742_v2 }
0x1166   : > { %6481 = vmatpush3.bf16.msra.mxu0 %v6480_v57 }
0x1167   : > { %6482 = vmatprep.subr.bf16.mxu0 %v6742_v2 }
0x1169   : > { %6178 = vmatmul.mubr.msk.f32.vlgmr.msra.gmra.mrb[32].mxu0 %vm858_vm2, %v7429_v34 }
0x116a   : > { %6484 = vmatpush3.bf16.msra.mxu0 %v6483_v60  ;;  %6188 = vmatprep.mubr.msk.f32.mxu0 %vm6743_vm0, %v6744_v4 }
0x116b   : > { %6485 = vmatprep.subr.bf16.mxu0 %v6742_v2 }
0x116e   : > { %6487 = vmatpush3.bf16.msra.mxu0 %v6486_v63 }
0x116f   : > { %6191 = vmatprep.subr.mxu0 %v6744_v4 }
0x1171   : > { %6189 = vmatmul.mubr.msk.f32.vlgmr.msra.gmra.mrb[34].mxu0 %vm858_vm2, %v7429_v34 }
0x1172   : > { %6193 = vmatprep.mubr.msk.f32.mxu0 %vm6743_vm0, %v6744_v4 }
0x1234   : > { %v3251_v0 = vpop.f32.mrb[30].mxu0 }
0x1235   : > { %v3255_v3 = vmul.f32 0.17677669, %v3251_v0  ;;  %v6168_v5 = vpop.f32.mrb[31].mxu0 }
0x1237   : > { %3556 = vrot.lane.b32.xlu0 %v3255_v3, %s7949_s29 }
0x123c   : > { %v3322_v6 = vpop.f32.mrb[32].mxu0 }
0x123d   : > { %3889 = vrot.lane.b32.xlu0 %v3322_v6, %s7950_s27  ;;  %3558 = vrot.lane.b32.xlu1 %v3322_v6, %s7949_s29  ;;  %v6179_v8 = vpop.f32.mrb[33].mxu0 }
0x123e   : > { %6192 = vmatpush3.xpose.msk.msra.mxu0 %vm1165_vm3, %v3322_v6 }
0x123f   : > { %6196 = vmatprep.subr.mxu0 %v6744_v4 }
0x1241   : > { %6194 = vmatmul.mubr.msk.f32.vlgmr.msra.gmra.mrb[36].mxu0 %vm1165_vm3, %v3255_v3  ;;  %3724 = vrot.lane.b32.xlu1 %v3322_v6, %s7951_s24 }
0x1242   : > { %6198 = vmatprep.mubr.msk.f32.mxu0 %vm6743_vm0, %v6744_v4 }
0x1244   : > { %v7474_v9 = vpop.f32.mrb[34].mxu0 }
0x1245   : > { %3722 = vrot.lane.b32.xlu1 %v3255_v3, %s7951_s24  ;;  %v6190_v10 = vpop.f32.mrb[35].mxu0  ;;  %6197 = vmatpush3.msra.mxu0 %v7474_v9 }
0x1246   : > { %6206 = vmatprep.subr.mxu0 %v6744_v4 }
0x1249   : > { %3887 = vrot.lane.b32.xlu1 %v3255_v3, %s7950_s27 }
0x12a9   : > { %v3557_v13 = vpop.permute.xlu0 %3556 }
0x12af   : > { %v3559_v12 = vpop.permute.xlu1 %3558  ;;  %v3890_v16 = vpop.permute.xlu0 %3889 }
0x12b0   : > { %6202 = vmatpush3.xpose.msk.msra.mxu1 %vm1165_vm3, %v3559_v12 }
0x12b1   : > { %6211 = vmatprep.subr.mxu1 %v6744_v4 }
0x12b3   : > { %6204 = vmatmul.mubr.msk.f32.vlgmr.msra.gmra.mrb[26].mxu1 %vm1165_vm3, %v3557_v13  ;;  %v3725_v14 = vpop.permute.xlu1 %3724 }
0x12b4   : > { %6212 = vmatpush3.xpose.msk.msra.mxu1 %vm1165_vm3, %v3725_v14  ;;  %6213 = vmatprep.mubr.msk.f32.mxu1 %vm6743_vm0, %v6744_v4 }
0x12b5   : > { %6221 = vmatprep.subr.mxu1 %v6744_v4 }
0x12b7   : > { %v3723_v15 = vpop.permute.xlu1 %3722 }
0x12b8   : > { %6214 = vmatmul.mubr.msk.f32.vlgmr.msra.gmra.mrb[28].mxu1 %vm1165_vm3, %v3723_v15  ;;  %v5638_v15 = vld [vmem:[%s7882_s10 + $0x20] sm:$0xff] }
0x12b9   : > { %6222 = vmatpush3.xpose.msk.msra.mxu1 %vm1165_vm3, %v3890_v16  ;;  %6223 = vmatprep.mubr.msk.f32.mxu1 %vm6743_vm0, %v6744_v4  ;;  %v5639_v16 = vld [vmem:[%s7882_s10 + $0x28] sm:$0xff] }
0x12ba   : > { %6488 = vmatprep.subr.bf16.mxu1 %v6742_v2 }
0x12bb   : > { %v3888_v37 = vpop.permute.xlu1 %3887 }
0x12bc   : > { %6224 = vmatmul.mubr.msk.f32.vlgmr.msra.gmra.mrb[30].mxu1 %vm1165_vm3, %v3888_v37  ;;  %v6489_v37 = vpack.c.bf16 %v5639_v16, %v5638_v15  ;;  %v5670_v15 = vld [vmem:[%s7884_s12 + $0xb0] sm:$0xff] }
0x12bd   : > { %6239 = vmatprep.mubr.msk.f32.mxu1 %vm6743_vm0, %v6744_v4 }
0x12be   : > { %6490 = vmatpush3.bf16.msra.mxu1 %v6489_v37 }
0x12bf   : > { %6491 = vmatprep.subr.bf16.mxu1 %v6742_v2 }
0x1314   : > { %v3468_v17 = vpop.f32.mrb[36].mxu0 }
0x1315   : > { %v3469_v18 = vadd.f32 %v3468_v17, %v7067_v53  ;;  %v6195_v19 = vpop.f32.mrb[37].mxu0  ;;  %v5640_v17 = vld [vmem:[%s7882_s10 + $0x30] sm:$0xff] }
0x1317   : > { %v3472_v20 = vsel %vm1165_vm3, %v3469_v18, -inf }
0x1318   : > { %3473 = vmax.xlane.f32.xlu0 %v3472_v20 }
0x1386   : > { %v3630_v21 = vpop.f32.mrb[26].mxu1 }
0x1387   : > { %v3631_v22 = vadd.f32 %v3630_v21, %v7067_v53  ;;  %v6205_v33 = vpop.f32.mrb[27].mxu1 }
0x1389   : > { %v3634_v23 = vsel %vm1165_vm3, %v3631_v22, -inf }
0x138a   : > { %3635 = vmax.xlane.f32.xlu1 %v3634_v23 }
0x138b   : > { %v3796_v24 = vpop.f32.mrb[28].mxu1 }
0x138c   : > { %v3797_v25 = vadd.f32 %v3796_v24, %v7067_v53  ;;  %v6215_v26 = vpop.f32.mrb[29].mxu1 }
0x138d   : > { %v5664_v26 = vld [vmem:[%s7884_s12 + $0x80] sm:$0xff] }
0x138e   : > { %v3800_v27 = vsel %vm1165_vm3, %v3797_v25, -inf }
0x138f   : > { %v3961_v28 = vpop.f32.mrb[30].mxu1  ;;  %3801 = vmax.xlane.f32.xlu0 %v3800_v27  ;;  %v5665_v27 = vld [vmem:[%s7884_s12 + $0x88] sm:$0xff] }
0x1390   : > { %v3962_v29 = vadd.f32 %v3961_v28, %v7067_v53  ;;  %v6225_v30 = vpop.f32.mrb[31].mxu1 }
0x1391   : > { %v6501_v30 = vpack.c.bf16 %v5665_v27, %v5664_v26 }
0x1392   : > { %v3965_v31 = vsel %vm1165_vm3, %v3962_v29, -inf }
0x1393   : > { %3966 = vmax.xlane.f32.xlu0 %v3965_v31 }
0x139b   : > { %3646 = vrot.lane.b32.xlu1 %v7474_v9, %s7949_s29 }
0x13a5   : > { %v3474_v32 = vpop.xlane.xlu0 %3473 }
0x13a6   : > { %v3475_v39 = vsub.f32 %v3469_v18, %v3474_v32  ;;  %v5641_v18 = vld [vmem:[%s7882_s10 + $0x38] sm:$0xff] }
0x13a7   : > { %v6492_v19 = vpack.c.bf16 %v5641_v18, %v5640_v17 }
0x13a8   : > { %v3476_v47 = vmul.f32 1.442695, %v3475_v39  ;;  %v5666_v39 = vld [vmem:[%s7884_s12 + $0x90] sm:$0xff] }
0x13a9   : > { %6493 = vmatpush3.bf16.msra.mxu1 %v6492_v19 }
0x13aa   : > { %6640 = vpow2.f32 %v3476_v47  ;;  %6500 = vmatprep.subr.bf16.mxu1 %v6742_v2  ;;  %v5667_v47 = vld [vmem:[%s7884_s12 + $0x98] sm:$0xff] }
0x13b4   : > { %v6641_v40 = vpop.eup %6640 }
0x13b5   : > { %v3478_v41 = vsel %vm1165_vm3, %v6641_v40, 0.0 }
0x13bf   : > { %3479 = vadd.xlane.f32.xlu1 %v3478_v41  ;;  %v6504_v41 = vpack.c.bf16 %v5667_v47, %v5666_v39 }
0x1417   : > { %v3636_v42 = vpop.xlane.xlu1 %3635 }
0x1418   : > { %v3637_v43 = vsub.f32 %v3631_v22, %v3636_v42  ;;  %v5658_v42 = vld [vmem:[%s7883_s11 + $0x1] ss:$0 sm:$0xff] }
0x141a   : > { %v3638_v44 = vmul.f32 1.442695, %v3637_v43 }
0x141b   : > { %v3647_v57 = vpop.permute.xlu1 %3646 }
0x141c   : > { %6642 = vpow2.f32 %v3638_v44  ;;  %v3802_v53 = vpop.xlane.xlu0 %3801 }
0x141d   : > { %v3803_v45 = vsub.f32 %v3797_v25, %v3802_v53 }
0x141f   : > { %v3804_v48 = vmul.f32 1.442695, %v3803_v45 }
0x1420   : > { %v3967_v49 = vpop.xlane.xlu0 %3966 }
0x1421   : > { %6644 = vpow2.f32 %v3804_v48  ;;  %v3968_v50 = vsub.f32 %v3962_v29, %v3967_v49 }
0x1423   : > { %v3969_v51 = vmul.f32 1.442695, %v3968_v50 }
0x1425   : > { %6646 = vpow2.f32 %v3969_v51 }
0x1426   : > { %v6643_v52 = vpop.eup %6642 }
0x1427   : > { %v3640_v54 = vsel %vm1165_vm3, %v6643_v52, 0.0 }
0x1428   : > { %3641 = vadd.xlane.f32.xlu0 %v3640_v54 }
0x142b   : > { %v6645_v55 = vpop.eup %6644 }
0x142c   : > { %v3806_v56 = vsel %vm1165_vm3, %v6645_v55, 0.0 }
0x142d   : > { %3807 = vadd.xlane.f32.xlu1 %v3806_v56  ;;  %v5660_v56 = vld [vmem:[%s7884_s12 + $0x60] sm:$0xff] }
0x142f   : > { %v6647_v36 = vpop.eup %6646 }
0x1430   : > { %v3971_v38 = vsel %vm1165_vm3, %v6647_v36, 0.0 }
0x1431   : > { %3972 = vadd.xlane.f32.xlu0 %v3971_v38 }
0x143e   : > { %3976 = vrot.lane.b32.xlu1 %v7474_v9, %s7950_s27 }
0x1447   : > { %3811 = vrot.lane.b32.xlu0 %v7474_v9, %s7951_s24 }
0x144c   : > { %v3480_v58 = vpop.xlane.xlu1 %3479 }
0x144d   : > { %6648 = vrcp.f32 %v3480_v58  ;;  %v5663_v58 = vld [vmem:[%s7884_s12 + $0x78] sm:$0xff] }
0x1457   : > { %v6649_v59 = vpop.eup %6648 }
0x1458   : > { %v3482_v60 = vmul.f32 %v6649_v59, %v6641_v40 }
0x145a   : > { %6199 = vmatmul.mubr.msk.f32.vlgmr.msra.gmra.mrb[38].mxu0 %vm1165_vm3, %v3482_v60 }
0x145b   : > { %6207 = vmatpush3.msra.mxu0 %v3647_v57  ;;  %6208 = vmatprep.mubr.msk.f32.mxu0 %vm6743_vm0, %v6744_v4  ;;  %v5662_v57 = vld [vmem:[%s7884_s12 + $0x70] sm:$0xff] }
0x145c   : > { %6216 = vmatprep.subr.mxu0 %v6744_v4  ;;  %v6498_v59 = vpack.c.bf16 %v5663_v58, %v5662_v57 }
0x14b5   : > { %v3642_v61 = vpop.xlane.xlu0 %3641 }
0x14b6   : > { %6650 = vrcp.f32 %v3642_v61 }
0x14ba   : > { %v3808_v62 = vpop.xlane.xlu1 %3807 }
0x14bb   : > { %6652 = vrcp.f32 %v3808_v62 }
0x14be   : > { %v3973_v63 = vpop.xlane.xlu0 %3972  ;;  %v3977_v9 = vpop.permute.xlu1 %3976 }
0x14bf   : > { %6654 = vrcp.f32 %v3973_v63  ;;  %v7597_v63 = vld [vmem:[%s7891_s19 + $0x4] sm:$0x7] }
0x14c0   : > { %v6651_v0 = vpop.eup %6650 }
0x14c1   : > { %v3644_v3 = vmul.f32 %v6651_v0, %v6643_v52  ;;  %v7602_v0 = vld [vmem:[%s7892_s20 + $0x4] sm:$0x7] }
0x14c2   : > { %v3812_v5 = vpop.permute.xlu0 %3811 }
0x14c3   : > { %6209 = vmatmul.mubr.msk.f32.vlgmr.msra.gmra.mrb[40].mxu0 %vm1165_vm3, %v3644_v3  ;;  %v4163_v3 = vrot.slane %v7597_v63, %v7177_v35 }
0x14c4   : > { %6217 = vmatpush3.msra.mxu0 %v3812_v5  ;;  %6218 = vmatprep.mubr.msk.f32.mxu0 %vm6743_vm0, %v6744_v4 }
0x14c5   : > { %v6653_v6 = vpop.eup %6652  ;;  %6226 = vmatprep.subr.mxu0 %v6744_v4 }
0x14c6   : > { %v3810_v8 = vmul.f32 %v6653_v6, %v6645_v55 }
0x14c8   : > { %6219 = vmatmul.mubr.msk.f32.vlgmr.msra.gmra.mrb[42].mxu0 %vm1165_vm3, %v3810_v8  ;;  %v4168_v8 = vrot.slane %v7602_v0, %v7177_v35  ;;  %v5671_v35 = vld [vmem:[%s7884_s12 + $0xb8] sm:$0xff] }
0x14c9   : > { %v6655_v10 = vpop.eup %6654  ;;  %6227 = vmatpush3.msra.mxu0 %v3977_v9  ;;  %6228 = vmatprep.mubr.msk.f32.mxu0 %vm6743_vm0, %v6744_v4  ;;  %v5668_v9 = vld [vmem:[%s7884_s12 + $0xa0] sm:$0xff]  ;;  %v6510_v16 = vpack.c.bf16 %v5671_v35, %v5670_v15 }
0x14ca   : > { %v3975_v12 = vmul.f32 %v6655_v10, %v6647_v36  ;;  %6494 = vmatprep.subr.bf16.mxu0 %v6742_v2  ;;  %v5661_v36 = vld [vmem:[%s7884_s12 + $0x68] sm:$0xff] }
0x14cb   : > { %v6495_v38 = vpack.c.bf16 %v5661_v36, %v5660_v56  ;;  %v5669_v10 = vld [vmem:[%s7884_s12 + $0xa8] sm:$0xff] }
0x14cc   : > { %6229 = vmatmul.mubr.msk.f32.vlgmr.msra.gmra.mrb[44].mxu0 %vm1165_vm3, %v3975_v12 }
0x14cd   : > { %6250 = vmatprep.mubr.msk.f32.mxu0 %vm6743_vm0, %v6744_v4  ;;  %6496 = vmatpush3.bf16.msra.mxu0 %v6495_v38 }
0x14ce   : > { %6497 = vmatprep.subr.bf16.mxu0 %v6742_v2 }
0x14d1   : > { %6499 = vmatpush3.bf16.msra.mxu0 %v6498_v59 }
0x14d2   : > { %6506 = vmatprep.subr.bf16.mxu0 %v6742_v2 }
0x152d   : > { %v3552_v13 = vpop.f32.mrb[38].mxu0 }
0x152e   : > { %v6200_v14 = vpop.f32.mrb[39].mxu0 }
0x1596   : > { %v3718_v20 = vpop.f32.mrb[40].mxu0 }
0x1597   : > { %4053 = vrot.lane.b32.xlu1 %v3718_v20, %s7946_s26  ;;  %v6210_v21 = vpop.f32.mrb[41].mxu0 }
0x159b   : > { %v3883_v22 = vpop.f32.mrb[42].mxu0 }
0x159c   : > { %4057 = vrot.lane.b32.xlu0 %v3883_v22, %s7947_s1  ;;  %v6220_v33 = vpop.f32.mrb[43].mxu0 }
0x159f   : > { %v4048_v23 = vpop.f32.mrb[44].mxu0 }
0x15a0   : > { %4061 = vrot.lane.b32.xlu1 %v4048_v23, %s7948_s28  ;;  %v6230_v24 = vpop.f32.mrb[45].mxu0 }
0x1609   : > { %v4054_v25 = vpop.permute.xlu1 %4053 }
0x160a   : > { %v4064_v29 = vsel %vm1165_vm3, %v3552_v13, %v4054_v25  ;;  %v6507_v13 = vpack.c.bf16 %v5669_v10, %v5668_v9 }
0x160e   : > { %v4058_v28 = vpop.permute.xlu0 %4057 }
0x160f   : > { %v4065_v31 = vsel %vm772_vm1, %v4064_v29, %v4058_v28 }
0x1612   : > { %v4062_v32 = vpop.permute.xlu1 %4061 }
0x1613   : > { %v4066_v40 = vsel %vm1836_vm5, %v4065_v31, %v4062_v32 }
0x1614   : > { %6240 = vmatmul.mubr.msk.f32.vlgmr.msra.gmra.mrb[32].mxu1 %vm858_vm2, %v4066_v40 }
0x1615   : > { %6502 = vmatpush3.bf16.msra.mxu1 %v6501_v30  ;;  %6261 = vmatprep.mubr.msk.f32.mxu1 %vm6743_vm0, %v6744_v4 }
0x1616   : > { %6503 = vmatprep.subr.bf16.mxu1 %v6742_v2 }
0x1619   : > { %6505 = vmatpush3.bf16.msra.mxu1 %v6504_v41 }
0x161a   : > { %6275 = vmatprep.subr.mxu1 %v6744_v4 }
0x161c   : > { %6262 = vmatmul.mubr.msk.f32.vlgmr.msra.gmra.mrb[34].mxu1 %vm858_vm2, %v7142_v11 }
0x161d   : > { %6277 = vmatprep.mubr.msk.f32.mxu1 %vm6743_vm0, %v6744_v4 }
0x16e7   : > { %v4142_v43 = vpop.f32.mrb[32].mxu1 }
0x16e8   : > { %v4143_v44 = vadd.f32 %v5658_v42, %v4142_v43  ;;  %v6241_v53 = vpop.f32.mrb[33].mxu1 }
0x16ea   : > { %v4146_v45 = vadd.f32 %v4143_v44, %v7429_v34 }
0x16ec   : > { %v4147_v48 = vsel %vm858_vm2, %v4146_v45, 0.0 }
0x16ed   : > { %4148 = vadd.xlane.f32.xlu0 %v4147_v48 }
0x16ef   : > { %v4330_v49 = vpop.f32.mrb[34].mxu1 }
0x16f0   : > { %v6263_v50 = vpop.f32.mrb[35].mxu1  ;;  %6276 = vmatpush3.xpose.msk.msra.mxu1 %vm1165_vm3, %v4330_v49 }
0x16f1   : > { %6285 = vmatprep.subr.mxu1 %v6744_v4 }
0x1703   : > { %4566 = vrot.lane.b32.xlu0 %v4330_v49, %s7949_s29 }
0x1707   : > { %4732 = vrot.lane.b32.xlu0 %v4330_v49, %s7951_s24 }
0x170b   : > { %4897 = vrot.lane.b32.xlu0 %v4330_v49, %s7950_s27 }
0x177a   : > { %v4149_v51 = vpop.xlane.xlu0 %4148 }
0x177b   : > { %v4150_v52 = vmul.f32 0.03125, %v4149_v51 }
0x177d   : > { %v4151_v54 = vsub.f32 %v4146_v45, %v4150_v52 }
0x177e   : > { %v4567_v19 = vpop.permute.xlu0 %4566 }
0x177f   : > { %v4152_v55 = vmul.f32 %v4151_v54, %v4151_v54 }
0x1781   : > { %v4153_v34 = vsel %vm858_vm2, %v4152_v55, 0.0 }
0x1782   : > { %4154 = vadd.xlane.f32.xlu1 %v4153_v34  ;;  %v4733_v21 = vpop.permute.xlu0 %4732 }
0x1786   : > { %v4898_v23 = vpop.permute.xlu0 %4897 }
0x180f   : > { %v4155_v60 = vpop.xlane.xlu1 %4154 }
0x1810   : > { %v4156_v61 = vmul.f32 0.03125, %v4155_v60 }
0x1812   : > { %v4157_v62 = vadd.f32 1e-05, %v4156_v61 }
0x1814   : > { %6656 = vrsqrt.f32 %v4157_v62 }
0x181e   : > { %v6657_v5 = vpop.eup %6656 }
0x181f   : > { %v4159_v6 = vmul.f32 %v6657_v5, %v4151_v54 }
0x1821   : > { %v4164_v12 = vmul.f32 %v4163_v3, %v4159_v6 }
0x1823   : > { %v7614_v14 = vadd.f32 %v4168_v8, %v4164_v12 }
0x1825   : > { %6251 = vmatmul.mubr.msk.f32.vlgmr.msra.gmra.mrb[46].mxu0 %vm858_vm2, %v7614_v14 }
0x1826   : > { %6508 = vmatpush3.bf16.msra.mxu0 %v6507_v13  ;;  %6272 = vmatprep.mubr.msk.f32.mxu0 %vm6743_vm0, %v6744_v4 }
0x1827   : > { %6509 = vmatprep.subr.bf16.mxu0 %v6742_v2 }
0x182a   : > { %6511 = vmatpush3.bf16.msra.mxu0 %v6510_v16 }
0x182b   : > { %6280 = vmatprep.subr.mxu0 %v6744_v4 }
0x182d   : > { %6273 = vmatmul.mubr.msk.f32.vlgmr.msra.gmra.mrb[48].mxu0 %vm858_vm2, %v7142_v11 }
0x182e   : > { %6282 = vmatprep.mubr.msk.f32.mxu0 %vm6743_vm0, %v6744_v4 }
0x18f8   : > { %v4259_v37 = vpop.f32.mrb[46].mxu0 }
0x18f9   : > { %v4263_v17 = vmul.f32 0.17677669, %v4259_v37  ;;  %v6252_v18 = vpop.f32.mrb[47].mxu0 }
0x18fb   : > { %4564 = vrot.lane.b32.xlu1 %v4263_v17, %s7949_s29  ;;  %6278 = vmatmul.mubr.msk.f32.vlgmr.msra.gmra.mrb[36].mxu1 %vm1165_vm3, %v4263_v17 }
0x18fc   : > { %6286 = vmatpush3.xpose.msk.msra.mxu1 %vm1165_vm3, %v4567_v19  ;;  %6287 = vmatprep.mubr.msk.f32.mxu1 %vm6743_vm0, %v6744_v4 }
0x18fd   : > { %6295 = vmatprep.subr.mxu1 %v6744_v4 }
0x18ff   : > { %4730 = vrot.lane.b32.xlu1 %v4263_v17, %s7951_s24 }
0x1900   : > { %v7639_v11 = vpop.f32.mrb[48].mxu0 }
0x1901   : > { %v6274_v20 = vpop.f32.mrb[49].mxu0  ;;  %6281 = vmatpush3.msra.mxu0 %v7639_v11 }
0x1902   : > { %6290 = vmatprep.subr.mxu0 %v6744_v4 }
0x1903   : > { %4895 = vrot.lane.b32.xlu1 %v4263_v17, %s7950_s27 }
0x196d   : > { %v4565_v22 = vpop.permute.xlu1 %4564 }
0x196e   : > { %6288 = vmatmul.mubr.msk.f32.vlgmr.msra.gmra.mrb[38].mxu1 %vm1165_vm3, %v4565_v22  ;;  %v5672_v22 = vld [vmem:[%s7885_s13 + $0x20] sm:$0xff] }
0x196f   : > { %6296 = vmatpush3.xpose.msk.msra.mxu1 %vm1165_vm3, %v4733_v21  ;;  %6297 = vmatprep.mubr.msk.f32.mxu1 %vm6743_vm0, %v6744_v4 }
0x1970   : > { %6305 = vmatprep.subr.mxu1 %v6744_v4 }
0x1971   : > { %v4731_v33 = vpop.permute.xlu1 %4730 }
0x1972   : > { %6298 = vmatmul.mubr.msk.f32.vlgmr.msra.gmra.mrb[40].mxu1 %vm1165_vm3, %v4731_v33  ;;  %v5673_v33 = vld [vmem:[%s7885_s13 + $0x28] sm:$0xff] }
0x1973   : > { %6306 = vmatpush3.xpose.msk.msra.mxu1 %vm1165_vm3, %v4898_v23  ;;  %6307 = vmatprep.mubr.msk.f32.mxu1 %vm6743_vm0, %v6744_v4  ;;  %v6513_v23 = vpack.c.bf16 %v5673_v33, %v5672_v22  ;;  %v5171_v33 = vrot.slane %v7597_v63, %v7376_v7 }
0x1974   : > { %6512 = vmatprep.subr.bf16.mxu1 %v6742_v2 }
0x1975   : > { %v4896_v24 = vpop.permute.xlu1 %4895 }
0x1976   : > { %6308 = vmatmul.mubr.msk.f32.vlgmr.msra.gmra.mrb[42].mxu1 %vm1165_vm3, %v4896_v24  ;;  %v5674_v24 = vld [vmem:[%s7885_s13 + $0x30] sm:$0xff] }
0x1977   : > { %6323 = vmatprep.mubr.msk.f32.mxu1 %vm6743_vm0, %v6744_v4  ;;  %6514 = vmatpush3.bf16.msra.mxu1 %v6513_v23 }
0x1978   : > { %6515 = vmatprep.subr.bf16.mxu1 %v6742_v2 }
0x19ce   : > { %v4476_v25 = vpop.f32.mrb[36].mxu1 }
0x19cf   : > { %v4477_v26 = vadd.f32 %v4476_v25, %v7248_v1  ;;  %v6279_v27 = vpop.f32.mrb[37].mxu1  ;;  %v5675_v25 = vld [vmem:[%s7885_s13 + $0x38] sm:$0xff] }
0x19d1   : > { %v4480_v28 = vsel %vm1165_vm3, %v4477_v26, -inf }
0x19d2   : > { %4481 = vmax.xlane.f32.xlu0 %v4480_v28 }
0x1a41   : > { %v4638_v29 = vpop.f32.mrb[38].mxu1 }
0x1a42   : > { %v4639_v30 = vadd.f32 %v4638_v29, %v7248_v1  ;;  %v6289_v31 = vpop.f32.mrb[39].mxu1 }
0x1a44   : > { %v4642_v32 = vsel %vm1165_vm3, %v4639_v30, -inf }
0x1a45   : > { %4643 = vmax.xlane.f32.xlu1 %v4642_v32  ;;  %v4804_v39 = vpop.f32.mrb[40].mxu1 }
0x1a46   : > { %v4805_v47 = vadd.f32 %v4804_v39, %v7248_v1  ;;  %v6299_v40 = vpop.f32.mrb[41].mxu1 }
0x1a48   : > { %v4808_v41 = vsel %vm1165_vm3, %v4805_v47, -inf }
0x1a49   : > { %4809 = vmax.xlane.f32.xlu0 %v4808_v41  ;;  %v4969_v42 = vpop.f32.mrb[42].mxu1 }
0x1a4a   : > { %v4970_v43 = vadd.f32 %v4969_v42, %v7248_v1  ;;  %v6309_v44 = vpop.f32.mrb[43].mxu1 }
0x1a4b   : > { %v5692_v44 = vld [vmem:[%s7886_s14 + $0x1] ss:$0 sm:$0xff] }
0x1a4c   : > { %v4973_v53 = vsel %vm1165_vm3, %v4970_v43, -inf }
0x1a4d   : > { %4974 = vmax.xlane.f32.xlu0 %v4973_v53 }
0x1a56   : > { %4654 = vrot.lane.b32.xlu1 %v7639_v11, %s7949_s29 }
0x1a5f   : > { %v4482_v45 = vpop.xlane.xlu0 %4481 }
0x1a60   : > { %v4483_v48 = vsub.f32 %v4477_v26, %v4482_v45  ;;  %v6516_v26 = vpack.c.bf16 %v5675_v25, %v5674_v24  ;;  %v5176_v25 = vrot.slane %v7602_v0, %v7376_v7  ;;  %v5699_v7 = vld [vmem:[%s7888_s16 + $0x1] ss:$0 sm:$0xff] }
0x1a62   : > { %v4484_v49 = vmul.f32 1.442695, %v4483_v48  ;;  %6517 = vmatpush3.bf16.msra.mxu1 %v6516_v26 }
0x1a63   : > { %6524 = vmatprep.subr.bf16.mxu1 %v6742_v2 }
0x1a64   : > { %6658 = vpow2.f32 %v4484_v49 }
0x1a6e   : > { %v6659_v50 = vpop.eup %6658 }
0x1a6f   : > { %v4486_v51 = vsel %vm1165_vm3, %v6659_v50, 0.0 }
0x1a7a   : > { %4487 = vadd.xlane.f32.xlu1 %v4486_v51 }
0x1ad2   : > { %v4644_v52 = vpop.xlane.xlu1 %4643 }
0x1ad3   : > { %v4645_v54 = vsub.f32 %v4639_v30, %v4644_v52 }
0x1ad5   : > { %v4646_v55 = vmul.f32 1.442695, %v4645_v54 }
0x1ad6   : > { %v4810_v34 = vpop.xlane.xlu0 %4809  ;;  %v4655_v5 = vpop.permute.xlu1 %4654 }
0x1ad7   : > { %6660 = vpow2.f32 %v4646_v55  ;;  %v4811_v1 = vsub.f32 %v4805_v47, %v4810_v34 }
0x1ad9   : > { %v4812_v56 = vmul.f32 1.442695, %v4811_v1  ;;  %v5694_v1 = vld [vmem:[%s7887_s15 + $0x20] sm:$0xff] }
0x1ada   : > { %v4975_v36 = vpop.xlane.xlu0 %4974 }
0x1adb   : > { %6662 = vpow2.f32 %v4812_v56  ;;  %v4976_v38 = vsub.f32 %v4970_v43, %v4975_v36  ;;  %v5695_v56 = vld [vmem:[%s7887_s15 + $0x28] sm:$0xff] }
0x1adc   : > { %v6519_v36 = vpack.c.bf16 %v5695_v56, %v5694_v1 }
0x1add   : > { %v4977_v57 = vmul.f32 1.442695, %v4976_v38  ;;  %v5697_v38 = vld [vmem:[%s7887_s15 + $0x38] sm:$0xff] }
0x1adf   : > { %6664 = vpow2.f32 %v4977_v57 }
0x1ae1   : > { %v6661_v58 = vpop.eup %6660 }
0x1ae2   : > { %v4648_v59 = vsel %vm1165_vm3, %v6661_v58, 0.0 }
0x1ae3   : > { %4649 = vadd.xlane.f32.xlu0 %v4648_v59  ;;  %v5702_v59 = vld [vmem:[%s7889_s17 + $0x88] sm:$0xff] }
0x1ae5   : > { %v6663_v60 = vpop.eup %6662 }
0x1ae6   : > { %v4814_v61 = vsel %vm1165_vm3, %v6663_v60, 0.0 }
0x1ae7   : > { %4815 = vadd.xlane.f32.xlu1 %v4814_v61 }
0x1ae9   : > { %v6665_v62 = vpop.eup %6664 }
0x1aea   : > { %v4979_v3 = vsel %vm1165_vm3, %v6665_v62, 0.0 }
0x1aeb   : > { %4980 = vadd.xlane.f32.xlu0 %v4979_v3 }
0x1af8   : > { %4984 = vrot.lane.b32.xlu1 %v7639_v11, %s7950_s27 }
0x1b01   : > { %4819 = vrot.lane.b32.xlu0 %v7639_v11, %s7951_s24  ;;  %s5470_s24 = scalar_lea.sflag [#allocation3], %s736_s8 }
0x1b07   : > { %v4488_v6 = vpop.xlane.xlu1 %4487 }
0x1b08   : > { %6666 = vrcp.f32 %v4488_v6  ;;  %v5706_v6 = vld [vmem:[%s7889_s17 + $0xa8] sm:$0xff] }
0x1b12   : > { %v6667_v8 = vpop.eup %6666 }
0x1b13   : > { %v4490_v9 = vmul.f32 %v6667_v8, %v6659_v50 }
0x1b15   : > { %6283 = vmatmul.mubr.msk.f32.vlgmr.msra.gmra.mrb[50].mxu0 %vm1165_vm3, %v4490_v9  ;;  %v5707_v9 = vld [vmem:[%s7889_s17 + $0xb0] sm:$0xff] }
0x1b16   : > { %6291 = vmatpush3.msra.mxu0 %v4655_v5  ;;  %6292 = vmatprep.mubr.msk.f32.mxu0 %vm6743_vm0, %v6744_v4  ;;  %v5705_v5 = vld [vmem:[%s7889_s17 + $0xa0] sm:$0xff] }
0x1b17   : > { %6300 = vmatprep.subr.mxu0 %v6744_v4  ;;  %v6531_v8 = vpack.c.bf16 %v5706_v6, %v5705_v5 }
0x1b70   : > { %v4650_v10 = vpop.xlane.xlu0 %4649 }
0x1b71   : > { %6668 = vrcp.f32 %v4650_v10  ;;  %v5708_v10 = vld [vmem:[%s7889_s17 + $0xb8] sm:$0xff] }
0x1b74   : > { %v4816_v12 = vpop.xlane.xlu1 %4815 }
0x1b75   : > { %6670 = vrcp.f32 %v4816_v12  ;;  %v6534_v12 = vpack.c.bf16 %v5708_v10, %v5707_v9 }
0x1b78   : > { %v4981_v13 = vpop.xlane.xlu0 %4980  ;;  %v4985_v18 = vpop.permute.xlu1 %4984 }
0x1b79   : > { %6672 = vrcp.f32 %v4981_v13  ;;  %v5709_v13 = vld [vmem:[%s7889_s17 + $0xc0] sm:$0xff] }
0x1b7b   : > { %v6669_v15 = vpop.eup %6668 }
0x1b7c   : > { %v4652_v35 = vmul.f32 %v6669_v15, %v6661_v58  ;;  %v4820_v16 = vpop.permute.xlu0 %4819  ;;  %v5701_v58 = vld [vmem:[%s7889_s17 + $0x80] sm:$0xff]  ;;  %v5710_v15 = vld [vmem:[%s7889_s17 + $0xc8] sm:$0xff] }
0x1b7d   : > { %v6525_v61 = vpack.c.bf16 %v5702_v59, %v5701_v58  ;;  %v5382_v58 = vrot.slane %v7602_v0, %v7417_v46 }
0x1b7e   : > { %6293 = vmatmul.mubr.msk.f32.vlgmr.msra.gmra.mrb[52].mxu0 %vm1165_vm3, %v4652_v35  ;;  %v6537_v35 = vpack.c.bf16 %v5710_v15, %v5709_v13 }
0x1b7f   : > { %v6671_v37 = vpop.eup %6670  ;;  %6301 = vmatpush3.msra.mxu0 %v4820_v16  ;;  %6302 = vmatprep.mubr.msk.f32.mxu0 %vm6743_vm0, %v6744_v4  ;;  %v5711_v16 = vld [vmem:[%s7889_s17 + $0xd0] sm:$0xff] }
0x1b80   : > { %v4818_v17 = vmul.f32 %v6671_v37, %v6663_v60  ;;  %6310 = vmatprep.subr.mxu0 %v6744_v4  ;;  %v5703_v60 = vld [vmem:[%s7889_s17 + $0x90] sm:$0xff]  ;;  %v5712_v37 = vld [vmem:[%s7889_s17 + $0xd8] sm:$0xff] }
0x1b82   : > { %6303 = vmatmul.mubr.msk.f32.vlgmr.msra.gmra.mrb[54].mxu0 %vm1165_vm3, %v4818_v17  ;;  %v6540_v17 = vpack.c.bf16 %v5712_v37, %v5711_v16 }
0x1b83   : > { %v6673_v19 = vpop.eup %6672  ;;  %6311 = vmatpush3.msra.mxu0 %v4985_v18  ;;  %6312 = vmatprep.mubr.msk.f32.mxu0 %vm6743_vm0, %v6744_v4  ;;  %v5713_v18 = vld [vmem:[%s7889_s17 + $0xe0] sm:$0xff] }
0x1b84   : > { %v4983_v11 = vmul.f32 %v6673_v19, %v6665_v62  ;;  %6518 = vmatprep.subr.bf16.mxu0 %v6742_v2  ;;  %v5704_v62 = vld [vmem:[%s7889_s17 + $0x98] sm:$0xff]  ;;  %v5714_v19 = vld [vmem:[%s7889_s17 + $0xe8] sm:$0xff] }
0x1b85   : > { %v6528_v3 = vpack.c.bf16 %v5704_v62, %v5703_v60 }
0x1b86   : > { %6313 = vmatmul.mubr.msk.f32.vlgmr.msra.gmra.mrb[56].mxu0 %vm1165_vm3, %v4983_v11  ;;  %v6543_v11 = vpack.c.bf16 %v5714_v19, %v5713_v18 }
0x1b87   : > { %6334 = vmatprep.mubr.msk.f32.mxu0 %vm6743_vm0, %v6744_v4  ;;  %6520 = vmatpush3.bf16.msra.mxu0 %v6519_v36 }
0x1b88   : > { %6521 = vmatprep.subr.bf16.mxu0 %v6742_v2 }
0x1be8   : > { %v4560_v20 = vpop.f32.mrb[50].mxu0 }
0x1be9   : > { %v6284_v21 = vpop.f32.mrb[51].mxu0 }
0x1c51   : > { %v4726_v27 = vpop.f32.mrb[52].mxu0 }
0x1c52   : > { %5061 = vrot.lane.b32.xlu1 %v4726_v27, %s7946_s26  ;;  %v6294_v28 = vpop.f32.mrb[53].mxu0 }
0x1c53   : > { %v5715_v28 = vld [vmem:[%s7889_s17 + $0xf0] sm:$0xff] }
0x1c55   : > { %v4891_v29 = vpop.f32.mrb[54].mxu0 }
0x1c56   : > { %5065 = vrot.lane.b32.xlu0 %v4891_v29, %s7947_s1  ;;  %v6304_v30 = vpop.f32.mrb[55].mxu0  ;;  %v5716_v29 = vld [vmem:[%s7889_s17 + $0xf8] sm:$0xff] }
0x1c57   : > { %v6546_v30 = vpack.c.bf16 %v5716_v29, %v5715_v28 }
0x1c59   : > { %v5056_v31 = vpop.f32.mrb[56].mxu0 }
0x1c5a   : > { %5069 = vrot.lane.b32.xlu1 %v5056_v31, %s7948_s28  ;;  %v6314_v32 = vpop.f32.mrb[57].mxu0  ;;  %s5722_s28 = sshll.u32 %s6893_s5, 7  ;;  %s6751_s5 = smov [#allocation2]  }
0x1c5b   : > { %s7829_s27 = scalar_lea.hbm %s7895_s23, %s5722_s28  ;;  %s6682_s4 = sshll.u32 %s6751_s5, 4  ;;  %s6683_s4 = int_to_ptr.vmem [resolvable:$false] %s6682_s4 }
0x1c5c   : > { %s6684_s2 = scalar_lea.vmem %s6683_s4, 256  ;;  %p6685_p0 = scmp.lt.s32.totalorder %s7831_s3, %s6683_s4 }
0x1c5d   : > { %p6686_p1 = scmp.lt.s32.totalorder %s6684_s2, %s6678_s0 }
0x1c5f   : > { %p6687_p2 = por %p6686_p1, %p6685_p0 }
0x1c61   : > { %p6688_p3 = pnand %p6687_p2, %p6681_p13 }
0x1cc4   : > { %v5062_v39 = vpop.permute.xlu1 %5061 }
0x1cc5   : > { %v5072_v40 = vsel %vm1165_vm3, %v4560_v20, %v5062_v39 }
0x1cc8   : > { %v5066_v47 = vpop.permute.xlu0 %5065 }
0x1cc9   : > { %v5073_v41 = vsel %vm772_vm1, %v5072_v40, %v5066_v47 }
0x1ccc   : > { %v5070_v42 = vpop.permute.xlu1 %5069 }
0x1ccd   : > { %v5074_v43 = vsel %vm1836_vm5, %v5073_v41, %v5070_v42 }
0x1cce   : > { %6324 = vmatmul.mubr.msk.f32.vlgmr.msra.gmra.mrb[44].mxu1 %vm858_vm2, %v5074_v43 }
0x1ccf   : > { %6369 = vmatprep.mubr.msk.f32.mxu1 %vm6743_vm0, %v6744_v4  ;;  %6526 = vmatpush3.bf16.msra.mxu1 %v6525_v61  ;;  %v5719_v61 = vld [vmem:[%s7894_s22] ss:$0 sm:$0xff] }
0x1cd0   : > { %6527 = vmatprep.subr.bf16.mxu1 %v6742_v2 }
0x1cd3   : > { %6529 = vmatpush3.bf16.msra.mxu1 %v6528_v3 }
0x1cd4   : > { %6530 = vmatprep.subr.bf16.mxu1 %v6742_v2 }
0x1cd7   : > { %6532 = vmatpush3.bf16.msra.mxu1 %v6531_v8 }
0x1cd8   : > { %6533 = vmatprep.subr.bf16.mxu1 %v6742_v2 }
0x1cdb   : > { %6535 = vmatpush3.bf16.msra.mxu1 %v6534_v12 }
0x1cdc   : > { %6536 = vmatprep.subr.bf16.mxu1 %v6742_v2 }
0x1cdf   : > { %6538 = vmatpush3.bf16.msra.mxu1 %v6537_v35 }
0x1ce0   : > { %6539 = vmatprep.subr.bf16.mxu1 %v6742_v2 }
0x1ce3   : > { %6541 = vmatpush3.bf16.msra.mxu1 %v6540_v17 }
0x1ce4   : > { %6542 = vmatprep.subr.bf16.mxu1 %v6742_v2 }
0x1ce7   : > { %6544 = vmatpush3.bf16.msra.mxu1 %v6543_v11 }
0x1ce8   : > { %6545 = vmatprep.subr.bf16.mxu1 %v6742_v2 }
0x1ceb   : > { %6547 = vmatpush3.bf16.msra.mxu1 %v6546_v30 }
0x1da1   : > { %v5150_v53 = vpop.f32.mrb[44].mxu1 }
0x1da2   : > { %v5151_v45 = vadd.f32 %v5692_v44, %v5150_v53  ;;  %v6325_v48 = vpop.f32.mrb[45].mxu1 }
0x1da4   : > { %v5154_v49 = vadd.f32 %v5151_v45, %v7614_v14  ;;  %v5696_v14 = vld [vmem:[%s7887_s15 + $0x30] sm:$0xff] }
0x1da5   : > { %v6522_v57 = vpack.c.bf16 %v5697_v38, %v5696_v14  ;;  %v5377_v38 = vrot.slane %v7597_v63, %v7417_v46 }
0x1da6   : > { %v5155_v50 = vsel %vm858_vm2, %v5154_v49, 0.0 }
0x1da7   : > { %5156 = vadd.xlane.f32.xlu0 %v5155_v50  ;;  %6523 = vmatpush3.bf16.msra.mxu0 %v6522_v57 }
0x1da8   : > { %6548 = vmatprep.subr.bf16.mxu0 %v6742_v2 }
0x1e34   : > { %v5157_v51 = vpop.xlane.xlu0 %5156 }
0x1e35   : > { %v5158_v52 = vmul.f32 0.03125, %v5157_v51  ;;  %v5384_v51 = vld [vmem:[%s7893_s21] sm:$0xff] }
0x1e37   : > { %v5159_v54 = vsub.f32 %v5154_v49, %v5158_v52  ;;  %v5385_v52 = vld [vmem:[%s7893_s21 + $0x8] sm:$0xff] }
0x1e39   : > { %v5160_v55 = vmul.f32 %v5159_v54, %v5159_v54 }
0x1e3b   : > { %v5161_v34 = vsel %vm858_vm2, %v5160_v55, 0.0  ;;  %v5386_v55 = vld [vmem:[%s7893_s21 + $0x10] sm:$0xff] }
0x1e3c   : > { %5162 = vadd.xlane.f32.xlu1 %v5161_v34  ;;  %v5387_v34 = vld [vmem:[%s7893_s21 + $0x18] sm:$0xff] }
0x1e3d   : > { %v6552_v1 = vpack.c.bf16 %v5387_v34, %v5386_v55 }
0x1ec9   : > { %v5163_v20 = vpop.xlane.xlu1 %5162 }
0x1eca   : > { %v5164_v21 = vmul.f32 0.03125, %v5163_v20 }
0x1ecc   : > { %v5165_v22 = vadd.f32 1e-05, %v5164_v21 }
0x1ece   : > { %6674 = vrsqrt.f32 %v5165_v22 }
0x1ed8   : > { %v6675_v23 = vpop.eup %6674 }
0x1ed9   : > { %v5167_v24 = vmul.f32 %v6675_v23, %v5159_v54  ;;  %v6549_v54 = vpack.c.bf16 %v5385_v52, %v5384_v51 }
0x1edb   : > { %v5172_v26 = vmul.f32 %v5171_v33, %v5167_v24 }
0x1edd   : > { %v5177_v27 = vadd.f32 %v5176_v25, %v5172_v26 }
0x1edf   : > { %6335 = vmatmul.mubr.msk.f32.vlgmr.msra.gmra.mrb[58].mxu0 %vm858_vm2, %v5177_v27 }
0x1ee0   : > { %6380 = vmatprep.mubr.msk.f32.mxu0 %vm6743_vm0, %v6744_v4  ;;  %v5718_v4 = vld [vmem:[%s7890_s18 + $0x1] ss:$0 sm:$0xff]  ;;  %6550 = vmatpush3.bf16.msra.mxu0 %v6549_v54 }
0x1ee1   : > { %6551 = vmatprep.subr.bf16.mxu0 %v6742_v2 }
0x1ee4   : > { %6553 = vmatpush3.bf16.msra.mxu0 %v6552_v1 }
0x1fb2   : > { %v5260_v31 = vpop.f32.mrb[58].mxu0 }
0x1fb3   : > { %v5261_v32 = vadd.f32 %v5699_v7, %v5260_v31  ;;  %v6336_v39 = vpop.f32.mrb[59].mxu0 }
0x1fb5   : > { %v5264_v47 = vmax.f32 %v5261_v32, 0.0 }
0x1fb7   : > { %6370 = vmatmul.mubr.f32.vlgmr.msra.gmra.mrb[46].mxu1 %v5264_v47 }
0x208a   : > { %v5356_v40 = vpop.f32.mrb[46].mxu1 }
0x208b   : > { %v5357_v41 = vadd.f32 %v5718_v4, %v5356_v40  ;;  %v6371_v42 = vpop.f32.mrb[47].mxu1 }
0x208d   : > { %v5360_v43 = vadd.f32 %v5357_v41, %v5177_v27 }
0x208f   : > { %v5361_v44 = vsel %vm858_vm2, %v5360_v43, 0.0 }
0x2090   : > { %5362 = vadd.xlane.f32.xlu0 %v5361_v44 }
0x211d   : > { %v5363_v53 = vpop.xlane.xlu0 %5362 }
0x211e   : > { %v5364_v45 = vmul.f32 0.03125, %v5363_v53 }
0x2120   : > { %v5365_v48 = vsub.f32 %v5360_v43, %v5364_v45 }
0x2122   : > { %v5366_v49 = vmul.f32 %v5365_v48, %v5365_v48 }
0x2124   : > { %v5367_v50 = vsel %vm858_vm2, %v5366_v49, 0.0 }
0x2125   : > { %5368 = vadd.xlane.f32.xlu0 %v5367_v50 }
0x21b2   : > { %v5369_v56 = vpop.xlane.xlu0 %5368 }
0x21b3   : > { %v5370_v36 = vmul.f32 0.03125, %v5369_v56 }
0x21b5   : > { %v5371_v14 = vadd.f32 1e-05, %v5370_v36 }
0x21b7   : > { %6676 = vrsqrt.f32 %v5371_v14 }
0x21c1   : > { %v6677_v2 = vpop.eup %6676 }
0x21c2   : > { %v5373_v57 = vmul.f32 %v6677_v2, %v5365_v48 }
0x21c4   : > { %v5378_v59 = vmul.f32 %v5377_v38, %v5373_v57 }
0x21c6   : > { %v5383_v60 = vadd.f32 %v5382_v58, %v5378_v59 }
0x21c8   : > { %6381 = vmatmul.mubr.msk.f32.vlgmr.msra.gmra.mrb[60].mxu0 %vm858_vm2, %v5383_v60 }
0x229b   : > { %v5464_v63 = vpop.f32.mrb[60].mxu0 }
0x229c   : > { %v5465_v62 = vadd.f32 %v5719_v61, %v5464_v63  ;;  %v6382_v3 = vpop.f32.mrb[61].mxu0 }
0x229e   : > { %5468 = vst.msk [vmem:[%s738_s25] sm:$0xff] %vm772_vm1, %v5465_v62 }
0x229f   : > { %6691 = shalt.err (!%p6688_p3)
}
0x22a0   : > { %s6692_s8 = scalar_lea.hbm %s7829_s27, 128  ;;  %s6696_s1 = scalar_lea.hbm %s7895_s23, 256 }
0x22a1   : > { %p6693_p4 = scmp.ne.s32.totalorder %s7829_s27, %s6692_s8  ;;  %p6697_p9 = scmp.lt.u32.totalorder %s7829_s27, %s7895_s23 }
0x22a2   : > { %p6698_p10 = scmp.lt.u32.totalorder %s6696_s1, %s6692_s8  ;;  %p6700_p12 = scmp.lt.u32.totalorder %s6692_s8, %s7829_s27 }
0x22a3   : > { %p6694_p7 = pnand %p6693_p4, %p6910_p5 }
0x22a4   : > { %p6699_p11 = por %p6698_p10, %p6697_p9 }
0x22a5   : > { %p6695_p8 = pneg %p6694_p7 }
0x22a6   : > { %p6701_p13 = por %p6700_p12, %p6699_p11 }
0x22a8   : > { %p6702_p0 = pnand %p6701_p13, %p6695_p8 }
0x22aa   : > { %6705 = shalt.err (!%p6702_p0)
}
0x22ab   : > { %6554 = dma.vmem_to_hbm [thread:$0]  (%p6910_p5), %s7831_s3, 128, %s7829_s27, %s5470_s24  }
0x22ac PF: > { %s7952_s6 = sld [smem:[#allocation7_spill]]  ;;  %s7953_s29 = sld [smem:[#allocation5_spill]] }
0x22b2   : > { %p6560_p1 = scmp.ge.s32.totalorder %s7952_s6, 2  ;;  %s5495_s5 = sand.u32 1, %s7953_s29  }
0x22b3   : > { %s5496_s4 = scalar_lea.sflag [#allocation3], %s5495_s5 }
0x22b4   : > { %p6557_p2 = pnand %p6560_p1, %p6914_p6 }
0x22b6   : > { %6723 = dma.done.wait (!%p6557_p2), %s5496_s4, 128  }
0x22b7   : > { %6725 = vsyncadd (!%p6557_p2), %s5496_s4, 4294967168  ;;  %s7955_s25 = sld [smem:[#allocation8_spill]]  ;;  %s7956_s2 = sld [smem:[#allocation6_spill]] }
0x22b8   : > { %s7957_s24 = sld [smem:[#allocation9_spill]]  ;;  %s7958_s4 = smov %s6732_s30 }
0x22bd   : > { %p33_p3 = scmp.ge.s32.totalorder %s7955_s25, 4   ;;  %s7959_s30 = smov %s7956_s2 }
0x22bf   :  { %35 = sbr.rel (!%p33_p3) target bundleno = 14 (0xe), region = 168 }
0x22c6   :  { %5501 = vsyncpa [#allocation3], 1 }
0x22c7   :  { %5503 = vsyncpa [#allocation3 + $0x1], 1 }

</bundles_post_ra>
